<compile_context>
chip_gen: v7x
topology: tpu7x:2x2x1
jax: 0.10.0
libtpu: 0.0.40
codegen_flags: <defaults>
</compile_context>

<pallas_src>
import numpy as np
import jax
import jax.numpy as jnp
from jax.experimental import pallas as pl
from jax.experimental.pallas import tpu as pltpu

SLICE_START = 1460
L_IN     = 2190                      # total signal length
L_FFT    = L_IN - SLICE_START        # 730
C1, K1   = 16, 7
L1       = L_FFT - K1 + 1            # 724
L_POOL   = L1 // 2                   # 362
C2, K2   = 8, 7
L2       = L_POOL - K2 + 1           # 356
FLAT     = C2 * L2                   # 2848
L2_PAD   = 384                       # 356 padded up to a multiple of 128 (lane-dense stores)
FLAT_PAD = C2 * L2_PAD               # 3072
H1, H2   = 1024, 128

BT   = 8                             # batch rows per conv grid step (sublane-full)
KPAD = 64                            # K1*BT = 56 padded to 64 (bf16 sublane-friendly)


def _make_pmat_np():
    """[724, 362] matrix with 0.5 at (2u, u) and (2u+1, u): pooled = h1 @ pmat (exact)."""
    rows = np.arange(L1)[:, None]
    cols = np.arange(L_POOL)[None, :]
    return np.where((rows == 2 * cols) | (rows == 2 * cols + 1), 0.5, 0.0).astype(np.float32)


def prepare_params(params):
    """Repack PyTorch-shaped weights into kernel layouts (call once, outside the hot path)."""
    (c1w, c1b, c2w, c2b, f1w, f1b, f2w, f2b, f3w, f3b) = params
    eye = jnp.eye(BT, dtype=jnp.float32)

    # Conv1d(1->16,k7) as one MXU push: W1big[c*BT+b, k*BT+b'] = w1[c,k]*delta(b,b').
    w1 = c1w[:, 0, :].astype(jnp.float32)                                    # [16, 7]
    w1big = jnp.einsum('ck,bd->cbkd', w1, eye).reshape(C1 * BT, K1 * BT)     # [128, 56]
    w1big = jnp.pad(w1big, ((0, 0), (0, KPAD - K1 * BT))).astype(jnp.bfloat16)  # [128, 64]
    b1col = jnp.repeat(c1b.astype(jnp.float32), BT)[:, None]                 # [128, 1]

    # AvgPool1d(2,2) as a matmul against a fixed 0/0.5 matrix (exact in bf16, resident).
    pmat = jnp.asarray(_make_pmat_np()).astype(jnp.bfloat16)                 # [724, 362]

    # Conv1d(16->8,k7): per-tap block-diagonal weights for 7 accumulating dots:
    #   w2taps[k, o*BT+b, c*BT+b'] = c2w[o,c,k] * delta(b,b')
    w2taps = jnp.einsum('ock,bd->kobcd', c2w.astype(jnp.float32), eye)
    w2taps = w2taps.reshape(K2, C2 * BT, C1 * BT).astype(jnp.bfloat16)       # [7, 64, 128]
    b2col = jnp.repeat(c2b.astype(jnp.float32), BT)[:, None]                 # [64, 1]

    # Linear(2848,1024): [out,in] -> [in,out], rows permuted/zero-padded to the lane-padded
    # (o*384 + t) conv flatten, stored bf16 (accumulation stays f32 in-kernel).
    w1l = f1w.T.reshape(C2, L2, H1)
    w1l = jnp.pad(w1l, ((0, 0), (0, L2_PAD - L2), (0, 0)))
    w1l = w1l.reshape(FLAT_PAD, H1).astype(jnp.bfloat16)                     # [3072, 1024]
    b1l = f1b.reshape(1, H1).astype(jnp.float32)
    w2l = f2w.T.astype(jnp.bfloat16)                                         # [1024, 128]
    b2l = f2b.reshape(1, H2).astype(jnp.float32)

    # Classifier padded to a lane-dense 128-multiple output; real columns first.
    n_classes = int(f3w.shape[0])
    ncp = ((n_classes + 127) // 128) * 128
    w3l = jnp.zeros((H2, ncp), jnp.float32).at[:, :n_classes].set(f3w.T).astype(jnp.bfloat16)
    b3l = jnp.zeros((1, ncp), jnp.float32).at[:, :n_classes].set(f3b.astype(jnp.float32))
    return (w1big, b1col, pmat, w2taps, b2col, w1l, b1l, w2l, b2l, w3l, b3l, n_classes)


def conv_block_kernel(x_ref, w1big_ref, b1col_ref, pmat_ref, w2taps_ref, b2col_ref, out_ref):
    """BT batch rows: Conv1d(1->16,k7)+ReLU -> AvgPool(2,2) -> Conv1d(16->8,k7)+ReLU, flattened."""
    xw = x_ref[...]                                                     # [BT, 730] f32 (pre-sliced)
    # im2col of the single input channel: rows (k, b), zero-padded 56 -> 64, bf16 for the MXU.
    taps = [xw[:, k:k + L1] for k in range(K1)]
    taps.append(jnp.zeros((KPAD - K1 * BT, L1), jnp.float32))
    xs = jnp.concatenate(taps, axis=0).astype(jnp.bfloat16)             # [64, 724]
    # Conv1d(1->16)+ReLU: one [128,64]@[64,724] bf16 MXU push (block-diag keeps batches apart).
    h1_all = jnp.dot(w1big_ref[...], xs, preferred_element_type=jnp.float32)   # [(c,b), 724]
    h1_all = jnp.maximum(h1_all + b1col_ref[...], 0.0)
    # AvgPool1d(2,2) for all 16 channels x BT rows as a single matmul (0/0.5 exact in bf16).
    pooled = jnp.dot(h1_all.astype(jnp.bfloat16), pmat_ref[...],
                     preferred_element_type=jnp.float32)                # [128, 362]
    pooled = pooled.astype(jnp.bfloat16)
    # Conv1d(16->8): 7 accumulating [64,128]@[128,356] dots (per-tap block-diag weights);
    # no [896,356] im2col concat is materialized.
    acc = jnp.dot(w2taps_ref[0], pooled[:, 0:L2], preferred_element_type=jnp.float32)
    for k in range(1, K2):
        acc = acc + jnp.dot(w2taps_ref[k], pooled[:, k:k + L2],
                            preferred_element_type=jnp.float32)         # [(o,b), 356]
    out_all = jnp.maximum(acc + b2col_ref[...], 0.0).astype(jnp.bfloat16)
    # Channel-major flatten with each channel lane-padded 356->384: one dense (BT, 3072) store.
    # flat[b, o*384 + t] corresponds to torch.nn.Flatten()[b, o*356 + t] (w1l rows are permuted
    # to match on the host); padded lanes are zero so they contribute nothing in the MLP.
    zpad = jnp.zeros((BT, L2_PAD - L2), jnp.bfloat16)
    segs = []
    for o in range(C2):
        segs.append(out_all[o * BT:(o + 1) * BT, :])
        segs.append(zpad)
    out_ref[...] = jnp.concatenate(segs, axis=-1)                       # [BT, 3072] bf16


def mlp_kernel(x_ref, w1_ref, b1_ref, w2_ref, b2_ref, w3_ref, b3_ref, o_ref):
    """Linear(3072->1024)+ReLU -> Linear(1024->128)+ReLU -> Linear(128->ncp).
    bf16 activations/weights on the MXU; f32 accumulation and elementwise math (v5e-safe)."""
    h = jnp.dot(x_ref[...], w1_ref[...], preferred_element_type=jnp.float32) + b1_ref[...]
    h = jnp.maximum(h, 0.0)
    h = jnp.dot(h.astype(jnp.bfloat16), w2_ref[...],
                preferred_element_type=jnp.float32) + b2_ref[...]
    h = jnp.maximum(h, 0.0)
    o_ref[...] = jnp.dot(h.astype(jnp.bfloat16), w3_ref[...],
                         preferred_element_type=jnp.float32) + b3_ref[...]


def _mlp_batch_tile(bp):
    """Largest multiple-of-8 tile <= 256 dividing bp; keep >= 2 grid steps when the batch
    allows so the 'parallel' axis can shard across both v7x TensorCores."""
    cap = min(256, bp)
    if bp >= 16:
        cap = min(cap, max(8, (bp // 2) // 8 * 8))
    t = cap
    while bp % t:
        t -= 8
    return max(t, 8)


def prototype_temp_forward(x, packed_params):
    """x: [B, 1, L_IN] float32 (NCL, as PyTorch). Returns [B, nr_of_classes]."""
    (w1big, b1col, pmat, w2taps, b2col,
     w1l, b1l, w2l, b2l, w3l, b3l, n_classes) = packed_params
    B = x.shape[0]
    ncp = w3l.shape[1]
    bp = ((B + BT - 1) // BT) * BT
    # Host-side slice: only the fft window x[:, :, 1460:] ever reaches the kernel.
    x2d = x[:, 0, SLICE_START:]                                          # [B, 730]
    if bp != B:
        x2d = jnp.pad(x2d, ((0, bp - B), (0, 0)))

    flat = pl.pallas_call(
        conv_block_kernel,
        out_shape=jax.ShapeDtypeStruct((bp, FLAT_PAD), jnp.bfloat16),
        grid_spec=pltpu.PrefetchScalarGridSpec(
            num_scalar_prefetch=0,
            grid=(bp // BT,),
            in_specs=[
                pl.BlockSpec((BT, L_FFT), lambda i: (i, 0)),                 # fft rows: pipelined
                pl.BlockSpec((C1 * BT, KPAD), lambda i: (0, 0)),             # conv1 block-diag (resident)
                pl.BlockSpec((C1 * BT, 1), lambda i: (0, 0)),                # conv1 bias column
                pl.BlockSpec((L1, L_POOL), lambda i: (0, 0)),                # pooling matrix (resident)
                pl.BlockSpec((K2, C2 * BT, C1 * BT), lambda i: (0, 0, 0)),   # conv2 per-tap weights
                pl.BlockSpec((C2 * BT, 1), lambda i: (0, 0)),                # conv2 bias column
            ],
            out_specs=pl.BlockSpec((BT, FLAT_PAD), lambda i: (i, 0)),
        ),
        compiler_params=pltpu.CompilerParams(
            dimension_semantics=("parallel",),
            vmem_limit_bytes=32 * 1024 * 1024),
    )(x2d, w1big, b1col, pmat, w2taps, b2col)

    bm = _mlp_batch_tile(bp)
    out = pl.pallas_call(
        mlp_kernel,
        out_shape=jax.ShapeDtypeStruct((bp, ncp), jnp.float32),
        grid_spec=pltpu.PrefetchScalarGridSpec(
            num_scalar_prefetch=0,
            grid=(bp // bm,),
            in_specs=[
                pl.BlockSpec((bm, FLAT_PAD), lambda i: (i, 0)),   # bf16 activation tiles: pipelined
                pl.BlockSpec((FLAT_PAD, H1), lambda i: (0, 0)),   # bf16 weights/biases: constant
                pl.BlockSpec((1, H1), lambda i: (0, 0)),          #   index maps -> DMA'd once,
                pl.BlockSpec((H1, H2), lambda i: (0, 0)),         #   stay resident in VMEM
                pl.BlockSpec((1, H2), lambda i: (0, 0)),
                pl.BlockSpec((H2, ncp), lambda i: (0, 0)),
                pl.BlockSpec((1, ncp), lambda i: (0, 0)),
            ],
            out_specs=pl.BlockSpec((bm, ncp), lambda i: (i, 0)),
        ),
        compiler_params=pltpu.CompilerParams(
            dimension_semantics=("parallel",),
            vmem_limit_bytes=32 * 1024 * 1024),
    )(flat, w1l, b1l, w2l, b2l, w3l, b3l)
    return out[:B, :n_classes]


def reference_forward(x, params):
    """Pure-JAX f32 reference mirroring the PyTorch forward (PyTorch-shaped params)."""
    (c1w, c1b, c2w, c2b, f1w, f1b, f2w, f2b, f3w, f3b) = params
    fft = x[:, 0, SLICE_START:]                                        # [B, 730]
    B = fft.shape[0]
    h1 = jnp.zeros((B, C1, L1), jnp.float32)
    for k in range(K1):
        h1 = h1 + c1w[None, :, 0, k:k + 1] * fft[:, None, k:k + L1]
    h1 = jnp.maximum(h1 + c1b[None, :, None], 0.0)
    pooled = 0.5 * (h1[:, :, 0::2] + h1[:, :, 1::2])                   # AvgPool1d(2, 2)
    h2 = jnp.zeros((B, C2, L2), jnp.float32)
    for k in range(K2):
        h2 = h2 + jnp.einsum('oc,bct->bot', c2w[:, :, k], pooled[:, :, k:k + L2])
    h2 = jnp.maximum(h2 + c2b[None, :, None], 0.0)
    flat = h2.reshape(B, FLAT)
    a = jnp.maximum(flat @ f1w.T + f1b, 0.0)
    a = jnp.maximum(a @ f2w.T + f2b, 0.0)
    return a @ f3w.T + f3b


if __name__ == "__main__":
    B = 2
    NUM_CLASSES = 5
    key = jax.random.PRNGKey(0)
    keys = jax.random.split(key, 11)

    x = jax.random.normal(keys[0], (B, 1, L_IN), jnp.float32)

    # Deterministic synthetic parameters in PyTorch-native shapes.
    c1w = 0.1 * jax.random.normal(keys[1], (C1, 1, K1), jnp.float32)    # Conv1d(1,16,7).weight
    c1b = 0.1 * jax.random.normal(keys[2], (C1,), jnp.float32)
    c2w = 0.1 * jax.random.normal(keys[3], (C2, C1, K2), jnp.float32)   # Conv1d(16,8,7).weight
    c2b = 0.1 * jax.random.normal(keys[4], (C2,), jnp.float32)
    f1w = (1.0 / jnp.sqrt(FLAT)) * jax.random.normal(keys[5], (H1, FLAT), jnp.float32)
    f1b = 0.1 * jax.random.normal(keys[6], (H1,), jnp.float32)
    f2w = (1.0 / jnp.sqrt(H1)) * jax.random.normal(keys[7], (H2, H1), jnp.float32)
    f2b = 0.1 * jax.random.normal(keys[8], (H2,), jnp.float32)
    f3w = (1.0 / jnp.sqrt(H2)) * jax.random.normal(keys[9], (NUM_CLASSES, H2), jnp.float32)
    f3b = 0.1 * jax.random.normal(keys[10], (NUM_CLASSES,), jnp.float32)
    params = (c1w, c1b, c2w, c2b, f1w, f1b, f2w, f2b, f3w, f3b)

    packed = prepare_params(params)
    out = jax.block_until_ready(prototype_temp_forward(x, packed))
    ref = jax.block_until_ready(reference_forward(x, params))
    assert out.shape == (B, NUM_CLASSES)
    np.testing.assert_allclose(np.asarray(out), np.asarray(ref), rtol=2e-2, atol=2e-2)
    print("KERNEL_OK")
</pallas_src>

<mosaic_0001>
module attributes {stable_mosaic.version = 11 : i64} {
  func.func @conv_block_kernel(%arg0: i32, %arg1: memref<8x730xf32, #tpu.memory_space<vmem>>, %arg2: memref<128x64xbf16, #tpu.memory_space<vmem>>, %arg3: memref<128x1xf32, #tpu.memory_space<vmem>>, %arg4: memref<724x362xbf16, #tpu.memory_space<vmem>>, %arg5: memref<7x64x128xbf16, #tpu.memory_space<vmem>>, %arg6: memref<64x1xf32, #tpu.memory_space<vmem>>, %arg7: memref<8x3072xbf16, #tpu.memory_space<vmem>>) attributes {dimension_semantics = [#tpu.dimension_semantics<parallel>], iteration_bounds = array<i64: 1>, scalar_prefetch = 0 : i64, scratch_operands = 0 : i64, tpu.core_type = #tpu.core_type<tc>, window_params = [{transform_indices = @transform_0, window_bounds = array<i64: 8, 730>}, {pipeline_mode = #tpu.pipeline_mode<synchronous>, transform_indices = @transform_1, window_bounds = array<i64: 128, 64>}, {pipeline_mode = #tpu.pipeline_mode<synchronous>, transform_indices = @transform_2, window_bounds = array<i64: 128, 1>}, {pipeline_mode = #tpu.pipeline_mode<synchronous>, transform_indices = @transform_3, window_bounds = array<i64: 724, 362>}, {pipeline_mode = #tpu.pipeline_mode<synchronous>, transform_indices = @transform_4, window_bounds = array<i64: 7, 64, 128>}, {pipeline_mode = #tpu.pipeline_mode<synchronous>, transform_indices = @transform_5, window_bounds = array<i64: 64, 1>}, {transform_indices = @transform_6, window_bounds = array<i64: 8, 3072>}]} {
    %c0 = arith.constant 0 : index
    %c0_0 = arith.constant 0 : index
    %0 = vector.load %arg1[%c0, %c0_0] : memref<8x730xf32, #tpu.memory_space<vmem>>, vector<8x730xf32>
    %1 = vector.extract_strided_slice %0 {offsets = [0, 0], sizes = [8, 724], strides = [1, 1]} : vector<8x730xf32> to vector<8x724xf32>
    %2 = vector.extract_strided_slice %0 {offsets = [0, 1], sizes = [8, 724], strides = [1, 1]} : vector<8x730xf32> to vector<8x724xf32>
    %3 = vector.extract_strided_slice %0 {offsets = [0, 2], sizes = [8, 724], strides = [1, 1]} : vector<8x730xf32> to vector<8x724xf32>
    %4 = vector.extract_strided_slice %0 {offsets = [0, 3], sizes = [8, 724], strides = [1, 1]} : vector<8x730xf32> to vector<8x724xf32>
    %5 = vector.extract_strided_slice %0 {offsets = [0, 4], sizes = [8, 724], strides = [1, 1]} : vector<8x730xf32> to vector<8x724xf32>
    %6 = vector.extract_strided_slice %0 {offsets = [0, 5], sizes = [8, 724], strides = [1, 1]} : vector<8x730xf32> to vector<8x724xf32>
    %7 = vector.extract_strided_slice %0 {offsets = [0, 6], sizes = [8, 724], strides = [1, 1]} : vector<8x730xf32> to vector<8x724xf32>
    %cst = arith.constant 0.000000e+00 : f32
    %8 = vector.broadcast %cst : f32 to vector<8x724xf32>
    %9 = tpu.concatenate %1, %2, %3, %4, %5, %6, %7, %8 in 0 : vector<8x724xf32>, vector<8x724xf32>, vector<8x724xf32>, vector<8x724xf32>, vector<8x724xf32>, vector<8x724xf32>, vector<8x724xf32>, vector<8x724xf32> -> vector<64x724xf32>
    %10 = arith.truncf %9 : vector<64x724xf32> to vector<64x724xbf16>
    %c0_1 = arith.constant 0 : index
    %c0_2 = arith.constant 0 : index
    %11 = vector.load %arg2[%c0_1, %c0_2] : memref<128x64xbf16, #tpu.memory_space<vmem>>, vector<128x64xbf16>
    %cst_3 = arith.constant dense<0.000000e+00> : vector<128x724xf32>
    %12 = tpu.matmul %11, %10, %cst_3 {dimension_numbers = #tpu.dot_dimension_numbers<[1], [0], [0], [1], [0, 0, 1, 1], [], []>} : vector<128x64xbf16>, vector<64x724xbf16>, vector<128x724xf32> -> vector<128x724xf32>
    %c0_4 = arith.constant 0 : index
    %c0_5 = arith.constant 0 : index
    %13 = vector.load %arg3[%c0_4, %c0_5] : memref<128x1xf32, #tpu.memory_space<vmem>>, vector<128x1xf32>
    %14 = vector.broadcast %13 : vector<128x1xf32> to vector<128x724xf32>
    %15 = arith.addf %12, %14 : vector<128x724xf32>
    %cst_6 = arith.constant 0.000000e+00 : f32
    %16 = vector.broadcast %cst_6 : f32 to vector<128x724xf32>
    %17 = arith.maximumf %15, %16 : vector<128x724xf32>
    %18 = arith.truncf %17 : vector<128x724xf32> to vector<128x724xbf16>
    %c0_7 = arith.constant 0 : index
    %c0_8 = arith.constant 0 : index
    %19 = vector.load %arg4[%c0_7, %c0_8] : memref<724x362xbf16, #tpu.memory_space<vmem>>, vector<724x362xbf16>
    %cst_9 = arith.constant dense<0.000000e+00> : vector<128x362xf32>
    %20 = tpu.matmul %18, %19, %cst_9 {dimension_numbers = #tpu.dot_dimension_numbers<[1], [0], [0], [1], [0, 0, 1, 1], [], []>} : vector<128x724xbf16>, vector<724x362xbf16>, vector<128x362xf32> -> vector<128x362xf32>
    %21 = arith.truncf %20 : vector<128x362xf32> to vector<128x362xbf16>
    %c0_10 = arith.constant 0 : index
    %c0_11 = arith.constant 0 : index
    %c0_12 = arith.constant 0 : index
    %22 = vector.load %arg5[%c0_10, %c0_11, %c0_12] : memref<7x64x128xbf16, #tpu.memory_space<vmem>>, vector<1x64x128xbf16>
    %23 = vector.shape_cast %22 : vector<1x64x128xbf16> to vector<64x128xbf16>
    %24 = vector.extract_strided_slice %21 {offsets = [0, 0], sizes = [128, 356], strides = [1, 1]} : vector<128x362xbf16> to vector<128x356xbf16>
    %cst_13 = arith.constant dense<0.000000e+00> : vector<64x356xf32>
    %25 = tpu.matmul %23, %24, %cst_13 {dimension_numbers = #tpu.dot_dimension_numbers<[1], [0], [0], [1], [0, 0, 1, 1], [], []>} : vector<64x128xbf16>, vector<128x356xbf16>, vector<64x356xf32> -> vector<64x356xf32>
    %c1 = arith.constant 1 : index
    %c0_14 = arith.constant 0 : index
    %c0_15 = arith.constant 0 : index
    %26 = vector.load %arg5[%c1, %c0_14, %c0_15] : memref<7x64x128xbf16, #tpu.memory_space<vmem>>, vector<1x64x128xbf16>
    %27 = vector.shape_cast %26 : vector<1x64x128xbf16> to vector<64x128xbf16>
    %28 = vector.extract_strided_slice %21 {offsets = [0, 1], sizes = [128, 356], strides = [1, 1]} : vector<128x362xbf16> to vector<128x356xbf16>
    %cst_16 = arith.constant dense<0.000000e+00> : vector<64x356xf32>
    %29 = tpu.matmul %27, %28, %cst_16 {dimension_numbers = #tpu.dot_dimension_numbers<[1], [0], [0], [1], [0, 0, 1, 1], [], []>} : vector<64x128xbf16>, vector<128x356xbf16>, vector<64x356xf32> -> vector<64x356xf32>
    %30 = arith.addf %25, %29 : vector<64x356xf32>
    %c2 = arith.constant 2 : index
    %c0_17 = arith.constant 0 : index
    %c0_18 = arith.constant 0 : index
    %31 = vector.load %arg5[%c2, %c0_17, %c0_18] : memref<7x64x128xbf16, #tpu.memory_space<vmem>>, vector<1x64x128xbf16>
    %32 = vector.shape_cast %31 : vector<1x64x128xbf16> to vector<64x128xbf16>
    %33 = vector.extract_strided_slice %21 {offsets = [0, 2], sizes = [128, 356], strides = [1, 1]} : vector<128x362xbf16> to vector<128x356xbf16>
    %cst_19 = arith.constant dense<0.000000e+00> : vector<64x356xf32>
    %34 = tpu.matmul %32, %33, %cst_19 {dimension_numbers = #tpu.dot_dimension_numbers<[1], [0], [0], [1], [0, 0, 1, 1], [], []>} : vector<64x128xbf16>, vector<128x356xbf16>, vector<64x356xf32> -> vector<64x356xf32>
    %35 = arith.addf %30, %34 : vector<64x356xf32>
    %c3 = arith.constant 3 : index
    %c0_20 = arith.constant 0 : index
    %c0_21 = arith.constant 0 : index
    %36 = vector.load %arg5[%c3, %c0_20, %c0_21] : memref<7x64x128xbf16, #tpu.memory_space<vmem>>, vector<1x64x128xbf16>
    %37 = vector.shape_cast %36 : vector<1x64x128xbf16> to vector<64x128xbf16>
    %38 = vector.extract_strided_slice %21 {offsets = [0, 3], sizes = [128, 356], strides = [1, 1]} : vector<128x362xbf16> to vector<128x356xbf16>
    %cst_22 = arith.constant dense<0.000000e+00> : vector<64x356xf32>
    %39 = tpu.matmul %37, %38, %cst_22 {dimension_numbers = #tpu.dot_dimension_numbers<[1], [0], [0], [1], [0, 0, 1, 1], [], []>} : vector<64x128xbf16>, vector<128x356xbf16>, vector<64x356xf32> -> vector<64x356xf32>
    %40 = arith.addf %35, %39 : vector<64x356xf32>
    %c4 = arith.constant 4 : index
    %c0_23 = arith.constant 0 : index
    %c0_24 = arith.constant 0 : index
    %41 = vector.load %arg5[%c4, %c0_23, %c0_24] : memref<7x64x128xbf16, #tpu.memory_space<vmem>>, vector<1x64x128xbf16>
    %42 = vector.shape_cast %41 : vector<1x64x128xbf16> to vector<64x128xbf16>
    %43 = vector.extract_strided_slice %21 {offsets = [0, 4], sizes = [128, 356], strides = [1, 1]} : vector<128x362xbf16> to vector<128x356xbf16>
    %cst_25 = arith.constant dense<0.000000e+00> : vector<64x356xf32>
    %44 = tpu.matmul %42, %43, %cst_25 {dimension_numbers = #tpu.dot_dimension_numbers<[1], [0], [0], [1], [0, 0, 1, 1], [], []>} : vector<64x128xbf16>, vector<128x356xbf16>, vector<64x356xf32> -> vector<64x356xf32>
    %45 = arith.addf %40, %44 : vector<64x356xf32>
    %c5 = arith.constant 5 : index
    %c0_26 = arith.constant 0 : index
    %c0_27 = arith.constant 0 : index
    %46 = vector.load %arg5[%c5, %c0_26, %c0_27] : memref<7x64x128xbf16, #tpu.memory_space<vmem>>, vector<1x64x128xbf16>
    %47 = vector.shape_cast %46 : vector<1x64x128xbf16> to vector<64x128xbf16>
    %48 = vector.extract_strided_slice %21 {offsets = [0, 5], sizes = [128, 356], strides = [1, 1]} : vector<128x362xbf16> to vector<128x356xbf16>
    %cst_28 = arith.constant dense<0.000000e+00> : vector<64x356xf32>
    %49 = tpu.matmul %47, %48, %cst_28 {dimension_numbers = #tpu.dot_dimension_numbers<[1], [0], [0], [1], [0, 0, 1, 1], [], []>} : vector<64x128xbf16>, vector<128x356xbf16>, vector<64x356xf32> -> vector<64x356xf32>
    %50 = arith.addf %45, %49 : vector<64x356xf32>
    %c6 = arith.constant 6 : index
    %c0_29 = arith.constant 0 : index
    %c0_30 = arith.constant 0 : index
    %51 = vector.load %arg5[%c6, %c0_29, %c0_30] : memref<7x64x128xbf16, #tpu.memory_space<vmem>>, vector<1x64x128xbf16>
    %52 = vector.shape_cast %51 : vector<1x64x128xbf16> to vector<64x128xbf16>
    %53 = vector.extract_strided_slice %21 {offsets = [0, 6], sizes = [128, 356], strides = [1, 1]} : vector<128x362xbf16> to vector<128x356xbf16>
    %cst_31 = arith.constant dense<0.000000e+00> : vector<64x356xf32>
    %54 = tpu.matmul %52, %53, %cst_31 {dimension_numbers = #tpu.dot_dimension_numbers<[1], [0], [0], [1], [0, 0, 1, 1], [], []>} : vector<64x128xbf16>, vector<128x356xbf16>, vector<64x356xf32> -> vector<64x356xf32>
    %55 = arith.addf %50, %54 : vector<64x356xf32>
    %c0_32 = arith.constant 0 : index
    %c0_33 = arith.constant 0 : index
    %56 = vector.load %arg6[%c0_32, %c0_33] : memref<64x1xf32, #tpu.memory_space<vmem>>, vector<64x1xf32>
    %57 = vector.broadcast %56 : vector<64x1xf32> to vector<64x356xf32>
    %58 = arith.addf %55, %57 : vector<64x356xf32>
    %cst_34 = arith.constant 0.000000e+00 : f32
    %59 = vector.broadcast %cst_34 : f32 to vector<64x356xf32>
    %60 = arith.maximumf %58, %59 : vector<64x356xf32>
    %61 = arith.truncf %60 : vector<64x356xf32> to vector<64x356xbf16>
    %cst_35 = arith.constant 0.000000e+00 : bf16
    %62 = vector.broadcast %cst_35 : bf16 to vector<8x28xbf16>
    %63 = vector.extract_strided_slice %61 {offsets = [0, 0], sizes = [8, 356], strides = [1, 1]} : vector<64x356xbf16> to vector<8x356xbf16>
    %64 = vector.extract_strided_slice %61 {offsets = [8, 0], sizes = [8, 356], strides = [1, 1]} : vector<64x356xbf16> to vector<8x356xbf16>
    %65 = vector.extract_strided_slice %61 {offsets = [16, 0], sizes = [8, 356], strides = [1, 1]} : vector<64x356xbf16> to vector<8x356xbf16>
    %66 = vector.extract_strided_slice %61 {offsets = [24, 0], sizes = [8, 356], strides = [1, 1]} : vector<64x356xbf16> to vector<8x356xbf16>
    %67 = vector.extract_strided_slice %61 {offsets = [32, 0], sizes = [8, 356], strides = [1, 1]} : vector<64x356xbf16> to vector<8x356xbf16>
    %68 = vector.extract_strided_slice %61 {offsets = [40, 0], sizes = [8, 356], strides = [1, 1]} : vector<64x356xbf16> to vector<8x356xbf16>
    %69 = vector.extract_strided_slice %61 {offsets = [48, 0], sizes = [8, 356], strides = [1, 1]} : vector<64x356xbf16> to vector<8x356xbf16>
    %70 = vector.extract_strided_slice %61 {offsets = [56, 0], sizes = [8, 356], strides = [1, 1]} : vector<64x356xbf16> to vector<8x356xbf16>
    %71 = tpu.concatenate %63, %62, %64, %62, %65, %62, %66, %62, %67, %62, %68, %62, %69, %62, %70, %62 in 1 : vector<8x356xbf16>, vector<8x28xbf16>, vector<8x356xbf16>, vector<8x28xbf16>, vector<8x356xbf16>, vector<8x28xbf16>, vector<8x356xbf16>, vector<8x28xbf16>, vector<8x356xbf16>, vector<8x28xbf16>, vector<8x356xbf16>, vector<8x28xbf16>, vector<8x356xbf16>, vector<8x28xbf16>, vector<8x356xbf16>, vector<8x28xbf16> -> vector<8x3072xbf16>
    %c0_36 = arith.constant 0 : index
    %c0_37 = arith.constant 0 : index
    %72 = vector.load %arg7[%c0_36, %c0_37] : memref<8x3072xbf16, #tpu.memory_space<vmem>>, vector<8x3072xbf16>
    tpu.vector_store %arg7[%c0_36, %c0_37], %71 {strides = array<i32>} : memref<8x3072xbf16, #tpu.memory_space<vmem>>, vector<8x3072xbf16>,
    return
  }
  func.func @transform_0(%arg0: i32) -> (i32, i32) {
    %c0_i32 = arith.constant 0 : i32
    %c0_i32_0 = arith.constant 0 : i32
    return %arg0, %c0_i32 : i32, i32
  }
  func.func @transform_1(%arg0: i32) -> (i32, i32) {
    %c0_i32 = arith.constant 0 : i32
    %c0_i32_0 = arith.constant 0 : i32
    %c0_i32_1 = arith.constant 0 : i32
    return %c0_i32, %c0_i32_0 : i32, i32
  }
  func.func @transform_2(%arg0: i32) -> (i32, i32) {
    %c0_i32 = arith.constant 0 : i32
    %c0_i32_0 = arith.constant 0 : i32
    %c0_i32_1 = arith.constant 0 : i32
    return %c0_i32, %c0_i32_0 : i32, i32
  }
  func.func @transform_3(%arg0: i32) -> (i32, i32) {
    %c0_i32 = arith.constant 0 : i32
    %c0_i32_0 = arith.constant 0 : i32
    %c0_i32_1 = arith.constant 0 : i32
    return %c0_i32, %c0_i32_0 : i32, i32
  }
  func.func @transform_4(%arg0: i32) -> (i32, i32, i32) {
    %c0_i32 = arith.constant 0 : i32
    %c0_i32_0 = arith.constant 0 : i32
    %c0_i32_1 = arith.constant 0 : i32
    %c0_i32_2 = arith.constant 0 : i32
    return %c0_i32, %c0_i32_0, %c0_i32_1 : i32, i32, i32
  }
  func.func @transform_5(%arg0: i32) -> (i32, i32) {
    %c0_i32 = arith.constant 0 : i32
    %c0_i32_0 = arith.constant 0 : i32
    %c0_i32_1 = arith.constant 0 : i32
    return %c0_i32, %c0_i32_0 : i32, i32
  }
  func.func @transform_6(%arg0: i32) -> (i32, i32) {
    %c0_i32 = arith.constant 0 : i32
    %c0_i32_0 = arith.constant 0 : i32
    return %arg0, %c0_i32 : i32, i32
  }
}

</mosaic_0001>

<bundles_post_ra>
// kernel: tpu_custom_call.1
= control target key start
LH: loop header
LB: loop body
LE: loop exit
PB: predicated region body
PF: predicated region fallthrough
CT: control target
= control target key end

     0   :  { %11 = vsyncpa [#allocation3], 0  ;;  %s7529_s0 = inlined_call_operand.vmem [shape: f32[8,730], index: 0, kind: input, shape index: {}]   ;;  %s7530_s1 = inlined_call_operand.vmem [shape: bf16[128,64], index: 1, kind: input, shape index: {}]   ;;  %s7531_s2 = inlined_call_operand.vmem [shape: f32[128,1], index: 2, kind: input, shape index: {}]   ;;  %s7532_s3 = inlined_call_operand.hbm [shape: bf16[724,362], index: 3, kind: input, shape index: {}]   ;;  %s7533_s4 = inlined_call_operand.vmem [shape: bf16[7,64,128], index: 4, kind: input, shape index: {}]   ;;  %s7534_s5 = inlined_call_operand.vmem [shape: f32[64,1], index: 5, kind: input, shape index: {}]   ;;  %s7535_s6 = inlined_call_operand.hbm [shape: bf16[8,3072], index: 6, kind: output, shape index: {}]  }
   0x1   :  { %12 = vsyncpa [#allocation4], 0  ;;  %s5793_s21 = smov [#allocation2]   ;;  %s5745_s25 = scalar_lea.hbm %s7532_s3, 17472 }
   0x2   :  { %s24_s22 = sshll.u32 %s5793_s21, 4  ;;  %p5746_p0 = scmp.ne.s32.totalorder %s7532_s3, %s5745_s25  ;;  %s25_s22 = int_to_ptr.vmem [resolvable:$true] %s24_s22 }
   0x3   :  { %p5749_p1 = scmp.lt.u32.totalorder %s5745_s25, %s7532_s3 }
   0x5   :  { %p5751_p2 = pnand %p5749_p1, %p5746_p0 }
   0x7   :  { %5754 = shalt.err (!%p5751_p2)
}
   0x8   :  { %s5755_s30 = scalar_lea.vmem %s25_s22, 17472  ;;  %p5760_p4 = scmp.lt.s32.totalorder %s25_s22, %s25_s22 }
   0x9   :  { %p5756_p3 = scmp.ne.s32.totalorder %s25_s22, %s5755_s30  ;;  %p5761_p5 = scmp.lt.s32.totalorder %s5755_s30, %s5755_s30 }
   0xb   :  { %p5762_p6 = por %p5761_p5, %p5760_p4 }
   0xd   :  { %p5763_p7 = pnand %p5762_p6, %p5756_p3 }
   0xf   :  { %5766 = shalt.err (!%p5763_p7)
}
  0x10   :  { %s5794_s7 = smov 192   ;;  %s5795_s8 = smov 12  }
  0x11   :  { %30 = dma.hbm_to_vmem [thread:$0]  %s7532_s3, 17472, %s25_s22, [#allocation3], %s5794_s7, %s5794_s7, %s5795_s8  }
  0x12   :  { %5789 = dma.done.wait [#allocation3], 17472  }
  0x13   :  { %5790 = vsyncadd [#allocation3], 4294949824  ;;  %v5855_v0 = vld [vmem:[%s7529_s0 + $0x8] sm:$0xff]  ;;  %v5860_v1 = vld [vmem:[%s7529_s0 + $0x10] sm:$0xff]  ;;  %s5796_s3 = smov 126   ;;  %s5797_s17 = smov 127  }
  0x14   :  { %v5469_v2 = vpack.i.bf16 %v5860_v1, %v5855_v0  ;;  %v5867_v3 = vld [vmem:[%s7529_s0] sm:$0xff]  ;;  %s5798_s18 = smov 125   ;;  %s5799_s19 = smov 123   ;;  %v5883_v4 = vld [vmem:[%s7529_s0 + $0x18] sm:$0xff]  ;;  %v7536_v6 = vmov 0   ;;  %v5912_v8 = vld [vmem:[%s7529_s0 + $0x28] sm:$0xff] }
  0x15   :  { %s5800_s20 = smov 124   ;;  %v5888_v5 = vld [vmem:[%s7529_s0 + $0x20] sm:$0xff]  ;;  %428 = vmatprep.mubr.bf16.mxu0 %v7536_v6  ;;  %541 = vmatprep.mubr.bf16.mxu1 %v7536_v6  ;;  %s5802_s25 = smov 122   ;;  %v236_v9 = vld [vmem:[%s7531_s2 + $0x8] sm:$0xff]  ;;  %v237_v11 = vld [vmem:[%s7531_s2 + $0x10] sm:$0xff]  ;;  %vm63_vm0 = vcmask 1039360  }
  0x16   :  { %5470 = vrot.lane.b32.xlu1 %v5469_v2, %s5796_s3  ;;  %5465 = vrot.lane.b32.xlu0 %v5469_v2, %s5797_s17  ;;  %v5499_v7 = vpack.i.bf16 %v5888_v5, %v5883_v4  ;;  %v235_v10 = vld [vmem:[%s7531_s2] sm:$0xff]  ;;  %v238_v12 = vld [vmem:[%s7531_s2 + $0x18] sm:$0xff]  ;;  %vm87_vm1 = vcmask 1031168   ;;  %vm111_vm2 = vcmask 1022976   ;;  %vm159_vm3 = vcmask 1006592  }
  0x17   :  { %5525 = vset.pattern.permute.xlu1 %v7536_v6  ;;  %5524 = vset.pattern.permute.xlu0 %v7536_v6  ;;  %v239_v13 = vld [vmem:[%s7531_s2 + $0x20] sm:$0xff]  ;;  %v240_v14 = vld [vmem:[%s7531_s2 + $0x28] sm:$0xff]  ;;  %v241_v15 = vld [vmem:[%s7531_s2 + $0x30] sm:$0xff]  ;;  %vm135_vm4 = vcmask 1014784   ;;  %vm183_vm5 = vcmask 998400   ;;  %vm371_vm6 = vcmask 523264  }
  0x18   :  { %v242_v16 = vld [vmem:[%s7531_s2 + $0x38] sm:$0xff]  ;;  %v243_v17 = vld [vmem:[%s7531_s2 + $0x40] sm:$0xff]  ;;  %v244_v18 = vld [vmem:[%s7531_s2 + $0x48] sm:$0xff]  ;;  %vm1814_vm7 = vcmask 1041408   ;;  %vm1789_vm8 = vcmask 687104   ;;  %vm4484_vm9 = vcmask 818176  }
  0x19   :  { %v245_v19 = vld [vmem:[%s7531_s2 + $0x50] sm:$0xff]  ;;  %v246_v20 = vld [vmem:[%s7531_s2 + $0x58] sm:$0xff]  ;;  %v247_v21 = vld [vmem:[%s7531_s2 + $0x60] sm:$0xff] }
  0x1a   :  { %5475 = vrot.lane.b32.xlu1 %v5469_v2, %s5798_s18  ;;  %51 = vrot.lane.b32.xlu0 %v5867_v3, %s5797_s17  ;;  %v248_v22 = vld [vmem:[%s7531_s2 + $0x68] sm:$0xff]  ;;  %v249_v23 = vld [vmem:[%s7531_s2 + $0x70] sm:$0xff] }
  0x1b   :  { %v250_v24 = vld [vmem:[%s7531_s2 + $0x78] sm:$0xff] }
  0x1e   :  { %99 = vrot.lane.b32.xlu1 %v5867_v3, %s5798_s18  ;;  %75 = vrot.lane.b32.xlu0 %v5867_v3, %s5796_s3 }
  0x22   :  { %5485 = vrot.lane.b32.xlu1 %v5469_v2, %s5799_s19  ;;  %5480 = vrot.lane.b32.xlu0 %v5469_v2, %s5800_s20 }
  0x26   :  { %147 = vrot.lane.b32.xlu1 %v5867_v3, %s5799_s19  ;;  %123 = vrot.lane.b32.xlu0 %v5867_v3, %s5800_s20 }
  0x2a   :  { %171 = vrot.lane.b32.xlu1 %v5867_v3, %s5802_s25  ;;  %5490 = vrot.lane.b32.xlu0 %v5469_v2, %s5802_s25 }
  0x2e   :  { %5500 = vrot.lane.b32.xlu1 %v5499_v7, %s5796_s3  ;;  %5495 = vrot.lane.b32.xlu0 %v5499_v7, %s5797_s17 }
  0x32   :  { %5510 = vrot.lane.b32.xlu1 %v5499_v7, %s5800_s20  ;;  %5505 = vrot.lane.b32.xlu0 %v5499_v7, %s5798_s18 }
  0x36   :  { %5520 = vrot.lane.b32.xlu1 %v5499_v7, %s5802_s25  ;;  %5515 = vrot.lane.b32.xlu0 %v5499_v7, %s5799_s19 }
  0x3a   :  { %61 = vrot.lane.b32.xlu0 %v5912_v8, %s5797_s17  ;;  %85 = vrot.lane.b32.xlu1 %v5912_v8, %s5796_s3 }
  0x3e   :  { %109 = vrot.lane.b32.xlu0 %v5912_v8, %s5798_s18  ;;  %133 = vrot.lane.b32.xlu1 %v5912_v8, %s5800_s20 }
  0x42   :  { %157 = vrot.lane.b32.xlu0 %v5912_v8, %s5799_s19  ;;  %181 = vrot.lane.b32.xlu1 %v5912_v8, %s5802_s25 }
  0x46   :  { %258 = vperm.xlu1 %5525, %v236_v9   ;;  %253 = vperm.xlu0 %5524, %v235_v10   ;;  %v5803_v10 = vmov 0.0  }
  0x4a   :  { %263 = vperm.xlu1 %5525, %v237_v11   ;;  %268 = vperm.xlu0 %5524, %v238_v12  }
  0x4e   :  { %273 = vperm.xlu1 %5525, %v239_v13   ;;  %278 = vperm.xlu0 %5524, %v240_v14  }
  0x52   :  { %283 = vperm.xlu1 %5525, %v241_v15   ;;  %288 = vperm.xlu0 %5524, %v242_v16   ;;  %v6027_v16 = vld [vmem:[%s7530_s1] sm:$0xff]  }
  0x56   :  { %293 = vperm.xlu1 %5525, %v243_v17   ;;  %298 = vperm.xlu0 %5524, %v244_v18  }
  0x5a   :  { %303 = vperm.xlu1 %5525, %v245_v19   ;;  %308 = vperm.xlu0 %5524, %v246_v20  }
  0x5e   :  { %313 = vperm.xlu1 %5525, %v247_v21   ;;  %318 = vperm.xlu0 %5524, %v248_v22  }
  0x62   :  { %323 = vperm.xlu1 %5525, %v249_v23   ;;  %328 = vperm.xlu0 %5524, %v250_v24  }
  0x88   :  { %v5974_v25 = vpop.permute.xlu1 %5470  ;;  %v5976_v26 = vpop.permute.xlu0 %5465 }
  0x89   :  { %v5473_v27 = vunpack.i.h.bf16 %v5974_v25  ;;  %v5472_v28 = vunpack.i.l.bf16 %v5974_v25  ;;  %v5468_v29 = vunpack.i.h.bf16 %v5976_v26  ;;  %v5467_v30 = vunpack.i.l.bf16 %v5976_v26  ;;  %v6050_v25 = vld [vmem:[%s7530_s1 + $0x8] sm:$0xff]  }
  0x8b   :  { %v65_v31 = vsel %vm63_vm0, %v5467_v30, %v5468_v29  ;;  %v89_v38 = vsel %vm87_vm1, %v5472_v28, %v5473_v27 }
  0x8c   :  { %v5985_v32 = vpop.permute.xlu1 %5475  ;;  %v52_v33 = vpop.permute.xlu0 %51  ;;  %v196_v34 = vpack.c.bf16 %v65_v31, %v5855_v0 }
  0x8d   :  { %v5478_v35 = vunpack.i.h.bf16 %v5985_v32  ;;  %v5477_v36 = vunpack.i.l.bf16 %v5985_v32  ;;  %v64_v37 = vsel %vm63_vm0, %v52_v33, %v5467_v30 }
  0x8e   :  { %396 = vmatprep.subr.bf16.mxu0 %v196_v34  ;;  %v195_v39 = vpack.c.bf16 %v64_v37, %v5867_v3 }
  0x8f   :  { %v113_v40 = vsel %vm111_vm2, %v5477_v36, %v5478_v35 }
  0x90   :  { %v100_v41 = vpop.permute.xlu1 %99  ;;  %397 = vmatpush1.bf16.msra.mxu0 %v195_v39  ;;  %v76_v42 = vpop.permute.xlu0 %75  ;;  %v202_v43 = vpack.c.bf16 %v113_v40, %v89_v38 }
  0x91   :  { %v112_v44 = vsel %vm111_vm2, %v100_v41, %v5477_v36  ;;  %v88_v45 = vsel %vm87_vm1, %v76_v42, %v5472_v28 }
  0x92   :  { %v201_v46 = vpack.c.bf16 %v112_v44, %v88_v45  ;;  %398 = vmatprep.subr.bf16.mxu0 %v202_v43 }
  0x94   :  { %v6000_v47 = vpop.permute.xlu1 %5485  ;;  %399 = vmatpush1.bf16.msra.mxu0 %v201_v46  ;;  %v6002_v48 = vpop.permute.xlu0 %5480 }
  0x95   :  { %v5488_v49 = vunpack.i.h.bf16 %v6000_v47  ;;  %v5487_v50 = vunpack.i.l.bf16 %v6000_v47  ;;  %v5483_v51 = vunpack.i.h.bf16 %v6002_v48  ;;  %v5482_v52 = vunpack.i.l.bf16 %v6002_v48 }
  0x97   :  { %v137_v53 = vsel %vm135_vm4, %v5482_v52, %v5483_v51  ;;  %v161_v54 = vsel %vm159_vm3, %v5487_v50, %v5488_v49 }
  0x98   :  { %v148_v55 = vpop.permute.xlu1 %147  ;;  %v124_v56 = vpop.permute.xlu0 %123  ;;  %v208_v57 = vpack.c.bf16 %v161_v54, %v137_v53 }
  0x99   :  { %v160_v58 = vsel %vm159_vm3, %v148_v55, %v5487_v50  ;;  %v136_v59 = vsel %vm135_vm4, %v124_v56, %v5482_v52 }
  0x9a   :  { %v207_v60 = vpack.c.bf16 %v160_v58, %v136_v59  ;;  %400 = vmatprep.subr.bf16.mxu0 %v208_v57  ;;  %v6074_v58 = vld [vmem:[%s7530_s1 + $0x10] sm:$0xff]  }
  0x9c   :  { %v172_v61 = vpop.permute.xlu1 %171  ;;  %v6016_v62 = vpop.permute.xlu0 %5490  ;;  %401 = vmatpush1.bf16.msra.mxu0 %v207_v60 }
  0x9d   :  { %v5493_v63 = vunpack.i.h.bf16 %v6016_v62  ;;  %v5492_v0 = vunpack.i.l.bf16 %v6016_v62 }
  0x9f   :  { %v185_v2 = vsel %vm183_vm5, %v5492_v0, %v5493_v63  ;;  %v184_v3 = vsel %vm183_vm5, %v172_v61, %v5492_v0 }
  0xa0   :  { %v5501_v7 = vpop.permute.xlu1 %5500  ;;  %v5496_v9 = vpop.permute.xlu0 %5495  ;;  %v214_v11 = vpack.c.bf16 %v5803_v10, %v185_v2  ;;  %v213_v12 = vpack.c.bf16 %v5803_v10, %v184_v3 }
  0xa1   :  { %v5503_v13 = vunpack.i.h.bf16 %v5501_v7  ;;  %v5498_v14 = vunpack.i.h.bf16 %v5496_v9  ;;  %v5497_v15 = vunpack.i.l.bf16 %v5496_v9  ;;  %v5502_v17 = vunpack.i.l.bf16 %v5501_v7  ;;  %v6090_v9 = vld [vmem:[%s7530_s1 + $0x18] sm:$0xff]  }
  0xa2   :  { %402 = vmatprep.subr.bf16.mxu0 %v214_v11  ;;  %v5536_v11 = vld [vmem:[#allocation2 + $0x4] ss:$12 sps:$4 sm:$0xff]  }
  0xa3   :  { %403 = vmatpush1.bf16.msra.mxu0 %v213_v12  ;;  %v67_v18 = vsel %vm63_vm0, %v5497_v15, %v5498_v14  ;;  %v66_v19 = vsel %vm63_vm0, %v5468_v29, %v5497_v15  ;;  %v91_v31 = vsel %vm87_vm1, %v5502_v17, %v5503_v13  ;;  %v90_v29 = vsel %vm87_vm1, %v5473_v27, %v5502_v17  ;;  %v6112_v12 = vld [vmem:[%s7530_s1 + $0x28] sm:$0xff]  }
  0xa4   :  { %v5511_v20 = vpop.permute.xlu1 %5510  ;;  %v5506_v21 = vpop.permute.xlu0 %5505  ;;  %v198_v22 = vpack.c.bf16 %v67_v18, %v5883_v4  ;;  %v197_v23 = vpack.c.bf16 %v66_v19, %v5860_v1  ;;  %v5534_v15 = vld [vmem:[#allocation2] ss:$12 sps:$4 sm:$0xff]   ;;  %v5539_v17 = vld [vmem:[#allocation2 + $0x1c] ss:$12 sps:$4 sm:$0xff]   ;;  %v5537_v18 = vld [vmem:[#allocation2 + $0x18] ss:$12 sps:$4 sm:$0xff]  }
  0xa5   :  { %v5513_v24 = vunpack.i.h.bf16 %v5511_v20  ;;  %v5508_v28 = vunpack.i.h.bf16 %v5506_v21  ;;  %v5507_v30 = vunpack.i.l.bf16 %v5506_v21  ;;  %v5512_v33 = vunpack.i.l.bf16 %v5511_v20  ;;  %v5542_v19 = vld [vmem:[#allocation2 + $0x34] ss:$12 sps:$4 sm:$0xff]   ;;  %v5540_v20 = vld [vmem:[#allocation2 + $0x30] ss:$12 sps:$4 sm:$0xff]   ;;  %v5545_v21 = vld [vmem:[#allocation2 + $0x4c] ss:$12 sps:$4 sm:$0xff]  }
  0xa6   :  { %4593 = vmatmul.mubr.msk.bf16.vlgmr.msra.gmra.mrb[0].mxu0 %vm371_vm6, %v6027_v16  ;;  %509 = vmatprep.subr.bf16.mxu1 %v198_v22  ;;  %v5548_v22 = vld [vmem:[#allocation2 + $0x64] ss:$12 sps:$4 sm:$0xff]  }
  0xa7   :  { %510 = vmatpush1.bf16.msra.mxu1 %v197_v23  ;;  %v115_v26 = vsel %vm111_vm2, %v5507_v30, %v5508_v28  ;;  %v114_v1 = vsel %vm111_vm2, %v5478_v35, %v5507_v30  ;;  %438 = vmatprep.mubr.bf16.mxu0 %v7536_v6  ;;  %v139_v38 = vsel %vm135_vm4, %v5512_v33, %v5513_v24  ;;  %v5546_v23 = vld [vmem:[#allocation2 + $0x60] ss:$12 sps:$4 sm:$0xff]  }
  0xa8   :  { %v5521_v4 = vpop.permute.xlu1 %5520  ;;  %v5516_v34 = vpop.permute.xlu0 %5515  ;;  %v204_v36 = vpack.c.bf16 %v115_v26, %v91_v31  ;;  %v203_v37 = vpack.c.bf16 %v114_v1, %v90_v29  ;;  %v138_v32 = vsel %vm135_vm4, %v5483_v51, %v5512_v33  ;;  %v5554_v30 = vld [vmem:[#allocation2 + $0x94] ss:$12 sps:$4 sm:$0xff]   ;;  %v5552_v31 = vld [vmem:[#allocation2 + $0x90] ss:$12 sps:$4 sm:$0xff]   ;;  %v5557_v33 = vld [vmem:[#allocation2 + $0xac] ss:$12 sps:$4 sm:$0xff]  }
  0xa9   :  { %v5523_v39 = vunpack.i.h.bf16 %v5521_v4  ;;  %v5522_v40 = vunpack.i.l.bf16 %v5521_v4  ;;  %v5518_v41 = vunpack.i.h.bf16 %v5516_v34  ;;  %v5517_v42 = vunpack.i.l.bf16 %v5516_v34  ;;  %v5555_v26 = vld [vmem:[#allocation2 + $0xa8] ss:$12 sps:$4 sm:$0xff]   ;;  %v5560_v29 = vld [vmem:[#allocation2 + $0xc4] ss:$12 sps:$4 sm:$0xff]   ;;  %v5558_v1 = vld [vmem:[#allocation2 + $0xc0] ss:$12 sps:$4 sm:$0xff]  }
  0xaa   :  { %511 = vmatprep.subr.bf16.mxu1 %v204_v36  ;;  %v5563_v4 = vld [vmem:[#allocation2 + $0xdc] ss:$12 sps:$4 sm:$0xff]   ;;  %v5561_v34 = vld [vmem:[#allocation2 + $0xd8] ss:$12 sps:$4 sm:$0xff]   ;;  %v5566_v36 = vld [vmem:[#allocation2 + $0xf4] ss:$12 sps:$4 sm:$0xff]  }
  0xab   :  { %512 = vmatpush1.bf16.msra.mxu1 %v203_v37  ;;  %v163_v27 = vsel %vm159_vm3, %v5517_v42, %v5518_v41  ;;  %v162_v35 = vsel %vm159_vm3, %v5488_v49, %v5517_v42  ;;  %v187_v43 = vsel %vm183_vm5, %v5522_v40, %v5523_v39  ;;  %v186_v47 = vsel %vm183_vm5, %v5493_v63, %v5522_v40  ;;  %v5564_v37 = vld [vmem:[#allocation2 + $0xf0] ss:$12 sps:$4 sm:$0xff]  }
  0xac   :  { %v210_v44 = vpack.c.bf16 %v163_v27, %v139_v38  ;;  %v209_v45 = vpack.c.bf16 %v162_v35, %v138_v32  ;;  %v216_v46 = vpack.c.bf16 %v5803_v10, %v187_v43  ;;  %v62_v50 = vpop.permute.xlu0 %61  ;;  %v86_v52 = vpop.permute.xlu1 %85  ;;  %v215_v56 = vpack.c.bf16 %v5803_v10, %v186_v47  ;;  %v5569_v38 = vld [vmem:[#allocation2 + $0x10c] ss:$12 sps:$4 sm:$0xff]   ;;  %v5572_v40 = vld [vmem:[#allocation2 + $0x124] ss:$12 sps:$4 sm:$0xff]   ;;  %v5575_v42 = vld [vmem:[#allocation2 + $0x13c] ss:$12 sps:$4 sm:$0xff]  }
  0xad   :  { %v68_v53 = vsel %vm63_vm0, %v5498_v14, %v62_v50  ;;  %v200_v54 = vpack.c.bf16 %v62_v50, %v5912_v8  ;;  %v92_v49 = vsel %vm87_vm1, %v5503_v13, %v86_v52  ;;  %v6123_v13 = vld [vmem:[%s7530_s1 + $0x30] sm:$0xff]   ;;  %v6134_v14 = vld [vmem:[%s7530_s1 + $0x38] sm:$0xff]  }
  0xae   :  { %4594 = vmatmul.mubr.msk.bf16.gmra.mrb[4].mxu0 %vm371_vm6, %v6050_v25  ;;  %513 = vmatprep.subr.bf16.mxu1 %v210_v44  ;;  %v199_v48 = vpack.c.bf16 %v68_v53, %v5888_v5  ;;  %v5578_v27 = vld [vmem:[#allocation2 + $0x154] ss:$12 sps:$4 sm:$0xff]   ;;  %v5576_v32 = vld [vmem:[#allocation2 + $0x150] ss:$12 sps:$4 sm:$0xff]   ;;  %v5581_v35 = vld [vmem:[#allocation2 + $0x16c] ss:$12 sps:$4 sm:$0xff]  }
  0xaf   :  { %514 = vmatpush1.bf16.msra.mxu1 %v209_v45  ;;  %448 = vmatprep.mubr.bf16.mxu0 %v7536_v6  ;;  %v5579_v43 = vld [vmem:[#allocation2 + $0x168] ss:$12 sps:$4 sm:$0xff]   ;;  %v5584_v44 = vld [vmem:[#allocation2 + $0x184] ss:$12 sps:$4 sm:$0xff]  }
  0xb0   :  { %515 = vmatprep.subr.bf16.mxu1 %v216_v46  ;;  %622 = vmatprep.subr.bf16.mxu0 %v200_v54  ;;  %v110_v51 = vpop.permute.xlu0 %109  ;;  %v134_v55 = vpop.permute.xlu1 %133 }
  0xb1   :  { %v116_v8 = vsel %vm111_vm2, %v5508_v28, %v110_v51  ;;  %v206_v57 = vpack.c.bf16 %v110_v51, %v86_v52  ;;  %623 = vmatpush1.bf16.msra.mxu0 %v199_v48  ;;  %v140_v59 = vsel %vm135_vm4, %v5513_v24, %v134_v55  ;;  %v5551_v24 = vld [vmem:[#allocation2 + $0x7c] ss:$12 sps:$4 sm:$0xff]   ;;  %v5549_v28 = vld [vmem:[#allocation2 + $0x78] ss:$12 sps:$4 sm:$0xff]  }
  0xb2   :  { %v205_v5 = vpack.c.bf16 %v116_v8, %v92_v49 }
  0xb3   :  { %516 = vmatpush1.bf16.msra.mxu1 %v215_v56  ;;  %624 = vmatprep.subr.bf16.mxu0 %v206_v57 }
  0xb4   :  { %v158_v60 = vpop.permute.xlu0 %157  ;;  %v182_v61 = vpop.permute.xlu1 %181 }
  0xb5   :  { %v164_v62 = vsel %vm159_vm3, %v5518_v41, %v158_v60  ;;  %v212_v63 = vpack.c.bf16 %v158_v60, %v134_v55  ;;  %625 = vmatpush1.bf16.msra.mxu0 %v205_v5  ;;  %v188_v2 = vsel %vm183_vm5, %v5523_v39, %v182_v61  ;;  %v218_v3 = vpack.c.bf16 %v5803_v10, %v182_v61  ;;  %v5567_v39 = vld [vmem:[#allocation2 + $0x108] ss:$12 sps:$4 sm:$0xff]   ;;  %v5570_v41 = vld [vmem:[#allocation2 + $0x120] ss:$12 sps:$4 sm:$0xff]  }
  0xb6   :  { %4595 = vmatmul.mubr.msk.bf16.gmra.mrb[8].mxu0 %vm371_vm6, %v6074_v58  ;;  %4601 = vmatmul.mubr.msk.bf16.vlgmr.msra.gmra.mrb[0].mxu1 %vm371_vm6, %v6027_v16  ;;  %v211_v0 = vpack.c.bf16 %v164_v62, %v140_v59  ;;  %v217_v7 = vpack.c.bf16 %v5803_v10, %v188_v2  ;;  %v6101_v10 = vld [vmem:[%s7530_s1 + $0x20] sm:$0xff]   ;;  %v5587_v2 = vld [vmem:[#allocation2 + $0x19c] ss:$12 sps:$4 sm:$0xff]  }
  0xb7   :  { %458 = vmatprep.mubr.bf16.mxu0 %v7536_v6  ;;  %551 = vmatprep.mubr.bf16.mxu1 %v7536_v6  ;;  %v5582_v61 = vld [vmem:[#allocation2 + $0x180] ss:$12 sps:$4 sm:$0xff]  }
  0xb8   :  { %626 = vmatprep.subr.bf16.mxu0 %v212_v63 }
  0xb9   :  { %627 = vmatpush1.bf16.msra.mxu0 %v211_v0 }
  0xba   :  { %628 = vmatprep.subr.bf16.mxu0 %v218_v3 }
  0xbd   :  { %629 = vmatpush1.bf16.msra.mxu0 %v217_v7 }
  0xbe   :  { %4596 = vmatmul.mubr.msk.bf16.gmra.mrb[12].mxu0 %vm371_vm6, %v6090_v9  ;;  %4602 = vmatmul.mubr.msk.bf16.gmra.mrb[4].mxu1 %vm371_vm6, %v6050_v25 }
  0xbf   :  { %468 = vmatprep.mubr.bf16.mxu0 %v7536_v6  ;;  %561 = vmatprep.mubr.bf16.mxu1 %v7536_v6 }
  0xc0   :  { %1824 = vmatprep.subr.bf16.mxu0 %v5536_v11 }
  0xc5   :  { %v6171_v45 = vpop.permute.xlu0 %253  ;;  %v6174_v53 = vpop.permute.xlu1 %258 }
  0xc6   :  { %4597 = vmatmul.mubr.msk.bf16.gmra.mrb[16].mxu0 %vm371_vm6, %v6101_v10  ;;  %4603 = vmatmul.mubr.msk.bf16.gmra.mrb[8].mxu1 %vm371_vm6, %v6074_v58 }
  0xc7   :  { %478 = vmatprep.mubr.bf16.mxu0 %v7536_v6  ;;  %571 = vmatprep.mubr.bf16.mxu1 %v7536_v6 }
  0xc9   :  { %v6181_v5 = vpop.permute.xlu1 %263  ;;  %v6185_v62 = vpop.permute.xlu0 %268 }
  0xce   :  { %4598 = vmatmul.mubr.msk.bf16.gmra.mrb[20].mxu0 %vm371_vm6, %v6112_v12  ;;  %4604 = vmatmul.mubr.msk.bf16.gmra.mrb[12].mxu1 %vm371_vm6, %v6090_v9 }
  0xcf   :  { %488 = vmatprep.mubr.bf16.mxu0 %v7536_v6  ;;  %581 = vmatprep.mubr.bf16.mxu1 %v7536_v6 }
  0xd6   :  { %4599 = vmatmul.mubr.msk.bf16.gmra.mrb[24].mxu0 %vm371_vm6, %v6123_v13  ;;  %4605 = vmatmul.mubr.msk.bf16.gmra.mrb[16].mxu1 %vm371_vm6, %v6101_v10 }
  0xd7   :  { %498 = vmatprep.mubr.bf16.mxu0 %v7536_v6  ;;  %591 = vmatprep.mubr.bf16.mxu1 %v7536_v6 }
  0xde   :  { %4600 = vmatmul.mubr.msk.bf16.gmra.mrb[28].mxu0 %vm371_vm6, %v6134_v14  ;;  %4606 = vmatmul.mubr.msk.bf16.gmra.mrb[20].mxu1 %vm371_vm6, %v6112_v12 }
  0xdf   :  { %601 = vmatprep.mubr.bf16.mxu1 %v7536_v6  ;;  %654 = vmatprep.mubr.bf16.mxu0 %v7536_v6 }
  0xe6   :  { %4607 = vmatmul.mubr.msk.bf16.gmra.mrb[24].mxu1 %vm371_vm6, %v6123_v13  ;;  %4609 = vmatmul.mubr.msk.bf16.vlgmr.msra.gmra.mrb[32].mxu0 %vm371_vm6, %v6027_v16  ;;  %v5543_v16 = vld [vmem:[#allocation2 + $0x48] ss:$12 sps:$4 sm:$0xff]  }
  0xe7   :  { %611 = vmatprep.mubr.bf16.mxu1 %v7536_v6  ;;  %664 = vmatprep.mubr.bf16.mxu0 %v7536_v6 }
  0xe8   :  { %1825 = vmatpush1.bf16.msra.mxu0 %v5534_v15  ;;  %v5590_v15 = vld [vmem:[#allocation2 + $0x1b4] ss:$12 sps:$4 sm:$0xff]  }
  0xe9   :  { %1826 = vmatprep.subr.bf16.mxu0 %v5539_v17 }
  0xec   :  { %1827 = vmatpush1.bf16.msra.mxu0 %v5537_v18 }
  0xed   :  { %1828 = vmatprep.subr.bf16.mxu0 %v5542_v19  ;;  %v6193_v19 = vpop.permute.xlu1 %273 }
  0xee   :  { %4608 = vmatmul.mubr.msk.bf16.gmra.mrb[28].mxu1 %vm371_vm6, %v6134_v14  ;;  %4610 = vmatmul.mubr.msk.bf16.gmra.mrb[36].mxu0 %vm371_vm6, %v6050_v25  ;;  %v5573_v25 = vld [vmem:[#allocation2 + $0x138] ss:$12 sps:$4 sm:$0xff]  }
  0xef   :  { %674 = vmatprep.mubr.bf16.mxu0 %v7536_v6  ;;  %2664 = vmatprep.mubr.bf16.mxu1 %v7536_v6 }
  0xf0   :  { %1829 = vmatpush1.bf16.msra.mxu0 %v5540_v20  ;;  %v6195_v20 = vpop.permute.xlu0 %278 }
  0xf1   :  { %1830 = vmatprep.subr.bf16.mxu0 %v5545_v21 }
  0xf4   :  { %1831 = vmatpush1.bf16.msra.mxu0 %v5543_v16 }
  0xf5   :  { %1832 = vmatprep.subr.bf16.mxu0 %v5548_v22 }
  0xf6   :  { %4611 = vmatmul.mubr.msk.bf16.gmra.mrb[40].mxu0 %vm371_vm6, %v6074_v58 }
  0xf7   :  { %684 = vmatprep.mubr.bf16.mxu0 %v7536_v6 }
  0xf8   :  { %1833 = vmatpush1.bf16.msra.mxu0 %v5546_v23 }
  0xf9   :  { %1834 = vmatprep.subr.bf16.mxu0 %v5551_v24  ;;  %v5588_v24 = vld [vmem:[#allocation2 + $0x1b0] ss:$12 sps:$4 sm:$0xff]  }
  0xfc   :  { %1835 = vmatpush1.bf16.msra.mxu0 %v5549_v28 }
  0xfd   :  { %1836 = vmatprep.subr.bf16.mxu0 %v5554_v30 }
  0xfe   :  { %4612 = vmatmul.mubr.msk.bf16.gmra.mrb[44].mxu0 %vm371_vm6, %v6090_v9 }
  0xff   :  { %694 = vmatprep.mubr.bf16.mxu0 %v7536_v6 }
 0x100   :  { %1837 = vmatpush1.bf16.msra.mxu0 %v5552_v31 }
 0x101   :  { %1838 = vmatprep.subr.bf16.mxu0 %v5557_v33 }
 0x104   :  { %1839 = vmatpush1.bf16.msra.mxu0 %v5555_v26  ;;  %v5593_v26 = vld [vmem:[#allocation2 + $0x1cc] ss:$12 sps:$4 sm:$0xff]  }
 0x105   :  { %1840 = vmatprep.subr.bf16.mxu0 %v5560_v29 }
 0x106   :  { %4613 = vmatmul.mubr.msk.bf16.gmra.mrb[48].mxu0 %vm371_vm6, %v6101_v10 }
 0x107   :  { %704 = vmatprep.mubr.bf16.mxu0 %v7536_v6 }
 0x108   :  { %1841 = vmatpush1.bf16.msra.mxu0 %v5558_v1 }
 0x109   :  { %1842 = vmatprep.subr.bf16.mxu0 %v5563_v4 }
 0x10c   :  { %1843 = vmatpush1.bf16.msra.mxu0 %v5561_v34 }
 0x10d   :  { %1844 = vmatprep.subr.bf16.mxu0 %v5566_v36 }
 0x10e   :  { %4614 = vmatmul.mubr.msk.bf16.gmra.mrb[52].mxu0 %vm371_vm6, %v6112_v12  ;;  %v5585_v12 = vld [vmem:[#allocation2 + $0x198] ss:$12 sps:$4 sm:$0xff]  }
 0x10f   :  { %714 = vmatprep.mubr.bf16.mxu0 %v7536_v6 }
 0x110   :  { %1845 = vmatpush1.bf16.msra.mxu0 %v5564_v37 }
 0x111   :  { %1846 = vmatprep.subr.bf16.mxu0 %v5569_v38 }
 0x114   :  { %1847 = vmatpush1.bf16.msra.mxu0 %v5567_v39 }
 0x115   :  { %1848 = vmatprep.subr.bf16.mxu0 %v5572_v40 }
 0x116   :  { %4615 = vmatmul.mubr.msk.bf16.gmra.mrb[56].mxu0 %vm371_vm6, %v6123_v13 }
 0x117   :  { %724 = vmatprep.mubr.bf16.mxu0 %v7536_v6 }
 0x118   :  { %1849 = vmatpush1.bf16.msra.mxu0 %v5570_v41 }
 0x119   :  { %1850 = vmatprep.subr.bf16.mxu0 %v5575_v42  ;;  %v5591_v42 = vld [vmem:[#allocation2 + $0x1c8] ss:$12 sps:$4 sm:$0xff]  }
 0x11c   :  { %1851 = vmatpush1.bf16.msra.mxu0 %v5573_v25 }
 0x11d   :  { %1852 = vmatprep.subr.bf16.mxu0 %v5578_v27 }
 0x11e   :  { %4616 = vmatmul.mubr.msk.bf16.gmra.mrb[60].mxu0 %vm371_vm6, %v6134_v14 }
 0x120   :  { %1853 = vmatpush1.bf16.msra.mxu0 %v5576_v32 }
 0x121   :  { %1854 = vmatprep.subr.bf16.mxu0 %v5581_v35 }
 0x124   :  { %1855 = vmatpush1.bf16.msra.mxu0 %v5579_v43  ;;  %v5596_v43 = vld [vmem:[#allocation2 + $0x1e4] ss:$12 sps:$4 sm:$0xff]  }
 0x125   :  { %1937 = vmatprep.subr.bf16.mxu0 %v5584_v44 }
 0x179   :  { %v430_v46 = vpop.f32.mrb[0].mxu0 }
 0x17a   :  { %v431_v50 = vadd.f32 %v430_v46, %v6171_v45  ;;  %v432_v52 = vpop.f32.mrb[1].mxu0 }
 0x17b   :  { %v433_v54 = vadd.f32 %v432_v52, %v6171_v45  ;;  %v434_v47 = vpop.f32.mrb[2].mxu0 }
 0x17c   :  { %v435_v48 = vadd.f32 %v434_v47, %v6174_v53  ;;  %v436_v49 = vpop.f32.mrb[3].mxu0  ;;  %v735_v55 = vmax.f32 %v431_v50, 0.0  ;;  %v6213_v47 = vpop.permute.xlu0 %288 }
 0x17d   :  { %v437_v51 = vadd.f32 %v436_v49, %v6174_v53  ;;  %v736_v8 = vmax.f32 %v433_v54, 0.0  ;;  %v6211_v54 = vpop.permute.xlu1 %283 }
 0x17e   :  { %v741_v56 = vmax.f32 %v435_v48, 0.0 }
 0x17f   :  { %v742_v57 = vmax.f32 %v437_v51, 0.0 }
 0x180   :  { %v6179_v58 = vpack.c.bf16 %v741_v56, %v735_v55 }
 0x181   :  { %v6183_v59 = vpack.c.bf16 %v742_v57, %v736_v8  ;;  %v440_v60 = vpop.f32.mrb[4].mxu0  ;;  %v5594_v57 = vld [vmem:[#allocation2 + $0x1e0] ss:$12 sps:$4 sm:$0xff]  }
 0x182   :  { %v441_v63 = vadd.f32 %v440_v60, %v6181_v5  ;;  %v442_v0 = vpop.f32.mrb[5].mxu0 }
 0x183   :  { %v443_v3 = vadd.f32 %v442_v0, %v6181_v5  ;;  %v444_v7 = vpop.f32.mrb[6].mxu0  ;;  %1856 = vmatprep.mubr.bf16.mxu0 %v6183_v59 }
 0x184   :  { %v445_v9 = vadd.f32 %v444_v7, %v6185_v62  ;;  %v446_v11 = vpop.f32.mrb[7].mxu0  ;;  %1857 = vmatmul.mubr.bf16.vlgmr.msra.gmra.mrb[64].mxu0 %v6179_v58  ;;  %v747_v13 = vmax.f32 %v441_v63, 0.0 }
 0x185   :  { %v447_v10 = vadd.f32 %v446_v11, %v6185_v62  ;;  %1938 = vmatpush1.bf16.msra.mxu0 %v5582_v61  ;;  %v748_v17 = vmax.f32 %v443_v3, 0.0 }
 0x186   :  { %v753_v14 = vmax.f32 %v445_v9, 0.0  ;;  %1939 = vmatprep.subr.bf16.mxu0 %v5587_v2  ;;  %v5599_v2 = vld [vmem:[#allocation2 + $0x1fc] ss:$12 sps:$4 sm:$0xff]  }
 0x187   :  { %v754_v18 = vmax.f32 %v447_v10, 0.0 }
 0x188   :  { %v6197_v21 = vpack.c.bf16 %v753_v14, %v747_v13 }
 0x189   :  { %v6199_v16 = vpack.c.bf16 %v754_v18, %v748_v17  ;;  %v450_v22 = vpop.f32.mrb[8].mxu0  ;;  %v543_v23 = vpop.f32.mrb[0].mxu1  ;;  %1940 = vmatpush1.bf16.msra.mxu0 %v5585_v12  ;;  %v5597_v18 = vld [vmem:[#allocation2 + $0x1f8] ss:$12 sps:$4 sm:$0xff]  }
 0x18a   :  { %v451_v28 = vadd.f32 %v450_v22, %v6193_v19  ;;  %v544_v30 = vadd.f32 %v543_v23, %v6171_v45  ;;  %v452_v31 = vpop.f32.mrb[9].mxu0  ;;  %v545_v33 = vpop.f32.mrb[1].mxu1  ;;  %1941 = vmatprep.subr.bf16.mxu0 %v5590_v15 }
 0x18b   :  { %v453_v29 = vadd.f32 %v452_v31, %v6193_v19  ;;  %v546_v1 = vadd.f32 %v545_v33, %v6171_v45  ;;  %v454_v4 = vpop.f32.mrb[10].mxu0  ;;  %v547_v34 = vpop.f32.mrb[2].mxu1  ;;  %1866 = vmatprep.mubr.bf16.mxu0 %v6199_v16 }
 0x18c   :  { %v455_v36 = vadd.f32 %v454_v4, %v6195_v20  ;;  %v548_v37 = vadd.f32 %v547_v34, %v6174_v53  ;;  %v456_v38 = vpop.f32.mrb[11].mxu0  ;;  %v549_v39 = vpop.f32.mrb[3].mxu1  ;;  %1867 = vmatmul.mubr.bf16.gmra.mrb[68].mxu0 %v6197_v21  ;;  %v759_v25 = vmax.f32 %v451_v28, 0.0  ;;  %v737_v27 = vmax.f32 %v544_v30, 0.0  ;;  %v5602_v30 = vld [vmem:[#allocation2 + $0x214] ss:$12 sps:$4 sm:$0xff]  }
 0x18d   :  { %v457_v40 = vadd.f32 %v456_v38, %v6195_v20  ;;  %v550_v41 = vadd.f32 %v549_v39, %v6174_v53  ;;  %1942 = vmatpush1.bf16.msra.mxu0 %v5588_v24  ;;  %v760_v44 = vmax.f32 %v453_v29, 0.0  ;;  %v738_v46 = vmax.f32 %v546_v1, 0.0  ;;  %v6233_v1 = vpop.permute.xlu1 %293  ;;  %v6235_v4 = vpop.permute.xlu0 %298 }
 0x18e   :  { %v765_v32 = vmax.f32 %v455_v36, 0.0  ;;  %v743_v35 = vmax.f32 %v548_v37, 0.0  ;;  %1943 = vmatprep.subr.bf16.mxu0 %v5593_v26 }
 0x18f   :  { %v766_v50 = vmax.f32 %v457_v40, 0.0  ;;  %v744_v52 = vmax.f32 %v550_v41, 0.0  ;;  %v5600_v41 = vld [vmem:[#allocation2 + $0x210] ss:$12 sps:$4 sm:$0xff]  }
 0x190   :  { %v6215_v48 = vpack.c.bf16 %v765_v32, %v759_v25  ;;  %v6217_v49 = vpack.c.bf16 %v743_v35, %v737_v27  ;;  %v5605_v35 = vld [vmem:[#allocation2 + $0x22c] ss:$12 sps:$4 sm:$0xff]  }
 0x191   :  { %v6219_v51 = vpack.c.bf16 %v766_v50, %v760_v44  ;;  %v6221_v55 = vpack.c.bf16 %v744_v52, %v738_v46  ;;  %v460_v56 = vpop.f32.mrb[12].mxu0  ;;  %v553_v8 = vpop.f32.mrb[4].mxu1  ;;  %1944 = vmatpush1.bf16.msra.mxu0 %v5591_v42 }
 0x192   :  { %7543 = vst [vmem:[#allocation8_spill] sm:$0xff] %v6217_v49  ;;  %v461_v60 = vadd.f32 %v460_v56, %v6211_v54  ;;  %v554_v61 = vadd.f32 %v553_v8, %v6181_v5  ;;  %v462_v63 = vpop.f32.mrb[13].mxu0  ;;  %v555_v0 = vpop.f32.mrb[5].mxu1  ;;  %1945 = vmatprep.subr.bf16.mxu0 %v5596_v43 }
 0x193   :  { %7544 = vst [vmem:[#allocation9_spill] sm:$0xff] %v6221_v55  ;;  %v463_v3 = vadd.f32 %v462_v63, %v6211_v54  ;;  %v556_v7 = vadd.f32 %v555_v0, %v6181_v5  ;;  %v464_v9 = vpop.f32.mrb[14].mxu0  ;;  %v557_v11 = vpop.f32.mrb[6].mxu1  ;;  %1876 = vmatprep.mubr.bf16.mxu0 %v6219_v51  ;;  %v5603_v63 = vld [vmem:[#allocation2 + $0x228] ss:$12 sps:$4 sm:$0xff]  }
 0x194   :  { %v465_v10 = vadd.f32 %v464_v9, %v6213_v47  ;;  %v558_v12 = vadd.f32 %v557_v11, %v6185_v62  ;;  %v466_v13 = vpop.f32.mrb[15].mxu0  ;;  %v559_v14 = vpop.f32.mrb[7].mxu1  ;;  %1877 = vmatmul.mubr.bf16.gmra.mrb[72].mxu0 %v6215_v48  ;;  %v771_v22 = vmax.f32 %v461_v60, 0.0  ;;  %v749_v23 = vmax.f32 %v554_v61, 0.0  ;;  %v5608_v9 = vld [vmem:[#allocation2 + $0x244] ss:$12 sps:$4 sm:$0xff]  }
 0x195   :  { %v467_v15 = vadd.f32 %v466_v13, %v6213_v47  ;;  %v560_v17 = vadd.f32 %v559_v14, %v6185_v62  ;;  %1946 = vmatpush1.bf16.msra.mxu0 %v5594_v57  ;;  %v772_v31 = vmax.f32 %v463_v3, 0.0  ;;  %v750_v33 = vmax.f32 %v556_v7, 0.0  ;;  %v6255_v14 = vpop.permute.xlu1 %303 }
 0x196   :  { %v777_v24 = vmax.f32 %v465_v10, 0.0  ;;  %v755_v28 = vmax.f32 %v558_v12, 0.0  ;;  %1947 = vmatprep.subr.bf16.mxu0 %v5599_v2 }
 0x197   :  { %v778_v26 = vmax.f32 %v467_v15, 0.0  ;;  %v756_v29 = vmax.f32 %v560_v17, 0.0  ;;  %v6257_v15 = vpop.permute.xlu0 %308 }
 0x198   :  { %v6237_v34 = vpack.c.bf16 %v777_v24, %v771_v22  ;;  %v6239_v36 = vpack.c.bf16 %v755_v28, %v749_v23 }
 0x199   :  { %v6241_v37 = vpack.c.bf16 %v778_v26, %v772_v31  ;;  %v6243_v38 = vpack.c.bf16 %v756_v29, %v750_v33  ;;  %v470_v39 = vpop.f32.mrb[16].mxu0  ;;  %v563_v40 = vpop.f32.mrb[8].mxu1  ;;  %1948 = vmatpush1.bf16.msra.mxu0 %v5597_v18 }
 0x19a   :  { %v471_v42 = vadd.f32 %v470_v39, %v6233_v1  ;;  %v564_v25 = vadd.f32 %v563_v40, %v6193_v19  ;;  %v472_v27 = vpop.f32.mrb[17].mxu0  ;;  %v565_v32 = vpop.f32.mrb[9].mxu1  ;;  %1949 = vmatprep.subr.bf16.mxu0 %v5602_v30  ;;  %v5606_v30 = vld [vmem:[#allocation2 + $0x240] ss:$12 sps:$4 sm:$0xff]   ;;  %v5611_v39 = vld [vmem:[#allocation2 + $0x25c] ss:$12 sps:$4 sm:$0xff]  }
 0x19b   :  { %v473_v43 = vadd.f32 %v472_v27, %v6233_v1  ;;  %v566_v44 = vadd.f32 %v565_v32, %v6193_v19  ;;  %v474_v46 = vpop.f32.mrb[18].mxu0  ;;  %v567_v50 = vpop.f32.mrb[10].mxu1  ;;  %1886 = vmatprep.mubr.bf16.mxu0 %v6241_v37 }
 0x19c   :  { %v475_v52 = vadd.f32 %v474_v46, %v6235_v4  ;;  %v568_v56 = vadd.f32 %v567_v50, %v6195_v20  ;;  %v476_v8 = vpop.f32.mrb[19].mxu0  ;;  %v569_v57 = vpop.f32.mrb[11].mxu1  ;;  %1887 = vmatmul.mubr.bf16.gmra.mrb[76].mxu0 %v6237_v34  ;;  %v783_v0 = vmax.f32 %v471_v42, 0.0  ;;  %v761_v2 = vmax.f32 %v564_v25, 0.0  ;;  %v5609_v50 = vld [vmem:[#allocation2 + $0x258] ss:$12 sps:$4 sm:$0xff]  }
 0x19d   :  { %v477_v60 = vadd.f32 %v476_v8, %v6235_v4  ;;  %v570_v61 = vadd.f32 %v569_v57, %v6195_v20  ;;  %1950 = vmatpush1.bf16.msra.mxu0 %v5600_v41  ;;  %v784_v11 = vmax.f32 %v473_v43, 0.0  ;;  %v762_v10 = vmax.f32 %v566_v44, 0.0 }
 0x19e   :  { %v789_v3 = vmax.f32 %v475_v52, 0.0  ;;  %v767_v7 = vmax.f32 %v568_v56, 0.0  ;;  %1951 = vmatprep.subr.bf16.mxu0 %v5605_v35 }
 0x19f   :  { %v790_v12 = vmax.f32 %v477_v60, 0.0  ;;  %v768_v13 = vmax.f32 %v570_v61, 0.0  ;;  %v5614_v60 = vld [vmem:[#allocation2 + $0x274] ss:$12 sps:$4 sm:$0xff]  }
 0x1a0   :  { %v6259_v17 = vpack.c.bf16 %v789_v3, %v783_v0  ;;  %v6261_v18 = vpack.c.bf16 %v767_v7, %v761_v2  ;;  %v6277_v3 = vpop.permute.xlu1 %313  ;;  %v6279_v7 = vpop.permute.xlu0 %318 }
 0x1a1   :  { %v6263_v22 = vpack.c.bf16 %v790_v12, %v784_v11  ;;  %v6265_v23 = vpack.c.bf16 %v768_v13, %v762_v10  ;;  %v480_v24 = vpop.f32.mrb[20].mxu0  ;;  %v573_v28 = vpop.f32.mrb[12].mxu1  ;;  %1952 = vmatpush1.bf16.msra.mxu0 %v5603_v63 }
 0x1a2   :  { %v481_v31 = vadd.f32 %v480_v24, %v6255_v14  ;;  %v574_v33 = vadd.f32 %v573_v28, %v6211_v54  ;;  %v482_v26 = vpop.f32.mrb[21].mxu0  ;;  %v575_v29 = vpop.f32.mrb[13].mxu1  ;;  %1953 = vmatprep.subr.bf16.mxu0 %v5608_v9  ;;  %v5612_v28 = vld [vmem:[#allocation2 + $0x270] ss:$12 sps:$4 sm:$0xff]  }
 0x1a3   :  { %v483_v40 = vadd.f32 %v482_v26, %v6255_v14  ;;  %v576_v41 = vadd.f32 %v575_v29, %v6211_v54  ;;  %v484_v42 = vpop.f32.mrb[22].mxu0  ;;  %v577_v25 = vpop.f32.mrb[14].mxu1  ;;  %1896 = vmatprep.mubr.bf16.mxu0 %v6263_v22  ;;  %v5617_v29 = vld [vmem:[#allocation2 + $0x28c] ss:$12 sps:$4 sm:$0xff]  }
 0x1a4   :  { %v485_v27 = vadd.f32 %v484_v42, %v6257_v15  ;;  %v578_v32 = vadd.f32 %v577_v25, %v6213_v47  ;;  %v486_v35 = vpop.f32.mrb[23].mxu0  ;;  %v579_v43 = vpop.f32.mrb[15].mxu1  ;;  %1897 = vmatmul.mubr.bf16.gmra.mrb[80].mxu0 %v6259_v17  ;;  %v795_v52 = vmax.f32 %v481_v31, 0.0  ;;  %v773_v56 = vmax.f32 %v574_v33, 0.0 }
 0x1a5   :  { %v487_v44 = vadd.f32 %v486_v35, %v6257_v15  ;;  %v580_v46 = vadd.f32 %v579_v43, %v6213_v47  ;;  %1954 = vmatpush1.bf16.msra.mxu0 %v5606_v30  ;;  %v796_v61 = vmax.f32 %v483_v40, 0.0  ;;  %v774_v63 = vmax.f32 %v576_v41, 0.0 }
 0x1a6   :  { %v801_v8 = vmax.f32 %v485_v27, 0.0  ;;  %v779_v57 = vmax.f32 %v578_v32, 0.0  ;;  %1955 = vmatprep.subr.bf16.mxu0 %v5611_v39 }
 0x1a7   :  { %v802_v0 = vmax.f32 %v487_v44, 0.0  ;;  %v780_v2 = vmax.f32 %v580_v46, 0.0  ;;  %v5615_v46 = vld [vmem:[#allocation2 + $0x288] ss:$12 sps:$4 sm:$0xff]  }
 0x1a8   :  { %v6281_v9 = vpack.c.bf16 %v801_v8, %v795_v52  ;;  %v6283_v11 = vpack.c.bf16 %v779_v57, %v773_v56  ;;  %v5620_v57 = vld [vmem:[#allocation2 + $0x2a4] ss:$12 sps:$4 sm:$0xff]  }
 0x1a9   :  { %v6285_v10 = vpack.c.bf16 %v802_v0, %v796_v61  ;;  %v6287_v12 = vpack.c.bf16 %v780_v2, %v774_v63  ;;  %v490_v13 = vpop.f32.mrb[24].mxu0  ;;  %v583_v24 = vpop.f32.mrb[16].mxu1  ;;  %1956 = vmatpush1.bf16.msra.mxu0 %v5609_v50 }
 0x1aa   :  { %v491_v30 = vadd.f32 %v490_v13, %v6277_v3  ;;  %v584_v31 = vadd.f32 %v583_v24, %v6233_v1  ;;  %v492_v33 = vpop.f32.mrb[25].mxu0  ;;  %v585_v26 = vpop.f32.mrb[17].mxu1  ;;  %1957 = vmatprep.subr.bf16.mxu0 %v5614_v60 }
 0x1ab   :  { %v493_v39 = vadd.f32 %v492_v33, %v6277_v3  ;;  %v586_v40 = vadd.f32 %v585_v26, %v6233_v1  ;;  %v494_v41 = vpop.f32.mrb[26].mxu0  ;;  %v587_v42 = vpop.f32.mrb[18].mxu1  ;;  %1906 = vmatprep.mubr.bf16.mxu0 %v6285_v10 }
 0x1ac   :  { %v495_v25 = vadd.f32 %v494_v41, %v6279_v7  ;;  %v588_v27 = vadd.f32 %v587_v42, %v6235_v4  ;;  %v496_v32 = vpop.f32.mrb[27].mxu0  ;;  %v589_v35 = vpop.f32.mrb[19].mxu1  ;;  %1907 = vmatmul.mubr.bf16.gmra.mrb[84].mxu0 %v6281_v9  ;;  %v807_v50 = vmax.f32 %v491_v30, 0.0  ;;  %v785_v52 = vmax.f32 %v584_v31, 0.0 }
 0x1ad   :  { %v497_v43 = vadd.f32 %v496_v32, %v6279_v7  ;;  %v590_v44 = vadd.f32 %v589_v35, %v6235_v4  ;;  %1958 = vmatpush1.bf16.msra.mxu0 %v5612_v28  ;;  %v808_v60 = vmax.f32 %v493_v39, 0.0  ;;  %v786_v61 = vmax.f32 %v586_v40, 0.0  ;;  %v6299_v2 = vpop.permute.xlu1 %323  ;;  %v6301_v13 = vpop.permute.xlu0 %328 }
 0x1ae   :  { %v813_v56 = vmax.f32 %v495_v25, 0.0  ;;  %v791_v8 = vmax.f32 %v588_v27, 0.0  ;;  %1959 = vmatprep.subr.bf16.mxu0 %v5617_v29  ;;  %v5618_v29 = vld [vmem:[#allocation2 + $0x2a0] ss:$12 sps:$4 sm:$0xff]   ;;  %v5623_v25 = vld [vmem:[#allocation2 + $0x2bc] ss:$12 sps:$4 sm:$0xff]  }
 0x1af   :  { %v814_v63 = vmax.f32 %v497_v43, 0.0  ;;  %v792_v0 = vmax.f32 %v590_v44, 0.0 }
 0x1b0   :  { %v6303_v24 = vpack.c.bf16 %v813_v56, %v807_v50  ;;  %v6305_v33 = vpack.c.bf16 %v791_v8, %v785_v52 }
 0x1b1   :  { %v6307_v28 = vpack.c.bf16 %v814_v63, %v808_v60  ;;  %v6309_v30 = vpack.c.bf16 %v792_v0, %v786_v61  ;;  %v500_v31 = vpop.f32.mrb[28].mxu0  ;;  %v593_v26 = vpop.f32.mrb[20].mxu1  ;;  %1960 = vmatpush1.bf16.msra.mxu0 %v5615_v46 }
 0x1b2   :  { %7545 = vst [vmem:[#allocation10_spill] sm:$0xff] %v6303_v24  ;;  %v501_v39 = vadd.f32 %v500_v31, %v6299_v2  ;;  %v594_v40 = vadd.f32 %v593_v26, %v6255_v14  ;;  %v502_v41 = vpop.f32.mrb[29].mxu0  ;;  %v595_v42 = vpop.f32.mrb[21].mxu1  ;;  %1961 = vmatprep.subr.bf16.mxu0 %v5620_v57  ;;  %v5621_v57 = vld [vmem:[#allocation2 + $0x2b8] ss:$12 sps:$4 sm:$0xff]  }
 0x1b3   :  { %v503_v27 = vadd.f32 %v502_v41, %v6299_v2  ;;  %v596_v32 = vadd.f32 %v595_v42, %v6255_v14  ;;  %v504_v35 = vpop.f32.mrb[30].mxu0  ;;  %v597_v43 = vpop.f32.mrb[22].mxu1  ;;  %1916 = vmatprep.mubr.bf16.mxu0 %v6307_v28  ;;  %v5626_v31 = vld [vmem:[#allocation2 + $0x2d4] ss:$12 sps:$4 sm:$0xff]  }
 0x1b4   :  { %v505_v44 = vadd.f32 %v504_v35, %v6301_v13  ;;  %v598_v46 = vadd.f32 %v597_v43, %v6257_v15  ;;  %v506_v50 = vpop.f32.mrb[31].mxu0  ;;  %v599_v52 = vpop.f32.mrb[23].mxu1  ;;  %1917 = vmatmul.mubr.bf16.gmra.mrb[88].mxu0 %v6303_v24  ;;  %v819_v60 = vmax.f32 %v501_v39, 0.0  ;;  %v797_v61 = vmax.f32 %v594_v40, 0.0  ;;  %v5624_v39 = vld [vmem:[#allocation2 + $0x2d0] ss:$12 sps:$4 sm:$0xff]  }
 0x1b5   :  { %v507_v56 = vadd.f32 %v506_v50, %v6301_v13  ;;  %v600_v8 = vadd.f32 %v599_v52, %v6257_v15  ;;  %1962 = vmatpush1.bf16.msra.mxu0 %v5618_v29  ;;  %v820_v26 = vmax.f32 %v503_v27, 0.0  ;;  %v798_v41 = vmax.f32 %v596_v32, 0.0 }
 0x1b6   :  { %v825_v63 = vmax.f32 %v505_v44, 0.0  ;;  %v803_v0 = vmax.f32 %v598_v46, 0.0  ;;  %1963 = vmatprep.subr.bf16.mxu0 %v5623_v25  ;;  %v5629_v44 = vld [vmem:[#allocation2 + $0x2ec] ss:$12 sps:$4 sm:$0xff]  }
 0x1b7   :  { %v826_v42 = vmax.f32 %v507_v56, 0.0  ;;  %v804_v35 = vmax.f32 %v600_v8, 0.0 }
 0x1b8   :  { %v6321_v43 = vpack.c.bf16 %v825_v63, %v819_v60  ;;  %v6323_v6 = vpack.c.bf16 %v803_v0, %v797_v61 }
 0x1b9   :  { %v6325_v24 = vpack.c.bf16 %v826_v42, %v820_v26  ;;  %v6327_v50 = vpack.c.bf16 %v804_v35, %v798_v41  ;;  %v603_v29 = vpop.f32.mrb[24].mxu1  ;;  %v656_v52 = vpop.f32.mrb[32].mxu0  ;;  %1964 = vmatpush1.bf16.msra.mxu0 %v5621_v57 }
 0x1ba   :  { %7546 = vst [vmem:[#allocation11_spill] sm:$0xff] %v6321_v43  ;;  %v604_v40 = vadd.f32 %v603_v29, %v6277_v3  ;;  %v657_v25 = vadd.f32 %v656_v52, %v6171_v45  ;;  %v605_v27 = vpop.f32.mrb[25].mxu1  ;;  %v658_v32 = vpop.f32.mrb[33].mxu0  ;;  %1965 = vmatprep.subr.bf16.mxu0 %v5626_v31  ;;  %v5632_v52 = vld [vmem:[#allocation2 + $0x304] ss:$12 sps:$4 sm:$0xff]  }
 0x1bb   :  { %7547 = vst [vmem:[#allocation12_spill] sm:$0xff] %v6325_v24  ;;  %v606_v46 = vadd.f32 %v605_v27, %v6277_v3  ;;  %v659_v56 = vadd.f32 %v658_v32, %v6171_v45  ;;  %v607_v8 = vpop.f32.mrb[26].mxu1  ;;  %v660_v60 = vpop.f32.mrb[34].mxu0  ;;  %1926 = vmatprep.mubr.bf16.mxu0 %v6325_v24  ;;  %v5627_v45 = vld [vmem:[#allocation2 + $0x2e8] ss:$12 sps:$4 sm:$0xff]  }
 0x1bc   :  { %v608_v61 = vadd.f32 %v607_v8, %v6279_v7  ;;  %v661_v57 = vadd.f32 %v660_v60, %v6174_v53  ;;  %v609_v63 = vpop.f32.mrb[27].mxu1  ;;  %v662_v0 = vpop.f32.mrb[35].mxu0  ;;  %1927 = vmatmul.mubr.bf16.gmra.mrb[92].mxu0 %v6321_v43  ;;  %v809_v41 = vmax.f32 %v604_v40, 0.0  ;;  %v739_v42 = vmax.f32 %v657_v25, 0.0  ;;  %v5630_v40 = vld [vmem:[#allocation2 + $0x300] ss:$12 sps:$4 sm:$0xff]  }
 0x1bd   :  { %v610_v26 = vadd.f32 %v609_v63, %v6279_v7  ;;  %v663_v31 = vadd.f32 %v662_v0, %v6174_v53  ;;  %1966 = vmatpush1.bf16.msra.mxu0 %v5624_v39  ;;  %1969 = vmatprep.mubr.bf16.mxu0 %v6221_v55  ;;  %v810_v27 = vmax.f32 %v606_v46, 0.0  ;;  %v740_v32 = vmax.f32 %v659_v56, 0.0 }
 0x1be   :  { %v815_v35 = vmax.f32 %v608_v61, 0.0  ;;  %v745_v29 = vmax.f32 %v661_v57, 0.0  ;;  %1967 = vmatprep.subr.bf16.mxu0 %v5629_v44  ;;  %v5635_v61 = vld [vmem:[#allocation2 + $0x31c] ss:$12 sps:$4 sm:$0xff]  }
 0x1bf   :  { %v816_v8 = vmax.f32 %v610_v26, 0.0  ;;  %v746_v60 = vmax.f32 %v663_v31, 0.0 }
 0x1c0   :  { %v6340_v24 = vpack.c.bf16 %v815_v35, %v809_v41  ;;  %v6342_v43 = vpack.c.bf16 %v745_v29, %v739_v42 }
 0x1c1   :  { %v6344_v63 = vpack.c.bf16 %v816_v8, %v810_v27  ;;  %v6346_v53 = vpack.c.bf16 %v746_v60, %v740_v32  ;;  %v613_v39 = vpop.f32.mrb[28].mxu1  ;;  %v666_v0 = vpop.f32.mrb[36].mxu0  ;;  %1968 = vmatpush1.bf16.msra.mxu0 %v5627_v45 }
 0x1c2   :  { %v614_v25 = vadd.f32 %v613_v39, %v6299_v2  ;;  %v667_v44 = vadd.f32 %v666_v0, %v6181_v5  ;;  %v615_v46 = vpop.f32.mrb[29].mxu1  ;;  %v668_v56 = vpop.f32.mrb[37].mxu0  ;;  %2050 = vmatprep.subr.bf16.mxu0 %v5632_v52  ;;  %v5633_v52 = vld [vmem:[#allocation2 + $0x318] ss:$12 sps:$4 sm:$0xff]   ;;  %v5638_v0 = vld [vmem:[#allocation2 + $0x334] ss:$12 sps:$4 sm:$0xff]  }
 0x1c3   :  { %v616_v57 = vadd.f32 %v615_v46, %v6299_v2  ;;  %v669_v26 = vadd.f32 %v668_v56, %v6181_v5  ;;  %v617_v31 = vpop.f32.mrb[30].mxu1  ;;  %v670_v41 = vpop.f32.mrb[38].mxu0 }
 0x1c4   :  { %v618_v42 = vadd.f32 %v617_v31, %v6301_v13  ;;  %v671_v35 = vadd.f32 %v670_v41, %v6185_v62  ;;  %v619_v45 = vpop.f32.mrb[31].mxu1  ;;  %v672_v29 = vpop.f32.mrb[39].mxu0  ;;  %1970 = vmatmul.mubr.bf16.vlgmr.msra.gmra.mrb[64].mxu0 %v6217_v49  ;;  %v821_v8 = vmax.f32 %v614_v25, 0.0  ;;  %v751_v5 = vmax.f32 %v667_v44, 0.0  ;;  %v5636_v25 = vld [vmem:[#allocation2 + $0x330] ss:$12 sps:$4 sm:$0xff]  }
 0x1c5   :  { %v620_v27 = vadd.f32 %v619_v45, %v6301_v13  ;;  %v673_v32 = vadd.f32 %v672_v29, %v6185_v62  ;;  %1979 = vmatprep.mubr.bf16.mxu0 %v6243_v38  ;;  %2051 = vmatpush1.bf16.msra.mxu0 %v5630_v40  ;;  %v822_v46 = vmax.f32 %v616_v57, 0.0  ;;  %v752_v56 = vmax.f32 %v669_v26, 0.0 }
 0x1c6   :  { %v827_v60 = vmax.f32 %v618_v42, 0.0  ;;  %v757_v39 = vmax.f32 %v671_v35, 0.0  ;;  %2052 = vmatprep.subr.bf16.mxu0 %v5635_v61  ;;  %v5641_v61 = vld [vmem:[#allocation2 + $0x34c] ss:$12 sps:$4 sm:$0xff]  }
 0x1c7   :  { %v828_v31 = vmax.f32 %v620_v27, 0.0  ;;  %v758_v41 = vmax.f32 %v673_v32, 0.0  ;;  %v5639_v32 = vld [vmem:[#allocation2 + $0x348] ss:$12 sps:$4 sm:$0xff]  }
 0x1c8   :  { %v6358_v55 = vpack.c.bf16 %v827_v60, %v821_v8  ;;  %v6360_v49 = vpack.c.bf16 %v757_v39, %v751_v5  ;;  %v5644_v5 = vld [vmem:[#allocation2 + $0x364] ss:$12 sps:$4 sm:$0xff]  }
 0x1c9   :  { %v6362_v45 = vpack.c.bf16 %v828_v31, %v822_v46  ;;  %v6364_v62 = vpack.c.bf16 %v758_v41, %v752_v56  ;;  %v676_v40 = vpop.f32.mrb[40].mxu0  ;;  %2053 = vmatpush1.bf16.msra.mxu0 %v5633_v52  ;;  %v5642_v56 = vld [vmem:[#allocation2 + $0x360] ss:$12 sps:$4 sm:$0xff]   ;;  %v5647_v41 = vld [vmem:[#allocation2 + $0x37c] ss:$12 sps:$4 sm:$0xff]  }
 0x1ca   :  { %v677_v44 = vadd.f32 %v676_v40, %v6193_v19  ;;  %v678_v42 = vpop.f32.mrb[41].mxu0  ;;  %2054 = vmatprep.subr.bf16.mxu0 %v5638_v0 }
 0x1cb   :  { %v679_v57 = vadd.f32 %v678_v42, %v6193_v19  ;;  %v680_v26 = vpop.f32.mrb[42].mxu0 }
 0x1cc   :  { %v681_v35 = vadd.f32 %v680_v26, %v6195_v20  ;;  %v682_v29 = vpop.f32.mrb[43].mxu0  ;;  %1980 = vmatmul.mubr.bf16.gmra.mrb[68].mxu0 %v6239_v36  ;;  %v763_v52 = vmax.f32 %v677_v44, 0.0 }
 0x1cd   :  { %v683_v27 = vadd.f32 %v682_v29, %v6195_v20  ;;  %1989 = vmatprep.mubr.bf16.mxu0 %v6265_v23  ;;  %2055 = vmatpush1.bf16.msra.mxu0 %v5636_v25  ;;  %v764_v60 = vmax.f32 %v679_v57, 0.0  ;;  %v5645_v57 = vld [vmem:[#allocation2 + $0x378] ss:$12 sps:$4 sm:$0xff]   ;;  %v5650_v29 = vld [vmem:[#allocation2 + $0x394] ss:$12 sps:$4 sm:$0xff]  }
 0x1ce   :  { %v769_v8 = vmax.f32 %v681_v35, 0.0  ;;  %2056 = vmatprep.subr.bf16.mxu0 %v5641_v61 }
 0x1cf   :  { %v770_v39 = vmax.f32 %v683_v27, 0.0 }
 0x1d0   :  { %v6372_v0 = vpack.c.bf16 %v769_v8, %v763_v52 }
 0x1d1   :  { %v6374_v19 = vpack.c.bf16 %v770_v39, %v764_v60  ;;  %v686_v46 = vpop.f32.mrb[44].mxu0  ;;  %2057 = vmatpush1.bf16.msra.mxu0 %v5639_v32  ;;  %v5653_v39 = vld [vmem:[#allocation2 + $0x3ac] ss:$12 sps:$4 sm:$0xff]  }
 0x1d2   :  { %v687_v31 = vadd.f32 %v686_v46, %v6211_v54  ;;  %v688_v20 = vpop.f32.mrb[45].mxu0  ;;  %2058 = vmatprep.subr.bf16.mxu0 %v5644_v5  ;;  %v5648_v5 = vld [vmem:[#allocation2 + $0x390] ss:$12 sps:$4 sm:$0xff]  }
 0x1d3   :  { %v689_v40 = vadd.f32 %v688_v20, %v6211_v54  ;;  %v690_v25 = vpop.f32.mrb[46].mxu0 }
 0x1d4   :  { %v691_v44 = vadd.f32 %v690_v25, %v6213_v47  ;;  %v692_v42 = vpop.f32.mrb[47].mxu0  ;;  %1990 = vmatmul.mubr.bf16.gmra.mrb[72].mxu0 %v6261_v18  ;;  %v775_v26 = vmax.f32 %v687_v31, 0.0 }
 0x1d5   :  { %v693_v61 = vadd.f32 %v692_v42, %v6213_v47  ;;  %1999 = vmatprep.mubr.bf16.mxu0 %v6287_v12  ;;  %2059 = vmatpush1.bf16.msra.mxu0 %v5642_v56  ;;  %v776_v27 = vmax.f32 %v689_v40, 0.0  ;;  %v5651_v40 = vld [vmem:[#allocation2 + $0x3a8] ss:$12 sps:$4 sm:$0xff]   ;;  %v5656_v42 = vld [vmem:[#allocation2 + $0x3c4] ss:$12 sps:$4 sm:$0xff]  }
 0x1d6   :  { %v781_v35 = vmax.f32 %v691_v44, 0.0  ;;  %2060 = vmatprep.subr.bf16.mxu0 %v5647_v41 }
 0x1d7   :  { %v782_v32 = vmax.f32 %v693_v61, 0.0 }
 0x1d8   :  { %v6382_v52 = vpack.c.bf16 %v781_v35, %v775_v26 }
 0x1d9   :  { %v6384_v54 = vpack.c.bf16 %v782_v32, %v776_v27  ;;  %v696_v8 = vpop.f32.mrb[48].mxu0  ;;  %2061 = vmatpush1.bf16.msra.mxu0 %v5645_v57  ;;  %v5659_v32 = vld [vmem:[#allocation2 + $0x3dc] ss:$12 sps:$4 sm:$0xff]  }
 0x1da   :  { %v697_v60 = vadd.f32 %v696_v8, %v6233_v1  ;;  %v698_v47 = vpop.f32.mrb[49].mxu0  ;;  %2062 = vmatprep.subr.bf16.mxu0 %v5650_v29  ;;  %v5654_v29 = vld [vmem:[#allocation2 + $0x3c0] ss:$12 sps:$4 sm:$0xff]  }
 0x1db   :  { %v699_v46 = vadd.f32 %v698_v47, %v6233_v1  ;;  %v700_v56 = vpop.f32.mrb[50].mxu0 }
 0x1dc   :  { %v701_v31 = vadd.f32 %v700_v56, %v6235_v4  ;;  %v702_v20 = vpop.f32.mrb[51].mxu0  ;;  %2000 = vmatmul.mubr.bf16.gmra.mrb[76].mxu0 %v6283_v11  ;;  %v787_v25 = vmax.f32 %v697_v60, 0.0 }
 0x1dd   :  { %v703_v41 = vadd.f32 %v702_v20, %v6235_v4  ;;  %2009 = vmatprep.mubr.bf16.mxu0 %v6309_v30  ;;  %2063 = vmatpush1.bf16.msra.mxu0 %v5648_v5  ;;  %v788_v61 = vmax.f32 %v699_v46, 0.0  ;;  %v5657_v46 = vld [vmem:[#allocation2 + $0x3d8] ss:$12 sps:$4 sm:$0xff]   ;;  %v5662_v20 = vld [vmem:[#allocation2 + $0x3f4] ss:$12 sps:$4 sm:$0xff]  }
 0x1de   :  { %v793_v44 = vmax.f32 %v701_v31, 0.0  ;;  %2064 = vmatprep.subr.bf16.mxu0 %v5653_v39 }
 0x1df   :  { %v794_v57 = vmax.f32 %v703_v41, 0.0 }
 0x1e0   :  { %v6392_v26 = vpack.c.bf16 %v793_v44, %v787_v25 }
 0x1e1   :  { %v6394_v1 = vpack.c.bf16 %v794_v57, %v788_v61  ;;  %v706_v35 = vpop.f32.mrb[52].mxu0  ;;  %2065 = vmatpush1.bf16.msra.mxu0 %v5651_v40  ;;  %v5665_v57 = vld [vmem:[#allocation2 + $0x40c] ss:$12 sps:$4 sm:$0xff]  }
 0x1e2   :  { %v707_v27 = vadd.f32 %v706_v35, %v6255_v14  ;;  %v708_v4 = vpop.f32.mrb[53].mxu0  ;;  %2066 = vmatprep.subr.bf16.mxu0 %v5656_v42  ;;  %v5660_v42 = vld [vmem:[#allocation2 + $0x3f0] ss:$12 sps:$4 sm:$0xff]  }
 0x1e3   :  { %v709_v8 = vadd.f32 %v708_v4, %v6255_v14  ;;  %v710_v5 = vpop.f32.mrb[54].mxu0 }
 0x1e4   :  { %v711_v60 = vadd.f32 %v710_v5, %v6257_v15  ;;  %v712_v47 = vpop.f32.mrb[55].mxu0  ;;  %2010 = vmatmul.mubr.bf16.gmra.mrb[80].mxu0 %v6305_v33  ;;  %v799_v56 = vmax.f32 %v707_v27, 0.0 }
 0x1e5   :  { %v713_v39 = vadd.f32 %v712_v47, %v6257_v15  ;;  %2019 = vmatprep.mubr.bf16.mxu0 %v6327_v50  ;;  %2067 = vmatpush1.bf16.msra.mxu0 %v5654_v29  ;;  %v800_v41 = vmax.f32 %v709_v8, 0.0  ;;  %v5663_v8 = vld [vmem:[#allocation2 + $0x408] ss:$12 sps:$4 sm:$0xff]   ;;  %v5668_v47 = vld [vmem:[#allocation2 + $0x424] ss:$12 sps:$4 sm:$0xff]  }
 0x1e6   :  { %v805_v31 = vmax.f32 %v711_v60, 0.0  ;;  %2068 = vmatprep.subr.bf16.mxu0 %v5659_v32 }
 0x1e7   :  { %v806_v40 = vmax.f32 %v713_v39, 0.0 }
 0x1e8   :  { %v6402_v25 = vpack.c.bf16 %v805_v31, %v799_v56  ;;  %v1059_v56 = vld [vmem:[#allocation2 + $0x438] sm:$0x33] }
 0x1e9   :  { %v6404_v14 = vpack.c.bf16 %v806_v40, %v800_v41  ;;  %v716_v44 = vpop.f32.mrb[56].mxu0  ;;  %2069 = vmatpush1.bf16.msra.mxu0 %v5657_v46  ;;  %v5666_v41 = vld [vmem:[#allocation2 + $0x420] ss:$12 sps:$4 sm:$0xff]  }
 0x1ea   :  { %v717_v61 = vadd.f32 %v716_v44, %v6277_v3  ;;  %v718_v15 = vpop.f32.mrb[57].mxu0  ;;  %2070 = vmatprep.subr.bf16.mxu0 %v5662_v20  ;;  %v4753_v44 = vcombine.high %v1059_v56, %v1059_v56 }
 0x1eb   :  { %v719_v35 = vadd.f32 %v718_v15, %v6277_v3  ;;  %v720_v29 = vpop.f32.mrb[58].mxu0 }
 0x1ec   :  { %v721_v27 = vadd.f32 %v720_v29, %v6279_v7  ;;  %v722_v4 = vpop.f32.mrb[59].mxu0  ;;  %2020 = vmatmul.mubr.bf16.gmra.mrb[84].mxu0 %v6323_v6  ;;  %v811_v5 = vmax.f32 %v717_v61, 0.0 }
 0x1ed   :  { %v723_v32 = vadd.f32 %v722_v4, %v6279_v7  ;;  %2029 = vmatprep.mubr.bf16.mxu0 %v6344_v63  ;;  %2071 = vmatpush1.bf16.msra.mxu0 %v5660_v42  ;;  %v812_v39 = vmax.f32 %v719_v35, 0.0  ;;  %v4752_v42 = vcombine.low %v1059_v56, %v1059_v56  ;;  %v5675_v56 = vld [vmem:[#allocation2 + $0xf8] ss:$12 sps:$4 sm:$0xff]  }
 0x1ee   :  { %v817_v60 = vmax.f32 %v721_v27, 0.0  ;;  %2072 = vmatprep.subr.bf16.mxu0 %v5665_v57 }
 0x1ef   :  { %v818_v46 = vmax.f32 %v723_v32, 0.0  ;;  %v1816_v32 = vsel %vm1814_vm7, %v4752_v42, 0  ;;  %v5681_v42 = vld [vmem:[#allocation2 + $0x140] ss:$12 sps:$4 sm:$0xff]  }
 0x1f0   :  { %v6412_v3 = vpack.c.bf16 %v817_v60, %v811_v5 }
 0x1f1   :  { %v6414_v31 = vpack.c.bf16 %v818_v46, %v812_v39  ;;  %v726_v20 = vpop.f32.mrb[60].mxu0  ;;  %2073 = vmatpush1.bf16.msra.mxu0 %v5663_v8  ;;  %v5671_v8 = vld [vmem:[#allocation2 + $0xc8] ss:$12 sps:$4 sm:$0xff]   ;;  %v5673_v39 = vld [vmem:[#allocation2 + $0xe0] ss:$12 sps:$4 sm:$0xff]  }
 0x1f2   :  { %v727_v7 = vadd.f32 %v726_v20, %v6299_v2  ;;  %v728_v40 = vpop.f32.mrb[61].mxu0  ;;  %2074 = vmatprep.subr.bf16.mxu0 %v5668_v47  ;;  %v5674_v46 = vld [vmem:[#allocation2 + $0x20] ss:$12 sps:$4 sm:$0xff]   ;;  %v5676_v20 = vld [vmem:[#allocation2 + $0x38] ss:$12 sps:$4 sm:$0xff]  }
 0x1f3   :  { %v729_v61 = vadd.f32 %v728_v40, %v6299_v2  ;;  %v730_v15 = vpop.f32.mrb[62].mxu0  ;;  %v5679_v40 = vld [vmem:[#allocation2 + $0x128] ss:$12 sps:$4 sm:$0xff]  }
 0x1f4   :  { %v731_v57 = vadd.f32 %v730_v15, %v6301_v13  ;;  %v732_v35 = vpop.f32.mrb[63].mxu0  ;;  %2030 = vmatmul.mubr.bf16.gmra.mrb[88].mxu0 %v6340_v24  ;;  %v823_v27 = vmax.f32 %v727_v7, 0.0  ;;  %v5678_v7 = vld [vmem:[#allocation2 + $0x50] ss:$12 sps:$4 sm:$0xff]   ;;  %v5683_v15 = vld [vmem:[#allocation2 + $0x158] ss:$12 sps:$4 sm:$0xff]  }
 0x1f5   :  { %v733_v29 = vadd.f32 %v732_v35, %v6301_v13  ;;  %2039 = vmatprep.mubr.bf16.mxu0 %v6362_v45  ;;  %2075 = vmatpush1.bf16.msra.mxu0 %v5666_v41  ;;  %v824_v2 = vmax.f32 %v729_v61, 0.0  ;;  %v5672_v13 = vld [vmem:[#allocation2 + $0x8] ss:$12 sps:$4 sm:$0xff]   ;;  %v5677_v41 = vld [vmem:[#allocation2 + $0x110] ss:$12 sps:$4 sm:$0xff]  }
 0x1f6   :  { %v829_v4 = vmax.f32 %v731_v57, 0.0  ;;  %4755 = vmatprep.subr.msk.bf16.mxu0 %vm1814_vm7, %v4753_v44  ;;  %v5680_v44 = vld [vmem:[#allocation2 + $0x68] ss:$12 sps:$4 sm:$0xff]   ;;  %v5682_v61 = vld [vmem:[#allocation2 + $0x80] ss:$12 sps:$4 sm:$0xff]  }
 0x1f7   :  { %v830_v5 = vmax.f32 %v733_v29, 0.0  ;;  %v5684_v57 = vld [vmem:[#allocation2 + $0x98] ss:$12 sps:$4 sm:$0xff]   ;;  %v5685_v35 = vld [vmem:[#allocation2 + $0x170] ss:$12 sps:$4 sm:$0xff]  }
 0x1f8   :  { %v6424_v60 = vpack.c.bf16 %v829_v4, %v823_v27  ;;  %v5686_v29 = vld [vmem:[#allocation2 + $0xb0] ss:$12 sps:$4 sm:$0xff]   ;;  %v5687_v27 = vld [vmem:[#allocation2 + $0x248] ss:$12 sps:$4 sm:$0xff]  }
 0x1f9   :  { %v6426_v47 = vpack.c.bf16 %v830_v5, %v824_v2  ;;  %2077 = vmatpush1.bf16.msra.mxu0 %v1816_v32  ;;  %v5688_v4 = vld [vmem:[#allocation2 + $0x188] ss:$12 sps:$4 sm:$0xff]   ;;  %v5689_v32 = vld [vmem:[#allocation2 + $0x260] ss:$12 sps:$4 sm:$0xff]   ;;  %v5691_v2 = vld [vmem:[#allocation2 + $0x278] ss:$12 sps:$4 sm:$0xff]  }
 0x1fa   :  { %4864 = vmatprep.subr.bf16.mxu0 %v5671_v8  ;;  %v5690_v8 = vld [vmem:[#allocation2 + $0x1a0] ss:$12 sps:$4 sm:$0xff]   ;;  %v5692_v5 = vld [vmem:[#allocation2 + $0x1b8] ss:$12 sps:$4 sm:$0xff]  }
 0x1fc   :  { %2040 = vmatmul.mubr.bf16.gmra.mrb[92].mxu0 %v6358_v55 }
 0x1fd   :  { %4756 = vmatprep.mubr.msk.bf16.mxu0 %vm1789_vm8, %v6346_v53 }
 0x204   :  { %2083 = vmatmul.mubr.bf16.vlgmr.msra.gmra.mrb[64].mxu0 %v6342_v43 }
 0x205   :  { %4757 = vmatprep.mubr.msk.bf16.mxu0 %vm1789_vm8, %v6364_v62  ;;  %4865 = vmatpush3.bf16.msra.mxu0 %v5672_v13  ;;  %v5693_v13 = vld [vmem:[#allocation2 + $0x290] ss:$12 sps:$4 sm:$0xff]  }
 0x206   :  { %4866 = vmatprep.subr.bf16.mxu0 %v5673_v39  ;;  %v5695_v39 = vld [vmem:[#allocation2 + $0x2a8] ss:$12 sps:$4 sm:$0xff]  }
 0x209   :  { %4867 = vmatpush3.bf16.msra.mxu0 %v5674_v46  ;;  %v5698_v46 = vld [vmem:[#allocation2 + $0x200] ss:$12 sps:$4 sm:$0xff]  }
 0x20a   :  { %4868 = vmatprep.subr.bf16.mxu0 %v5675_v56  ;;  %v5699_v56 = vld [vmem:[#allocation2 + $0x2d8] ss:$12 sps:$4 sm:$0xff]  }
 0x20c   :  { %2093 = vmatmul.mubr.bf16.gmra.mrb[68].mxu0 %v6360_v49 }
 0x20d   :  { %4758 = vmatprep.mubr.msk.bf16.mxu0 %vm1789_vm8, %v6374_v19  ;;  %4869 = vmatpush3.bf16.msra.mxu0 %v5676_v20  ;;  %v5702_v20 = vld [vmem:[#allocation2 + $0x230] ss:$12 sps:$4 sm:$0xff]  }
 0x20e   :  { %4870 = vmatprep.subr.bf16.mxu0 %v5677_v41  ;;  %v7548_v41 = vmov 0  }
 0x211   :  { %4871 = vmatpush3.bf16.msra.mxu0 %v5678_v7  ;;  %v5703_v7 = vld [vmem:[#allocation2 + $0x308] ss:$12 sps:$4 sm:$0xff]  }
 0x212   :  { %4872 = vmatprep.subr.bf16.mxu0 %v5679_v40  ;;  %v7553_v40 = vld [vmem:[#allocation8_spill] sm:$0xff] }
 0x214   :  { %2103 = vmatmul.mubr.bf16.gmra.mrb[72].mxu0 %v6372_v0 }
 0x215   :  { %4759 = vmatprep.mubr.msk.bf16.mxu0 %vm1789_vm8, %v6384_v54  ;;  %4873 = vmatpush3.bf16.msra.mxu0 %v5680_v44 }
 0x216   :  { %4874 = vmatprep.subr.bf16.mxu0 %v5681_v42 }
 0x219   :  { %4875 = vmatpush3.bf16.msra.mxu0 %v5682_v61 }
 0x21a   :  { %4876 = vmatprep.subr.bf16.mxu0 %v5683_v15 }
 0x21c   :  { %2113 = vmatmul.mubr.bf16.gmra.mrb[76].mxu0 %v6382_v52 }
 0x21d   :  { %4760 = vmatprep.mubr.msk.bf16.mxu0 %vm1789_vm8, %v6394_v1  ;;  %4877 = vmatpush3.bf16.msra.mxu0 %v5684_v57 }
 0x21e   :  { %4878 = vmatprep.subr.bf16.mxu0 %v5685_v35 }
 0x221   :  { %4879 = vmatpush3.bf16.msra.mxu0 %v5686_v29 }
 0x222   :  { %4928 = vmatprep.subr.bf16.mxu0 %v5687_v27 }
 0x224   :  { %2123 = vmatmul.mubr.bf16.gmra.mrb[80].mxu0 %v6392_v26 }
 0x225   :  { %4761 = vmatprep.mubr.msk.bf16.mxu0 %vm1789_vm8, %v6404_v14 }
 0x22c   :  { %2133 = vmatmul.mubr.bf16.gmra.mrb[84].mxu0 %v6402_v25 }
 0x22d   :  { %4762 = vmatprep.mubr.msk.bf16.mxu0 %vm1789_vm8, %v6414_v31 }
 0x234   :  { %2143 = vmatmul.mubr.bf16.gmra.mrb[88].mxu0 %v6412_v3 }
 0x235   :  { %4763 = vmatprep.mubr.msk.bf16.mxu0 %vm1789_vm8, %v6426_v47 }
 0x23c   :  { %2153 = vmatmul.mubr.bf16.gmra.mrb[92].mxu0 %v6424_v60 }
 0x23d   :  { %2195 = vmatprep.mubr.bf16.mxu0 %v6183_v59  ;;  %v5694_v59 = vld [vmem:[#allocation2 + $0x1d0] ss:$12 sps:$4 sm:$0xff]  }
 0x244   :  { %2196 = vmatmul.mubr.bf16.vlgmr.msra.gmra.mrb[96].mxu0 %v6179_v58  ;;  %v5696_v58 = vld [vmem:[#allocation2 + $0x1e8] ss:$12 sps:$4 sm:$0xff]  }
 0x245   :  { %2203 = vmatprep.mubr.bf16.mxu0 %v6199_v16  ;;  %4929 = vmatpush3.bf16.msra.mxu0 %v5688_v4  ;;  %v5697_v16 = vld [vmem:[#allocation2 + $0x2c0] ss:$12 sps:$4 sm:$0xff]  }
 0x246   :  { %4930 = vmatprep.subr.bf16.mxu0 %v5689_v32 }
 0x249   :  { %4931 = vmatpush3.bf16.msra.mxu0 %v5690_v8 }
 0x24a   :  { %4932 = vmatprep.subr.bf16.mxu0 %v5691_v2 }
 0x24c   :  { %2204 = vmatmul.mubr.bf16.gmra.mrb[100].mxu0 %v6197_v21  ;;  %v5700_v21 = vld [vmem:[#allocation2 + $0x218] ss:$12 sps:$4 sm:$0xff]  }
 0x24d   :  { %2211 = vmatprep.mubr.bf16.mxu0 %v6219_v51  ;;  %4933 = vmatpush3.bf16.msra.mxu0 %v5692_v5  ;;  %v5701_v51 = vld [vmem:[#allocation2 + $0x2f0] ss:$12 sps:$4 sm:$0xff]  }
 0x24e   :  { %4934 = vmatprep.subr.bf16.mxu0 %v5693_v13 }
 0x251   :  { %4935 = vmatpush3.bf16.msra.mxu0 %v5694_v59 }
 0x252   :  { %4936 = vmatprep.subr.bf16.mxu0 %v5695_v39 }
 0x254   :  { %2212 = vmatmul.mubr.bf16.gmra.mrb[104].mxu0 %v6215_v48  ;;  %v7549_v48 = vld [vmem:[#allocation10_spill] sm:$0xff] }
 0x255   :  { %2219 = vmatprep.mubr.bf16.mxu0 %v6241_v37  ;;  %4937 = vmatpush3.bf16.msra.mxu0 %v5696_v58  ;;  %v7550_v37 = vld [vmem:[#allocation12_spill] sm:$0xff] }
 0x256   :  { %4938 = vmatprep.subr.bf16.mxu0 %v5697_v16 }
 0x259   :  { %4939 = vmatpush3.bf16.msra.mxu0 %v5698_v46 }
 0x25a   :  { %4940 = vmatprep.subr.bf16.mxu0 %v5699_v56 }
 0x25c   :  { %2220 = vmatmul.mubr.bf16.gmra.mrb[108].mxu0 %v6237_v34  ;;  %v7551_v34 = vld [vmem:[#allocation11_spill] sm:$0xff] }
 0x25d   :  { %2227 = vmatprep.mubr.bf16.mxu0 %v6263_v22  ;;  %4941 = vmatpush3.bf16.msra.mxu0 %v5700_v21  ;;  %v7552_v22 = vld [vmem:[#allocation9_spill] sm:$0xff] }
 0x25e   :  { %4942 = vmatprep.subr.bf16.mxu0 %v5701_v51 }
 0x261   :  { %4943 = vmatpush3.bf16.msra.mxu0 %v5702_v20 }
 0x262   :  { %2357 = vmatprep.subr.bf16.mxu0 %v7548_v41 }
 0x264   :  { %2228 = vmatmul.mubr.bf16.gmra.mrb[112].mxu0 %v6259_v17  ;;  %v5704_v17 = vld [vmem:[#allocation2 + $0x320] ss:$12 sps:$4 sm:$0xff]  }
 0x265   :  { %2235 = vmatprep.mubr.bf16.mxu0 %v6285_v10  ;;  %v5706_v10 = vld [vmem:[#allocation2 + $0x350] ss:$12 sps:$4 sm:$0xff]  }
 0x26c   :  { %2236 = vmatmul.mubr.bf16.gmra.mrb[116].mxu0 %v6281_v9  ;;  %v5705_v9 = vld [vmem:[#allocation2 + $0x338] ss:$12 sps:$4 sm:$0xff]  }
 0x26d   :  { %2243 = vmatprep.mubr.bf16.mxu0 %v6307_v28  ;;  %v5707_v28 = vld [vmem:[#allocation2 + $0x368] ss:$12 sps:$4 sm:$0xff]  }
 0x274   :  { %2244 = vmatmul.mubr.bf16.gmra.mrb[120].mxu0 %v7549_v48 }
 0x275   :  { %2251 = vmatprep.mubr.bf16.mxu0 %v7550_v37 }
 0x27c   :  { %2252 = vmatmul.mubr.bf16.gmra.mrb[124].mxu0 %v7551_v34 }
 0x27d   :  { %2292 = vmatprep.mubr.bf16.mxu0 %v7552_v22 }
 0x284   :  { %2293 = vmatmul.mubr.bf16.vlgmr.msra.gmra.mrb[128].mxu0 %v7553_v40 }
 0x285   :  { %2300 = vmatprep.mubr.bf16.mxu0 %v6243_v38  ;;  %2358 = vmatpush1.bf16.msra.mxu0 %v5703_v7  ;;  %v5708_v38 = vld [vmem:[#allocation2 + $0x380] ss:$12 sps:$4 sm:$0xff]  }
 0x286   :  { %2359 = vmatprep.subr.bf16.mxu0 %v7548_v41 }
 0x289   :  { %2360 = vmatpush1.bf16.msra.mxu0 %v5704_v17 }
 0x28a   :  { %2361 = vmatprep.subr.bf16.mxu0 %v7548_v41 }
 0x28c   :  { %2301 = vmatmul.mubr.bf16.gmra.mrb[132].mxu0 %v6239_v36  ;;  %v5709_v36 = vld [vmem:[#allocation2 + $0x398] ss:$12 sps:$4 sm:$0xff]  }
 0x28d   :  { %2308 = vmatprep.mubr.bf16.mxu0 %v6265_v23  ;;  %2362 = vmatpush1.bf16.msra.mxu0 %v5705_v9  ;;  %v5710_v23 = vld [vmem:[#allocation2 + $0x3b0] ss:$12 sps:$4 sm:$0xff]  }
 0x28e   :  { %2363 = vmatprep.subr.bf16.mxu0 %v7548_v41 }
 0x291   :  { %2364 = vmatpush1.bf16.msra.mxu0 %v5706_v10 }
 0x292   :  { %2365 = vmatprep.subr.bf16.mxu0 %v7548_v41 }
 0x294   :  { %2309 = vmatmul.mubr.bf16.gmra.mrb[136].mxu0 %v6261_v18  ;;  %v5711_v18 = vld [vmem:[#allocation2 + $0x3c8] ss:$12 sps:$4 sm:$0xff]  }
 0x295   :  { %2316 = vmatprep.mubr.bf16.mxu0 %v6287_v12  ;;  %2366 = vmatpush1.bf16.msra.mxu0 %v5707_v28  ;;  %v5712_v12 = vld [vmem:[#allocation2 + $0x3e0] ss:$12 sps:$4 sm:$0xff]  }
 0x296   :  { %2367 = vmatprep.subr.bf16.mxu0 %v7548_v41 }
 0x299   :  { %2368 = vmatpush1.bf16.msra.mxu0 %v5708_v38 }
 0x29a   :  { %2369 = vmatprep.subr.bf16.mxu0 %v7548_v41 }
 0x29c   :  { %2317 = vmatmul.mubr.bf16.gmra.mrb[140].mxu0 %v6283_v11  ;;  %v5713_v11 = vld [vmem:[#allocation2 + $0x3f8] ss:$12 sps:$4 sm:$0xff]  }
 0x29d   :  { %2324 = vmatprep.mubr.bf16.mxu0 %v6309_v30  ;;  %2370 = vmatpush1.bf16.msra.mxu0 %v5709_v36  ;;  %v5714_v30 = vld [vmem:[#allocation2 + $0x410] ss:$12 sps:$4 sm:$0xff]  }
 0x29e   :  { %2371 = vmatprep.subr.bf16.mxu0 %v7548_v41 }
 0x2a1   :  { %2372 = vmatpush1.bf16.msra.mxu0 %v5710_v23 }
 0x2a2   :  { %2373 = vmatprep.subr.bf16.mxu0 %v7548_v41 }
 0x2a4   :  { %2325 = vmatmul.mubr.bf16.gmra.mrb[144].mxu0 %v6305_v33  ;;  %v5715_v33 = vld [vmem:[#allocation2 + $0x428] ss:$12 sps:$4 sm:$0xff]  }
 0x2a5   :  { %2332 = vmatprep.mubr.bf16.mxu0 %v6327_v50  ;;  %2374 = vmatpush1.bf16.msra.mxu0 %v5711_v18  ;;  %v5716_v50 = vld [vmem:[#allocation2 + $0x440] ss:$0 sps:$4 sm:$0x33]  }
 0x2a6   :  { %2375 = vmatprep.subr.bf16.mxu0 %v7548_v41 }
 0x2a9   :  { %2376 = vmatpush1.bf16.msra.mxu0 %v5712_v12 }
 0x2aa   :  { %2377 = vmatprep.subr.bf16.mxu0 %v7548_v41 }
 0x2ac   :  { %2333 = vmatmul.mubr.bf16.gmra.mrb[148].mxu0 %v6323_v6  ;;  %v1822_v6 = vsel %vm1814_vm7, %v5716_v50, 0 }
 0x2ad   :  { %2340 = vmatprep.mubr.bf16.mxu0 %v6344_v63  ;;  %2378 = vmatpush1.bf16.msra.mxu0 %v5713_v11 }
 0x2ae   :  { %2379 = vmatprep.subr.bf16.mxu0 %v7548_v41 }
 0x2b1   :  { %2380 = vmatpush1.bf16.msra.mxu0 %v5714_v30 }
 0x2b2   :  { %2381 = vmatprep.subr.bf16.mxu0 %v7548_v41 }
 0x2b4   :  { %2341 = vmatmul.mubr.bf16.gmra.mrb[152].mxu0 %v6340_v24 }
 0x2b5   :  { %2348 = vmatprep.mubr.bf16.mxu0 %v6362_v45  ;;  %2382 = vmatpush1.bf16.msra.mxu0 %v5715_v33 }
 0x2b6   :  { %2383 = vmatprep.subr.bf16.mxu0 %v7548_v41 }
 0x2b9   :  { %2384 = vmatpush1.bf16.msra.mxu0 %v1822_v6 }
 0x2bc   :  { %2349 = vmatmul.mubr.bf16.gmra.mrb[156].mxu0 %v6358_v55 }
 0x2bd   :  { %4764 = vmatprep.mubr.msk.bf16.mxu0 %vm1789_vm8, %v6346_v53 }
 0x2c4   :  { %2390 = vmatmul.mubr.bf16.vlgmr.msra.gmra.mrb[160].mxu0 %v6342_v43 }
 0x2c5   :  { %4765 = vmatprep.mubr.msk.bf16.mxu0 %vm1789_vm8, %v6364_v62 }
 0x2cc   :  { %2398 = vmatmul.mubr.bf16.gmra.mrb[164].mxu0 %v6360_v49 }
 0x2cd   :  { %4766 = vmatprep.mubr.msk.bf16.mxu0 %vm1789_vm8, %v6374_v19 }
 0x2d4   :  { %2406 = vmatmul.mubr.bf16.gmra.mrb[168].mxu0 %v6372_v0 }
 0x2d5   :  { %4767 = vmatprep.mubr.msk.bf16.mxu0 %vm1789_vm8, %v6384_v54 }
 0x2d7   :  { %v2084_v24 = vpop.f32.mrb[64].mxu0 }
 0x2d8   :  { %v2086_v55 = vpop.f32.mrb[65].mxu0 }
 0x2d9   :  { %v2088_v63 = vpop.f32.mrb[66].mxu0 }
 0x2da   :  { %v6511_v45 = vpack.c.bf16 %v2088_v63, %v2084_v24  ;;  %v2090_v53 = vpop.f32.mrb[67].mxu0 }
 0x2db   :  { %v6513_v43 = vpack.c.bf16 %v2090_v53, %v2086_v55 }
 0x2dc   :  { %2414 = vmatmul.mubr.bf16.gmra.mrb[172].mxu0 %v6382_v52  ;;  %2543 = vrot.lane.b32.xlu1 %v6511_v45, %s5797_s17 }
 0x2dd   :  { %4768 = vmatprep.mubr.msk.bf16.mxu0 %vm1789_vm8, %v6394_v1 }
 0x2df   :  { %v2094_v49 = vpop.f32.mrb[68].mxu0 }
 0x2e0   :  { %2545 = vrot.lane.b32.xlu1 %v6513_v43, %s5797_s17  ;;  %v2096_v62 = vpop.f32.mrb[69].mxu0 }
 0x2e1   :  { %v2098_v0 = vpop.f32.mrb[70].mxu0 }
 0x2e2   :  { %v6522_v19 = vpack.c.bf16 %v2098_v0, %v2094_v49  ;;  %v2100_v54 = vpop.f32.mrb[71].mxu0 }
 0x2e3   :  { %v6524_v44 = vpack.c.bf16 %v2100_v54, %v2096_v62 }
 0x2e4   :  { %2422 = vmatmul.mubr.bf16.gmra.mrb[176].mxu0 %v6392_v26  ;;  %2549 = vrot.lane.b32.xlu0 %v6522_v19, %s5797_s17 }
 0x2e5   :  { %4769 = vmatprep.mubr.msk.bf16.mxu0 %vm1789_vm8, %v6404_v14 }
 0x2e7   :  { %v2104_v52 = vpop.f32.mrb[72].mxu0 }
 0x2e8   :  { %2551 = vrot.lane.b32.xlu0 %v6524_v44, %s5797_s17  ;;  %v2106_v1 = vpop.f32.mrb[73].mxu0 }
 0x2e9   :  { %v2108_v42 = vpop.f32.mrb[74].mxu0 }
 0x2ea   :  { %v6533_v61 = vpack.c.bf16 %v2108_v42, %v2104_v52  ;;  %v2110_v15 = vpop.f32.mrb[75].mxu0 }
 0x2eb   :  { %v6535_v57 = vpack.c.bf16 %v2110_v15, %v2106_v1 }
 0x2ec   :  { %2430 = vmatmul.mubr.bf16.gmra.mrb[180].mxu0 %v6402_v25  ;;  %2555 = vrot.lane.b32.xlu1 %v6533_v61, %s5797_s17 }
 0x2ed   :  { %4770 = vmatprep.mubr.msk.bf16.mxu0 %vm1789_vm8, %v6414_v31 }
 0x2ef   :  { %v2114_v26 = vpop.f32.mrb[76].mxu0 }
 0x2f0   :  { %2557 = vrot.lane.b32.xlu1 %v6535_v57, %s5797_s17  ;;  %v2116_v14 = vpop.f32.mrb[77].mxu0 }
 0x2f1   :  { %v2118_v35 = vpop.f32.mrb[78].mxu0 }
 0x2f2   :  { %v6544_v29 = vpack.c.bf16 %v2118_v35, %v2114_v26  ;;  %v2120_v27 = vpop.f32.mrb[79].mxu0 }
 0x2f3   :  { %v6546_v4 = vpack.c.bf16 %v2120_v27, %v2116_v14 }
 0x2f4   :  { %2438 = vmatmul.mubr.bf16.gmra.mrb[184].mxu0 %v6412_v3 }
 0x2f5   :  { %4771 = vmatprep.mubr.msk.bf16.mxu0 %vm1789_vm8, %v6426_v47  ;;  %2563 = vrot.lane.b32.xlu0 %v6546_v4, %s5797_s17 }
 0x2f7   :  { %v2124_v25 = vpop.f32.mrb[80].mxu0 }
 0x2f8   :  { %v2126_v31 = vpop.f32.mrb[81].mxu0 }
 0x2f9   :  { %v2128_v32 = vpop.f32.mrb[82].mxu0 }
 0x2fa   :  { %v6553_v8 = vpack.c.bf16 %v2128_v32, %v2124_v25  ;;  %v2130_v2 = vpop.f32.mrb[83].mxu0 }
 0x2fb   :  { %v6555_v5 = vpack.c.bf16 %v2130_v2, %v2126_v31 }
 0x2fc   :  { %2446 = vmatmul.mubr.bf16.gmra.mrb[188].mxu0 %v6424_v60 }
 0x2fd   :  { %2569 = vrot.lane.b32.xlu1 %v6555_v5, %s5797_s17 }
 0x2ff   :  { %v2134_v3 = vpop.f32.mrb[84].mxu0 }
 0x300   :  { %v2136_v13 = vpop.f32.mrb[85].mxu0 }
 0x301   :  { %v2138_v59 = vpop.f32.mrb[86].mxu0 }
 0x302   :  { %v6560_v47 = vpack.c.bf16 %v2138_v59, %v2134_v3  ;;  %v2140_v39 = vpop.f32.mrb[87].mxu0 }
 0x303   :  { %v6562_v58 = vpack.c.bf16 %v2140_v39, %v2136_v13 }
 0x307   :  { %v2144_v16 = vpop.f32.mrb[88].mxu0 }
 0x308   :  { %v2146_v46 = vpop.f32.mrb[89].mxu0 }
 0x309   :  { %v2148_v56 = vpop.f32.mrb[90].mxu0 }
 0x30a   :  { %v6564_v21 = vpack.c.bf16 %v2148_v56, %v2144_v16  ;;  %v2150_v51 = vpop.f32.mrb[91].mxu0 }
 0x30b   :  { %v6566_v20 = vpack.c.bf16 %v2150_v51, %v2146_v46 }
 0x30f   :  { %v2154_v60 = vpop.f32.mrb[92].mxu0 }
 0x310   :  { %v2156_v48 = vpop.f32.mrb[93].mxu0 }
 0x311   :  { %v2158_v37 = vpop.f32.mrb[94].mxu0 }
 0x312   :  { %v6568_v34 = vpack.c.bf16 %v2158_v37, %v2154_v60  ;;  %v2160_v22 = vpop.f32.mrb[95].mxu0 }
 0x313   :  { %v6570_v7 = vpack.c.bf16 %v2160_v22, %v2156_v48 }
 0x317   :  { %v4880_v40 = vpop.f32.mrb[96].mxu0 }
 0x318   :  { %v4881_v17 = vpop.f32.mrb[97].mxu0 }
 0x319   :  { %v4882_v9 = vadd.f32 %v4881_v17, %v4880_v40  ;;  %v4883_v10 = vpop.f32.mrb[98].mxu0 }
 0x31a   :  { %v4884_v28 = vpop.f32.mrb[99].mxu0 }
 0x31b   :  { %v4885_v38 = vadd.f32 %v4884_v28, %v4883_v10 }
 0x31f   :  { %v4886_v36 = vpop.f32.mrb[100].mxu0 }
 0x320   :  { %v4887_v23 = vpop.f32.mrb[101].mxu0 }
 0x321   :  { %v4888_v18 = vadd.f32 %v4887_v23, %v4886_v36  ;;  %v4889_v12 = vpop.f32.mrb[102].mxu0 }
 0x322   :  { %v4890_v11 = vpop.f32.mrb[103].mxu0 }
 0x323   :  { %v4891_v30 = vadd.f32 %v4890_v11, %v4889_v12 }
 0x327   :  { %v4892_v33 = vpop.f32.mrb[104].mxu0 }
 0x328   :  { %v4893_v50 = vpop.f32.mrb[105].mxu0 }
 0x329   :  { %v4894_v6 = vadd.f32 %v4893_v50, %v4892_v33  ;;  %v4895_v24 = vpop.f32.mrb[106].mxu0 }
 0x32a   :  { %v4896_v55 = vpop.f32.mrb[107].mxu0 }
 0x32b   :  { %v4897_v63 = vadd.f32 %v4896_v55, %v4895_v24 }
 0x32f   :  { %v4898_v53 = vpop.f32.mrb[108].mxu0 }
 0x330   :  { %v4899_v49 = vpop.f32.mrb[109].mxu0 }
 0x331   :  { %v4900_v62 = vadd.f32 %v4899_v49, %v4898_v53  ;;  %v4901_v0 = vpop.f32.mrb[110].mxu0 }
 0x332   :  { %v4902_v54 = vpop.f32.mrb[111].mxu0 }
 0x333   :  { %v4903_v52 = vadd.f32 %v4902_v54, %v4901_v0 }
 0x337   :  { %v4904_v1 = vpop.f32.mrb[112].mxu0 }
 0x338   :  { %v4905_v42 = vpop.f32.mrb[113].mxu0 }
 0x339   :  { %v4906_v15 = vadd.f32 %v4905_v42, %v4904_v1  ;;  %v4907_v26 = vpop.f32.mrb[114].mxu0 }
 0x33a   :  { %v4908_v14 = vpop.f32.mrb[115].mxu0 }
 0x33b   :  { %v4909_v35 = vadd.f32 %v4908_v14, %v4907_v26 }
 0x33f   :  { %v4910_v27 = vpop.f32.mrb[116].mxu0 }
 0x340   :  { %v4911_v25 = vpop.f32.mrb[117].mxu0 }
 0x341   :  { %v4912_v31 = vadd.f32 %v4911_v25, %v4910_v27  ;;  %v4913_v32 = vpop.f32.mrb[118].mxu0 }
 0x342   :  { %v4914_v2 = vpop.f32.mrb[119].mxu0 }
 0x343   :  { %v4915_v3 = vadd.f32 %v4914_v2, %v4913_v32 }
 0x347   :  { %v4916_v13 = vpop.f32.mrb[120].mxu0 }
 0x348   :  { %v4917_v59 = vpop.f32.mrb[121].mxu0 }
 0x349   :  { %v6572_v39 = vadd.f32 %v4917_v59, %v4916_v13  ;;  %v4919_v16 = vpop.f32.mrb[122].mxu0 }
 0x34a   :  { %v4920_v46 = vpop.f32.mrb[123].mxu0 }
 0x34b   :  { %v4921_v56 = vadd.f32 %v4920_v46, %v4919_v16 }
 0x34f   :  { %v4922_v51 = vpop.f32.mrb[124].mxu0 }
 0x350   :  { %v4923_v60 = vpop.f32.mrb[125].mxu0 }
 0x351   :  { %v6574_v48 = vadd.f32 %v4923_v60, %v4922_v51  ;;  %v4925_v37 = vpop.f32.mrb[126].mxu0 }
 0x352   :  { %v4926_v22 = vpop.f32.mrb[127].mxu0 }
 0x353   :  { %v6576_v40 = vadd.f32 %v4926_v22, %v4925_v37 }
 0x357   :  { %v4944_v17 = vpop.f32.mrb[128].mxu0 }
 0x358   :  { %v4945_v10 = vpop.f32.mrb[129].mxu0 }
 0x359   :  { %v4946_v28 = vadd.f32 %v4945_v10, %v4944_v17  ;;  %v4947_v36 = vpop.f32.mrb[130].mxu0 }
 0x35a   :  { %v4948_v23 = vpop.f32.mrb[131].mxu0 }
 0x35b   :  { %v4949_v12 = vadd.f32 %v4948_v23, %v4947_v36  ;;  %v2295_v11 = vadd.f32 %v4946_v28, %v4882_v9 }
 0x35d   :  { %v2298_v33 = vadd.f32 %v4949_v12, %v4885_v38 }
 0x35f   :  { %v4950_v50 = vpop.f32.mrb[132].mxu0 }
 0x360   :  { %v4951_v24 = vpop.f32.mrb[133].mxu0 }
 0x361   :  { %v4952_v55 = vadd.f32 %v4951_v24, %v4950_v50  ;;  %v4953_v53 = vpop.f32.mrb[134].mxu0 }
 0x362   :  { %v4954_v49 = vpop.f32.mrb[135].mxu0 }
 0x363   :  { %v4955_v0 = vadd.f32 %v4954_v49, %v4953_v53  ;;  %v2303_v54 = vadd.f32 %v4952_v55, %v4888_v18 }
 0x365   :  { %v2306_v1 = vadd.f32 %v4955_v0, %v4891_v30 }
 0x367   :  { %v4956_v42 = vpop.f32.mrb[136].mxu0 }
 0x368   :  { %v4957_v26 = vpop.f32.mrb[137].mxu0 }
 0x369   :  { %v4958_v14 = vadd.f32 %v4957_v26, %v4956_v42  ;;  %v4959_v27 = vpop.f32.mrb[138].mxu0 }
 0x36a   :  { %v4960_v25 = vpop.f32.mrb[139].mxu0 }
 0x36b   :  { %v4961_v32 = vadd.f32 %v4960_v25, %v4959_v27  ;;  %v2311_v2 = vadd.f32 %v4958_v14, %v4894_v6 }
 0x36d   :  { %v2314_v13 = vadd.f32 %v4961_v32, %v4897_v63 }
 0x36f   :  { %v4962_v59 = vpop.f32.mrb[140].mxu0 }
 0x370   :  { %v4963_v16 = vpop.f32.mrb[141].mxu0 }
 0x371   :  { %v4964_v9 = vadd.f32 %v4963_v16, %v4962_v59  ;;  %v4965_v38 = vpop.f32.mrb[142].mxu0 }
 0x372   :  { %v4966_v46 = vpop.f32.mrb[143].mxu0 }
 0x373   :  { %v4967_v51 = vadd.f32 %v4966_v46, %v4965_v38  ;;  %v2319_v60 = vadd.f32 %v4964_v9, %v4900_v62 }
 0x375   :  { %v6578_v37 = vadd.f32 %v4967_v51, %v4903_v52 }
 0x377   :  { %v4968_v22 = vpop.f32.mrb[144].mxu0 }
 0x378   :  { %v4969_v18 = vpop.f32.mrb[145].mxu0 }
 0x379   :  { %v4970_v30 = vadd.f32 %v4969_v18, %v4968_v22  ;;  %v4971_v17 = vpop.f32.mrb[146].mxu0 }
 0x37a   :  { %v4972_v10 = vpop.f32.mrb[147].mxu0 }
 0x37b   :  { %v4973_v28 = vadd.f32 %v4972_v10, %v4971_v17  ;;  %v2327_v36 = vadd.f32 %v4970_v30, %v4906_v15 }
 0x37d   :  { %v6580_v23 = vadd.f32 %v4973_v28, %v4909_v35 }
 0x37f   :  { %v4974_v6 = vpop.f32.mrb[148].mxu0 }
 0x380   :  { %v4975_v63 = vpop.f32.mrb[149].mxu0 }
 0x381   :  { %v4976_v12 = vadd.f32 %v4975_v63, %v4974_v6  ;;  %v4977_v50 = vpop.f32.mrb[150].mxu0 }
 0x382   :  { %v4978_v24 = vpop.f32.mrb[151].mxu0 }
 0x383   :  { %v4979_v55 = vadd.f32 %v4978_v24, %v4977_v50  ;;  %v6582_v53 = vadd.f32 %v4976_v12, %v4912_v31 }
 0x385   :  { %v6584_v62 = vadd.f32 %v4979_v55, %v4915_v3 }
 0x387   :  { %v4980_v52 = vpop.f32.mrb[152].mxu0 }
 0x388   :  { %v4981_v49 = vpop.f32.mrb[153].mxu0 }
 0x389   :  { %v4982_v0 = vadd.f32 %v4981_v49, %v4980_v52  ;;  %v4983_v42 = vpop.f32.mrb[154].mxu0 }
 0x38a   :  { %v4984_v26 = vpop.f32.mrb[155].mxu0 }
 0x38b   :  { %v4985_v14 = vadd.f32 %v4984_v26, %v4983_v42  ;;  %v6587_v15 = vadd.f32 %v4982_v0, %v6572_v39 }
 0x38d   :  { %v6589_v35 = vadd.f32 %v4985_v14, %v4921_v56 }
 0x38f   :  { %v4986_v27 = vpop.f32.mrb[156].mxu0 }
 0x390   :  { %v4987_v25 = vpop.f32.mrb[157].mxu0 }
 0x391   :  { %v4988_v32 = vadd.f32 %v4987_v25, %v4986_v27  ;;  %v4989_v59 = vpop.f32.mrb[158].mxu0 }
 0x392   :  { %v4990_v16 = vpop.f32.mrb[159].mxu0 }
 0x393   :  { %v4991_v31 = vadd.f32 %v4990_v16, %v4989_v59  ;;  %v6592_v3 = vadd.f32 %v4988_v32, %v6574_v48 }
 0x395   :  { %v6595_v9 = vadd.f32 %v4991_v31, %v6576_v40 }
 0x397   :  { %v2391_v38 = vpop.f32.mrb[160].mxu0 }
 0x398   :  { %v2392_v46 = vadd.f32 %v2391_v38, %v2295_v11  ;;  %v2393_v51 = vpop.f32.mrb[161].mxu0 }
 0x399   :  { %v2394_v22 = vpop.f32.mrb[162].mxu0 }
 0x39a   :  { %v2395_v39 = vadd.f32 %v2394_v22, %v2298_v33  ;;  %v2396_v18 = vpop.f32.mrb[163].mxu0 }
 0x39c   :  { %v6597_v56 = vpack.c.bf16 %v2395_v39, %v2392_v46 }
 0x39e   :  { %2547 = vrot.lane.b32.xlu0 %v6597_v56, %s5797_s17 }
 0x39f   :  { %v2399_v30 = vpop.f32.mrb[164].mxu0 }
 0x3a0   :  { %v2400_v17 = vadd.f32 %v2399_v30, %v2303_v54  ;;  %v2401_v10 = vpop.f32.mrb[165].mxu0 }
 0x3a1   :  { %v2402_v28 = vpop.f32.mrb[166].mxu0 }
 0x3a2   :  { %v2403_v48 = vadd.f32 %v2402_v28, %v2306_v1  ;;  %v2404_v6 = vpop.f32.mrb[167].mxu0  ;;  %2561 = vrot.lane.b32.xlu0 %v6544_v29, %s5797_s17 }
 0x3a4   :  { %v6603_v40 = vpack.c.bf16 %v2403_v48, %v2400_v17 }
 0x3a6   :  { %2553 = vrot.lane.b32.xlu1 %v6603_v40, %s5797_s17 }
 0x3a7   :  { %v2407_v11 = vpop.f32.mrb[168].mxu0 }
 0x3a8   :  { %v2408_v33 = vadd.f32 %v2407_v11, %v2311_v2  ;;  %v2409_v63 = vpop.f32.mrb[169].mxu0 }
 0x3a9   :  { %v2410_v12 = vpop.f32.mrb[170].mxu0 }
 0x3aa   :  { %v2411_v50 = vadd.f32 %v2410_v12, %v2314_v13  ;;  %v2412_v24 = vpop.f32.mrb[171].mxu0  ;;  %2567 = vrot.lane.b32.xlu1 %v6553_v8, %s5797_s17 }
 0x3ac   :  { %v6609_v54 = vpack.c.bf16 %v2411_v50, %v2408_v33 }
 0x3ae   :  { %2559 = vrot.lane.b32.xlu0 %v6609_v54, %s5797_s17 }
 0x3af   :  { %v2415_v1 = vpop.f32.mrb[172].mxu0 }
 0x3b0   :  { %v2416_v55 = vadd.f32 %v2415_v1, %v2319_v60  ;;  %v2417_v52 = vpop.f32.mrb[173].mxu0 }
 0x3b1   :  { %v2418_v49 = vpop.f32.mrb[174].mxu0 }
 0x3b2   :  { %v2419_v0 = vadd.f32 %v2418_v49, %v6578_v37  ;;  %v2420_v42 = vpop.f32.mrb[175].mxu0  ;;  %2575 = vrot.lane.b32.xlu0 %v6562_v58, %s5797_s17 }
 0x3b4   :  { %v6616_v2 = vpack.c.bf16 %v2419_v0, %v2416_v55 }
 0x3b6   :  { %2565 = vrot.lane.b32.xlu1 %v6616_v2, %s5797_s17 }
 0x3b7   :  { %v2423_v13 = vpop.f32.mrb[176].mxu0 }
 0x3b8   :  { %v2424_v26 = vadd.f32 %v2423_v13, %v2327_v36  ;;  %v2425_v14 = vpop.f32.mrb[177].mxu0 }
 0x3b9   :  { %v2426_v27 = vpop.f32.mrb[178].mxu0 }
 0x3ba   :  { %v2427_v25 = vadd.f32 %v2426_v27, %v6580_v23  ;;  %v2428_v60 = vpop.f32.mrb[179].mxu0  ;;  %2581 = vrot.lane.b32.xlu1 %v6566_v20, %s5797_s17 }
 0x3bc   :  { %v6623_v37 = vpack.c.bf16 %v2427_v25, %v2424_v26 }
 0x3be   :  { %2571 = vrot.lane.b32.xlu0 %v6623_v37, %s5797_s17 }
 0x3bf   :  { %v2431_v32 = vpop.f32.mrb[180].mxu0 }
 0x3c0   :  { %v2432_v59 = vadd.f32 %v2431_v32, %v6582_v53  ;;  %v2433_v16 = vpop.f32.mrb[181].mxu0 }
 0x3c1   :  { %v2434_v31 = vpop.f32.mrb[182].mxu0 }
 0x3c2   :  { %v2435_v36 = vadd.f32 %v2434_v31, %v6584_v62  ;;  %v2436_v38 = vpop.f32.mrb[183].mxu0  ;;  %2573 = vrot.lane.b32.xlu0 %v6560_v47, %s5797_s17 }
 0x3c4   :  { %v6631_v23 = vpack.c.bf16 %v2435_v36, %v2432_v59 }
 0x3c6   :  { %2577 = vrot.lane.b32.xlu1 %v6631_v23, %s5797_s17 }
 0x3c7   :  { %v2439_v46 = vpop.f32.mrb[184].mxu0 }
 0x3c8   :  { %v2440_v51 = vadd.f32 %v2439_v46, %v6587_v15  ;;  %v2441_v22 = vpop.f32.mrb[185].mxu0 }
 0x3c9   :  { %v2442_v39 = vpop.f32.mrb[186].mxu0 }
 0x3ca   :  { %v2443_v53 = vadd.f32 %v2442_v39, %v6589_v35  ;;  %v2444_v18 = vpop.f32.mrb[187].mxu0  ;;  %2579 = vrot.lane.b32.xlu1 %v6564_v21, %s5797_s17 }
 0x3cc   :  { %v6639_v62 = vpack.c.bf16 %v2443_v53, %v2440_v51 }
 0x3ce   :  { %2583 = vrot.lane.b32.xlu0 %v6639_v62, %s5797_s17 }
 0x3cf   :  { %v2447_v30 = vpop.f32.mrb[188].mxu0 }
 0x3d0   :  { %v2448_v17 = vadd.f32 %v2447_v30, %v6592_v3  ;;  %v2449_v10 = vpop.f32.mrb[189].mxu0  ;;  %v2544_v3 = vpop.permute.xlu1 %2543 }
 0x3d1   :  { %v2450_v28 = vpop.f32.mrb[190].mxu0 }
 0x3d2   :  { %v2451_v15 = vadd.f32 %v2450_v28, %v6595_v9  ;;  %v2452_v48 = vpop.f32.mrb[191].mxu0  ;;  %2587 = vrot.lane.b32.xlu0 %v6570_v7, %s5797_s17  ;;  %v2550_v9 = vpop.permute.xlu0 %2549 }
 0x3d4   :  { %v6647_v35 = vpack.c.bf16 %v2451_v15, %v2448_v17  ;;  %v2546_v6 = vpop.permute.xlu1 %2545 }
 0x3d5   :  { %v2592_v1 = vsel %vm63_vm0, %v2544_v3, %v2546_v6 }
 0x3d6   :  { %2589 = vrot.lane.b32.xlu1 %v6647_v35, %s5797_s17  ;;  %2585 = vrot.lane.b32.xlu0 %v6568_v34, %s5797_s17  ;;  %v2552_v11 = vpop.permute.xlu0 %2551 }
 0x3d7   :  { %v2594_v0 = vsel %vm63_vm0, %v2550_v9, %v2552_v11  ;;  %v5717_v9 = vld [vmem:[%s7533_s4 + $0x20] sm:$0xff]  }
 0x3d8   :  { %v2556_v33 = vpop.permute.xlu1 %2555 }
 0x3da   :  { %2967 = vrot.lane.b32.xlu1 %v6513_v43, %s5796_s3  ;;  %2969 = vrot.lane.b32.xlu0 %v6597_v56, %s5796_s3  ;;  %v2564_v63 = vpop.permute.xlu0 %2563 }
 0x3dc   :  { %v2558_v12 = vpop.permute.xlu1 %2557 }
 0x3dd   :  { %v2596_v14 = vsel %vm63_vm0, %v2556_v33, %v2558_v12 }
 0x3de   :  { %2965 = vrot.lane.b32.xlu1 %v6511_v45, %s5796_s3  ;;  %2973 = vrot.lane.b32.xlu0 %v6524_v44, %s5796_s3 }
 0x3e0   :  { %v2570_v55 = vpop.permute.xlu1 %2569 }
 0x3e2   :  { %2975 = vrot.lane.b32.xlu1 %v6603_v40, %s5796_s3  ;;  %2971 = vrot.lane.b32.xlu0 %v6522_v19, %s5796_s3 }
 0x3e6   :  { %2979 = vrot.lane.b32.xlu1 %v6535_v57, %s5796_s3  ;;  %2981 = vrot.lane.b32.xlu0 %v6609_v54, %s5796_s3 }
 0x3ea   :  { %2977 = vrot.lane.b32.xlu1 %v6533_v61, %s5796_s3  ;;  %2985 = vrot.lane.b32.xlu0 %v6546_v4, %s5796_s3 }
 0x3ee   :  { %2987 = vrot.lane.b32.xlu1 %v6616_v2, %s5796_s3  ;;  %2983 = vrot.lane.b32.xlu0 %v6544_v29, %s5796_s3 }
 0x3f2   :  { %2991 = vrot.lane.b32.xlu1 %v6555_v5, %s5796_s3  ;;  %2993 = vrot.lane.b32.xlu0 %v6623_v37, %s5796_s3 }
 0x3f6   :  { %2989 = vrot.lane.b32.xlu1 %v6553_v8, %s5796_s3  ;;  %2997 = vrot.lane.b32.xlu0 %v6562_v58, %s5796_s3 }
 0x3fa   :  { %2999 = vrot.lane.b32.xlu1 %v6631_v23, %s5796_s3  ;;  %2995 = vrot.lane.b32.xlu0 %v6560_v47, %s5796_s3 }
 0x3fe   :  { %3003 = vrot.lane.b32.xlu1 %v6566_v20, %s5796_s3  ;;  %3005 = vrot.lane.b32.xlu0 %v6639_v62, %s5796_s3 }
 0x402   :  { %3001 = vrot.lane.b32.xlu1 %v6564_v21, %s5796_s3  ;;  %3009 = vrot.lane.b32.xlu0 %v6570_v7, %s5796_s3 }
 0x406   :  { %3011 = vrot.lane.b32.xlu1 %v6647_v35, %s5796_s3  ;;  %3007 = vrot.lane.b32.xlu0 %v6568_v34, %s5796_s3 }
 0x40a   :  { %3251 = vrot.lane.b32.xlu1 %v6513_v43, %s5798_s18  ;;  %3253 = vrot.lane.b32.xlu0 %v6597_v56, %s5798_s18 }
 0x40e   :  { %3249 = vrot.lane.b32.xlu1 %v6511_v45, %s5798_s18  ;;  %3257 = vrot.lane.b32.xlu0 %v6524_v44, %s5798_s18 }
 0x410   :  { %v6709_v50 = vpop.permute.xlu0 %2547 }
 0x411   :  { %v2593_v24 = vsel %vm63_vm0, %v2546_v6, %v6709_v50  ;;  %v5718_v6 = vld [vmem:[%s7533_s4 + $0x28] sm:$0xff]  }
 0x412   :  { %3259 = vrot.lane.b32.xlu1 %v6603_v40, %s5798_s18  ;;  %3255 = vrot.lane.b32.xlu0 %v6522_v19, %s5798_s18 }
 0x413   :  { %2632 = vmatprep.subr.bf16.mxu1 %v2593_v24 }
 0x414   :  { %2633 = vmatpush1.bf16.msra.mxu1 %v2592_v1  ;;  %v2562_v42 = vpop.permute.xlu0 %2561 }
 0x415   :  { %v2598_v32 = vsel %vm63_vm0, %v2562_v42, %v2564_v63 }
 0x416   :  { %3263 = vrot.lane.b32.xlu1 %v6535_v57, %s5798_s18  ;;  %3265 = vrot.lane.b32.xlu0 %v6609_v54, %s5798_s18 }
 0x418   :  { %v6722_v52 = vpop.permute.xlu1 %2553 }
 0x419   :  { %v2595_v49 = vsel %vm63_vm0, %v2552_v11, %v6722_v52  ;;  %v5719_v11 = vld [vmem:[%s7533_s4 + $0x30] sm:$0xff]  }
 0x41a   :  { %3261 = vrot.lane.b32.xlu1 %v6533_v61, %s5798_s18  ;;  %3269 = vrot.lane.b32.xlu0 %v6546_v4, %s5798_s18 }
 0x41b   :  { %2634 = vmatprep.subr.bf16.mxu1 %v2595_v49 }
 0x41c   :  { %2635 = vmatpush1.bf16.msra.mxu1 %v2594_v0  ;;  %v2568_v27 = vpop.permute.xlu1 %2567 }
 0x41d   :  { %v2600_v36 = vsel %vm63_vm0, %v2568_v27, %v2570_v55 }
 0x41e   :  { %3271 = vrot.lane.b32.xlu1 %v6616_v2, %s5798_s18  ;;  %3267 = vrot.lane.b32.xlu0 %v6544_v29, %s5798_s18 }
 0x420   :  { %v6735_v13 = vpop.permute.xlu0 %2559 }
 0x421   :  { %v2597_v26 = vsel %vm63_vm0, %v2558_v12, %v6735_v13 }
 0x422   :  { %3275 = vrot.lane.b32.xlu1 %v6555_v5, %s5798_s18  ;;  %3277 = vrot.lane.b32.xlu0 %v6623_v37, %s5798_s18 }
 0x423   :  { %2636 = vmatprep.subr.bf16.mxu1 %v2597_v26 }
 0x424   :  { %2637 = vmatpush1.bf16.msra.mxu1 %v2596_v14  ;;  %v2576_v59 = vpop.permute.xlu0 %2575 }
 0x426   :  { %3273 = vrot.lane.b32.xlu1 %v6553_v8, %s5798_s18  ;;  %3281 = vrot.lane.b32.xlu0 %v6562_v58, %s5798_s18 }
 0x428   :  { %v6748_v25 = vpop.permute.xlu1 %2565 }
 0x429   :  { %v2599_v60 = vsel %vm63_vm0, %v2564_v63, %v6748_v25  ;;  %v5720_v63 = vld [vmem:[%s7533_s4 + $0x38] sm:$0xff]  }
 0x42a   :  { %3283 = vrot.lane.b32.xlu1 %v6631_v23, %s5798_s18  ;;  %3279 = vrot.lane.b32.xlu0 %v6560_v47, %s5798_s18 }
 0x42b   :  { %2638 = vmatprep.subr.bf16.mxu1 %v2599_v60 }
 0x42c   :  { %2639 = vmatpush1.bf16.msra.mxu1 %v2598_v32  ;;  %v2582_v38 = vpop.permute.xlu1 %2581 }
 0x42e   :  { %3287 = vrot.lane.b32.xlu1 %v6566_v20, %s5798_s18  ;;  %3289 = vrot.lane.b32.xlu0 %v6639_v62, %s5798_s18 }
 0x430   :  { %v6761_v16 = vpop.permute.xlu0 %2571 }
 0x431   :  { %v2601_v31 = vsel %vm63_vm0, %v2570_v55, %v6761_v16 }
 0x432   :  { %3285 = vrot.lane.b32.xlu1 %v6564_v21, %s5798_s18  ;;  %3293 = vrot.lane.b32.xlu0 %v6570_v7, %s5798_s18 }
 0x433   :  { %2640 = vmatprep.subr.bf16.mxu1 %v2601_v31 }
 0x434   :  { %2641 = vmatpush1.bf16.msra.mxu1 %v2600_v36  ;;  %v2574_v46 = vpop.permute.xlu0 %2573 }
 0x435   :  { %v2602_v39 = vsel %vm63_vm0, %v2574_v46, %v2576_v59 }
 0x436   :  { %3295 = vrot.lane.b32.xlu1 %v6647_v35, %s5798_s18  ;;  %3291 = vrot.lane.b32.xlu0 %v6568_v34, %s5798_s18 }
 0x438   :  { %v2578_v51 = vpop.permute.xlu1 %2577 }
 0x439   :  { %v2603_v22 = vsel %vm63_vm0, %v2576_v59, %v2578_v51 }
 0x43a   :  { %3535 = vrot.lane.b32.xlu1 %v6513_v43, %s5800_s20  ;;  %3537 = vrot.lane.b32.xlu0 %v6597_v56, %s5800_s20 }
 0x43b   :  { %2642 = vmatprep.subr.bf16.mxu1 %v2603_v22 }
 0x43c   :  { %2643 = vmatpush1.bf16.msra.mxu1 %v2602_v39  ;;  %v2580_v53 = vpop.permute.xlu1 %2579 }
 0x43d   :  { %v2604_v17 = vsel %vm63_vm0, %v2580_v53, %v2582_v38 }
 0x43e   :  { %3533 = vrot.lane.b32.xlu1 %v6511_v45, %s5800_s20  ;;  %3541 = vrot.lane.b32.xlu0 %v6524_v44, %s5800_s20 }
 0x440   :  { %v2584_v18 = vpop.permute.xlu0 %2583 }
 0x441   :  { %v2605_v30 = vsel %vm63_vm0, %v2582_v38, %v2584_v18  ;;  %v5723_v38 = vld [vmem:[%s7533_s4 + $0x10] sm:$0xff]  }
 0x442   :  { %3543 = vrot.lane.b32.xlu1 %v6603_v40, %s5800_s20  ;;  %3539 = vrot.lane.b32.xlu0 %v6522_v19, %s5800_s20 }
 0x443   :  { %2644 = vmatprep.subr.bf16.mxu1 %v2605_v30 }
 0x444   :  { %2645 = vmatpush1.bf16.msra.mxu1 %v2604_v17  ;;  %v2588_v10 = vpop.permute.xlu0 %2587 }
 0x446   :  { %3547 = vrot.lane.b32.xlu1 %v6535_v57, %s5800_s20  ;;  %3549 = vrot.lane.b32.xlu0 %v6609_v54, %s5800_s20 }
 0x448   :  { %v2590_v28 = vpop.permute.xlu1 %2589  ;;  %v2586_v15 = vpop.permute.xlu0 %2585 }
 0x449   :  { %v2606_v48 = vsel %vm63_vm0, %v2586_v15, %v2588_v10  ;;  %v2607_v3 = vsel %vm63_vm0, %v2588_v10, %v2590_v28 }
 0x44a   :  { %3545 = vrot.lane.b32.xlu1 %v6533_v61, %s5800_s20  ;;  %3553 = vrot.lane.b32.xlu0 %v6546_v4, %s5800_s20 }
 0x44b   :  { %2646 = vmatprep.subr.bf16.mxu1 %v2607_v3  ;;  %v4355_v3 = vld [vmem:[%s7534_s5 + $0x18] sm:$0xff] }
 0x44c   :  { %2647 = vmatpush1.bf16.msra.mxu1 %v2606_v48  ;;  %v6846_v33 = vpop.permute.xlu1 %2967  ;;  %v6851_v12 = vpop.permute.xlu0 %2969  ;;  %v4354_v48 = vld [vmem:[%s7534_s5 + $0x10] sm:$0xff] }
 0x44d   :  { %5076 = vmatprep.subr.bf16.mxu1 %v6709_v50 }
 0x44e   :  { %3555 = vrot.lane.b32.xlu1 %v6616_v2, %s5800_s20  ;;  %3551 = vrot.lane.b32.xlu0 %v6544_v29, %s5800_s20 }
 0x44f   :  { %2665 = vmatmul.mubr.bf16.vlgmr.msra.gmra.mrb[32].mxu1 %v5717_v9 }
 0x450   :  { %5077 = vmatpush3.bf16.msra.mxu1 %v6709_v50  ;;  %2674 = vmatprep.mubr.bf16.mxu1 %v7548_v41  ;;  %v6857_v50 = vpop.permute.xlu1 %2965  ;;  %v6863_v24 = vpop.permute.xlu0 %2973 }
 0x451   :  { %5078 = vmatprep.subr.bf16.mxu1 %v6722_v52 }
 0x452   :  { %3559 = vrot.lane.b32.xlu1 %v6555_v5, %s5800_s20  ;;  %3561 = vrot.lane.b32.xlu0 %v6623_v37, %s5800_s20 }
 0x454   :  { %5079 = vmatpush3.bf16.msra.mxu1 %v6722_v52  ;;  %v6870_v1 = vpop.permute.xlu1 %2975  ;;  %v6874_v55 = vpop.permute.xlu0 %2971 }
 0x455   :  { %5080 = vmatprep.subr.bf16.mxu1 %v6735_v13 }
 0x456   :  { %3557 = vrot.lane.b32.xlu1 %v6553_v8, %s5800_s20  ;;  %3565 = vrot.lane.b32.xlu0 %v6562_v58, %s5800_s20 }
 0x457   :  { %2675 = vmatmul.mubr.bf16.gmra.mrb[36].mxu1 %v5718_v6 }
 0x458   :  { %5081 = vmatpush3.bf16.msra.mxu1 %v6735_v13  ;;  %2684 = vmatprep.mubr.bf16.mxu1 %v7548_v41  ;;  %v6881_v52 = vpop.permute.xlu1 %2979  ;;  %v6888_v49 = vpop.permute.xlu0 %2981 }
 0x459   :  { %5082 = vmatprep.subr.bf16.mxu1 %v6748_v25  ;;  %v3019_v22 = vsel %vm87_vm1, %v6881_v52, %v6888_v49 }
 0x45a   :  { %3567 = vrot.lane.b32.xlu1 %v6631_v23, %s5800_s20  ;;  %3563 = vrot.lane.b32.xlu0 %v6560_v47, %s5800_s20 }
 0x45c   :  { %5083 = vmatpush3.bf16.msra.mxu1 %v6748_v25  ;;  %v6897_v0 = vpop.permute.xlu1 %2977  ;;  %v6901_v42 = vpop.permute.xlu0 %2985  ;;  %v5721_v25 = vld [vmem:[%s7533_s4] sm:$0xff]  }
 0x45d   :  { %5084 = vmatprep.subr.bf16.mxu1 %v6761_v16 }
 0x45e   :  { %3571 = vrot.lane.b32.xlu1 %v6566_v20, %s5800_s20  ;;  %3573 = vrot.lane.b32.xlu0 %v6639_v62, %s5800_s20 }
 0x45f   :  { %2685 = vmatmul.mubr.bf16.gmra.mrb[40].mxu1 %v5719_v11 }
 0x460   :  { %5085 = vmatpush3.bf16.msra.mxu1 %v6761_v16  ;;  %2694 = vmatprep.mubr.bf16.mxu1 %v7548_v41  ;;  %v6908_v13 = vpop.permute.xlu1 %2987  ;;  %v6915_v26 = vpop.permute.xlu0 %2983  ;;  %v5722_v16 = vld [vmem:[%s7533_s4 + $0x8] sm:$0xff]  }
 0x461   :  { %5086 = vmatprep.subr.bf16.mxu1 %v2578_v51  ;;  %v3021_v39 = vsel %vm87_vm1, %v6901_v42, %v6908_v13 }
 0x462   :  { %3569 = vrot.lane.b32.xlu1 %v6564_v21, %s5800_s20  ;;  %3577 = vrot.lane.b32.xlu0 %v6570_v7, %s5800_s20 }
 0x464   :  { %5087 = vmatpush3.bf16.msra.mxu1 %v2578_v51  ;;  %v6923_v14 = vpop.permute.xlu1 %2991  ;;  %v6927_v27 = vpop.permute.xlu0 %2993 }
 0x465   :  { %5088 = vmatprep.subr.bf16.mxu1 %v2584_v18 }
 0x466   :  { %3579 = vrot.lane.b32.xlu1 %v6647_v35, %s5800_s20  ;;  %3575 = vrot.lane.b32.xlu0 %v6568_v34, %s5800_s20 }
 0x467   :  { %2695 = vmatmul.mubr.bf16.gmra.mrb[44].mxu1 %v5720_v63 }
 0x468   :  { %5089 = vmatpush3.bf16.msra.mxu1 %v2584_v18  ;;  %5092 = vmatprep.mubr.bf16.mxu1 %v5717_v9  ;;  %v6937_v60 = vpop.permute.xlu1 %2989  ;;  %v6944_v32 = vpop.permute.xlu0 %2997  ;;  %v5725_v9 = vld [vmem:[%s7533_s4 + $0x40] sm:$0xff]  }
 0x469   :  { %5090 = vmatprep.subr.bf16.mxu1 %v2590_v28 }
 0x46a   :  { %3819 = vrot.lane.b32.xlu1 %v6513_v43, %s5799_s19  ;;  %3821 = vrot.lane.b32.xlu0 %v6597_v56, %s5799_s19 }
 0x46c   :  { %5091 = vmatpush3.bf16.msra.mxu1 %v2590_v28  ;;  %v6953_v59 = vpop.permute.xlu1 %2999  ;;  %v6960_v31 = vpop.permute.xlu0 %2995  ;;  %v4353_v28 = vld [vmem:[%s7534_s5 + $0x8] sm:$0xff] }
 0x46d   :  { %2794 = vmatprep.subr.bf16.mxu1 %v6513_v43  ;;  %v3025_v30 = vsel %vm87_vm1, %v6944_v32, %v6953_v59 }
 0x46e   :  { %3817 = vrot.lane.b32.xlu1 %v6511_v45, %s5799_s19  ;;  %3825 = vrot.lane.b32.xlu0 %v6524_v44, %s5799_s19 }
 0x46f   :  { %5093 = vmatmul.mubr.bf16.vlgmr.msra.gmra.mrb[48].mxu1 %v5718_v6 }
 0x470   :  { %2795 = vmatpush1.bf16.msra.mxu1 %v6511_v45  ;;  %5096 = vmatprep.mubr.bf16.mxu1 %v5719_v11  ;;  %v6968_v36 = vpop.permute.xlu1 %3003  ;;  %v6978_v46 = vpop.permute.xlu0 %3005 }
 0x471   :  { %2796 = vmatprep.subr.bf16.mxu1 %v6524_v44  ;;  %v3027_v17 = vsel %vm87_vm1, %v6968_v36, %v6978_v46 }
 0x472   :  { %3827 = vrot.lane.b32.xlu1 %v6603_v40, %s5799_s19  ;;  %3823 = vrot.lane.b32.xlu0 %v6522_v19, %s5799_s19 }
 0x474   :  { %2797 = vmatpush1.bf16.msra.mxu1 %v6522_v19 }
 0x475   :  { %2798 = vmatprep.subr.bf16.mxu1 %v6535_v57 }
 0x476   :  { %3831 = vrot.lane.b32.xlu1 %v6535_v57, %s5799_s19  ;;  %3833 = vrot.lane.b32.xlu0 %v6609_v54, %s5799_s19 }
 0x477   :  { %5097 = vmatmul.mubr.bf16.gmra.mrb[52].mxu1 %v5720_v63  ;;  %v4357_v63 = vld [vmem:[%s7534_s5 + $0x28] sm:$0xff] }
 0x478   :  { %2799 = vmatpush1.bf16.msra.mxu1 %v6533_v61  ;;  %2826 = vmatprep.mubr.bf16.mxu1 %v7548_v41 }
 0x479   :  { %2800 = vmatprep.subr.bf16.mxu1 %v6546_v4 }
 0x47a   :  { %3829 = vrot.lane.b32.xlu1 %v6533_v61, %s5799_s19  ;;  %3837 = vrot.lane.b32.xlu0 %v6546_v4, %s5799_s19 }
 0x47c   :  { %2801 = vmatpush1.bf16.msra.mxu1 %v6544_v29 }
 0x47d   :  { %2802 = vmatprep.subr.bf16.mxu1 %v6555_v5 }
 0x47e   :  { %3839 = vrot.lane.b32.xlu1 %v6616_v2, %s5799_s19  ;;  %3835 = vrot.lane.b32.xlu0 %v6544_v29, %s5799_s19 }
 0x480   :  { %2803 = vmatpush1.bf16.msra.mxu1 %v6553_v8 }
 0x481   :  { %2804 = vmatprep.subr.bf16.mxu1 %v6562_v58 }
 0x482   :  { %3843 = vrot.lane.b32.xlu1 %v6555_v5, %s5799_s19  ;;  %3845 = vrot.lane.b32.xlu0 %v6623_v37, %s5799_s19 }
 0x484   :  { %2805 = vmatpush1.bf16.msra.mxu1 %v6560_v47 }
 0x485   :  { %2806 = vmatprep.subr.bf16.mxu1 %v6566_v20 }
 0x486   :  { %3841 = vrot.lane.b32.xlu1 %v6553_v8, %s5799_s19  ;;  %3849 = vrot.lane.b32.xlu0 %v6562_v58, %s5799_s19 }
 0x488   :  { %2807 = vmatpush1.bf16.msra.mxu1 %v6564_v21 }
 0x489   :  { %2808 = vmatprep.subr.bf16.mxu1 %v6570_v7 }
 0x48a   :  { %3851 = vrot.lane.b32.xlu1 %v6631_v23, %s5799_s19  ;;  %3847 = vrot.lane.b32.xlu0 %v6560_v47, %s5799_s19 }
 0x48c   :  { %2809 = vmatpush1.bf16.msra.mxu1 %v6568_v34 }
 0x48d   :  { %5100 = vmatprep.subr.bf16.mxu1 %v6597_v56 }
 0x48e   :  { %3855 = vrot.lane.b32.xlu1 %v6566_v20, %s5799_s19  ;;  %3857 = vrot.lane.b32.xlu0 %v6639_v62, %s5799_s19 }
 0x48f   :  { %2827 = vmatmul.mubr.bf16.vlgmr.msra.gmra.mrb[32].mxu1 %v5721_v25 }
 0x490   :  { %5101 = vmatpush3.bf16.msra.mxu1 %v6597_v56  ;;  %2836 = vmatprep.mubr.bf16.mxu1 %v7548_v41 }
 0x491   :  { %5102 = vmatprep.subr.bf16.mxu1 %v6603_v40 }
 0x492   :  { %3853 = vrot.lane.b32.xlu1 %v6564_v21, %s5799_s19  ;;  %3861 = vrot.lane.b32.xlu0 %v6570_v7, %s5799_s19 }
 0x494   :  { %5103 = vmatpush3.bf16.msra.mxu1 %v6603_v40 }
 0x495   :  { %5104 = vmatprep.subr.bf16.mxu1 %v6609_v54 }
 0x496   :  { %3863 = vrot.lane.b32.xlu1 %v6647_v35, %s5799_s19  ;;  %3859 = vrot.lane.b32.xlu0 %v6568_v34, %s5799_s19 }
 0x497   :  { %2837 = vmatmul.mubr.bf16.gmra.mrb[36].mxu1 %v5722_v16 }
 0x498   :  { %5105 = vmatpush3.bf16.msra.mxu1 %v6609_v54  ;;  %2846 = vmatprep.mubr.bf16.mxu1 %v7548_v41 }
 0x499   :  { %5106 = vmatprep.subr.bf16.mxu1 %v6616_v2 }
 0x49a   :  { %4103 = vrot.lane.b32.xlu1 %v6513_v43, %s5802_s25  ;;  %4105 = vrot.lane.b32.xlu0 %v6597_v56, %s5802_s25  ;;  %v6986_v43 = vpop.permute.xlu1 %3001  ;;  %v6991_v56 = vpop.permute.xlu0 %3009 }
 0x49c   :  { %5107 = vmatpush3.bf16.msra.mxu1 %v6616_v2 }
 0x49d   :  { %5108 = vmatprep.subr.bf16.mxu1 %v6623_v37 }
 0x49e   :  { %4101 = vrot.lane.b32.xlu1 %v6511_v45, %s5802_s25  ;;  %4109 = vrot.lane.b32.xlu0 %v6524_v44, %s5802_s25  ;;  %v5724_v45 = vld [vmem:[%s7533_s4 + $0x18] sm:$0xff]   ;;  %v7001_v44 = vpop.permute.xlu1 %3011 }
 0x49f   :  { %2847 = vmatmul.mubr.bf16.gmra.mrb[40].mxu1 %v5723_v38 }
 0x4a0   :  { %5109 = vmatpush3.bf16.msra.mxu1 %v6623_v37  ;;  %2856 = vmatprep.mubr.bf16.mxu1 %v7548_v41 }
 0x4a1   :  { %5110 = vmatprep.subr.bf16.mxu1 %v6631_v23 }
 0x4a2   :  { %4111 = vrot.lane.b32.xlu1 %v6603_v40, %s5802_s25  ;;  %4107 = vrot.lane.b32.xlu0 %v6522_v19, %s5802_s25  ;;  %v7008_v40 = vpop.permute.xlu0 %3007  ;;  %v7016_v19 = vpop.permute.xlu1 %3251 }
 0x4a4   :  { %5111 = vmatpush3.bf16.msra.mxu1 %v6631_v23 }
 0x4a5   :  { %5112 = vmatprep.subr.bf16.mxu1 %v6639_v62 }
 0x4a6   :  { %4115 = vrot.lane.b32.xlu1 %v6535_v57, %s5802_s25  ;;  %4117 = vrot.lane.b32.xlu0 %v6609_v54, %s5802_s25  ;;  %v3015_v57 = vsel %vm87_vm1, %v6846_v33, %v6851_v12  ;;  %v7022_v54 = vpop.permute.xlu0 %3253  ;;  %v7034_v51 = vpop.permute.xlu1 %3249 }
 0x4a7   :  { %2857 = vmatmul.mubr.bf16.gmra.mrb[44].mxu1 %v5724_v45 }
 0x4a8   :  { %5113 = vmatpush3.bf16.msra.mxu1 %v6639_v62  ;;  %5116 = vmatprep.mubr.bf16.mxu1 %v5721_v25 }
 0x4a9   :  { %5114 = vmatprep.subr.bf16.mxu1 %v6647_v35 }
 0x4aa   :  { %4113 = vrot.lane.b32.xlu1 %v6533_v61, %s5802_s25  ;;  %4121 = vrot.lane.b32.xlu0 %v6546_v4, %s5802_s25  ;;  %v3014_v61 = vsel %vm87_vm1, %v6857_v50, %v6846_v33  ;;  %v3017_v4 = vsel %vm87_vm1, %v6863_v24, %v6870_v1  ;;  %v4356_v33 = vld [vmem:[%s7534_s5 + $0x20] sm:$0xff] }
 0x4ac   :  { %5115 = vmatpush3.bf16.msra.mxu1 %v6647_v35 }
 0x4ad   :  { %3054 = vmatprep.subr.bf16.mxu1 %v3015_v57 }
 0x4ae   :  { %4123 = vrot.lane.b32.xlu1 %v6616_v2, %s5802_s25  ;;  %4119 = vrot.lane.b32.xlu0 %v6544_v29, %s5802_s25  ;;  %v3016_v29 = vsel %vm87_vm1, %v6874_v55, %v6863_v24  ;;  %v7043_v2 = vpop.permute.xlu0 %3257  ;;  %v4358_v24 = vld [vmem:[%s7534_s5 + $0x30] sm:$0xff]  ;;  %v4359_v55 = vld [vmem:[%s7534_s5 + $0x38] sm:$0xff] }
 0x4af   :  { %5117 = vmatmul.mubr.bf16.vlgmr.msra.gmra.mrb[48].mxu1 %v5722_v16 }
 0x4b0   :  { %3055 = vmatpush1.bf16.msra.mxu1 %v3014_v61  ;;  %5120 = vmatprep.mubr.bf16.mxu1 %v5723_v38 }
 0x4b1   :  { %3056 = vmatprep.subr.bf16.mxu1 %v3017_v4 }
 0x4b2   :  { %4127 = vrot.lane.b32.xlu1 %v6555_v5, %s5802_s25  ;;  %4129 = vrot.lane.b32.xlu0 %v6623_v37, %s5802_s25  ;;  %v3018_v5 = vsel %vm87_vm1, %v6897_v0, %v6881_v52  ;;  %v7055_v37 = vpop.permute.xlu1 %3259  ;;  %v7061_v53 = vpop.permute.xlu0 %3255 }
 0x4b4   :  { %3057 = vmatpush1.bf16.msra.mxu1 %v3016_v29 }
 0x4b5   :  { %3058 = vmatprep.subr.bf16.mxu1 %v3019_v22 }
 0x4b6   :  { %4125 = vrot.lane.b32.xlu1 %v6553_v8, %s5802_s25  ;;  %4133 = vrot.lane.b32.xlu0 %v6562_v58, %s5802_s25  ;;  %v3020_v8 = vsel %vm87_vm1, %v6915_v26, %v6901_v42  ;;  %v3023_v58 = vsel %vm87_vm1, %v6923_v14, %v6927_v27  ;;  %v7073_v18 = vpop.permute.xlu1 %3263  ;;  %v5727_v26 = vld [vmem:[%s7533_s4 + $0x50] sm:$0xff]  }
 0x4b7   :  { %5121 = vmatmul.mubr.bf16.gmra.mrb[52].mxu1 %v5724_v45 }
 0x4b8   :  { %3059 = vmatpush1.bf16.msra.mxu1 %v3018_v5  ;;  %3086 = vmatprep.mubr.bf16.mxu1 %v7548_v41 }
 0x4b9   :  { %3060 = vmatprep.subr.bf16.mxu1 %v3021_v39 }
 0x4ba   :  { %4135 = vrot.lane.b32.xlu1 %v6631_v23, %s5802_s25  ;;  %4131 = vrot.lane.b32.xlu0 %v6560_v47, %s5802_s25  ;;  %v3022_v47 = vsel %vm87_vm1, %v6937_v60, %v6923_v14  ;;  %v7082_v23 = vpop.permute.xlu0 %3265  ;;  %v5728_v14 = vld [vmem:[%s7533_s4 + $0x58] sm:$0xff]   ;;  %v3299_v60 = vsel %vm111_vm2, %v7016_v19, %v7022_v54 }
 0x4bc   :  { %3061 = vmatpush1.bf16.msra.mxu1 %v3020_v8 }
 0x4bd   :  { %3062 = vmatprep.subr.bf16.mxu1 %v3023_v58 }
 0x4be   :  { %4139 = vrot.lane.b32.xlu1 %v6566_v20, %s5802_s25  ;;  %4141 = vrot.lane.b32.xlu0 %v6639_v62, %s5802_s25  ;;  %v3024_v20 = vsel %vm87_vm1, %v6960_v31, %v6944_v32  ;;  %v7094_v62 = vpop.permute.xlu1 %3261  ;;  %v7099_v10 = vpop.permute.xlu0 %3269  ;;  %v3301_v31 = vsel %vm111_vm2, %v7043_v2, %v7055_v37 }
 0x4c0   :  { %3063 = vmatpush1.bf16.msra.mxu1 %v3022_v47  ;;  %v5729_v47 = vld [vmem:[%s7533_s4 + $0x60] sm:$0xff]  }
 0x4c1   :  { %3064 = vmatprep.subr.bf16.mxu1 %v3025_v30 }
 0x4c2   :  { %4137 = vrot.lane.b32.xlu1 %v6564_v21, %s5802_s25  ;;  %4145 = vrot.lane.b32.xlu0 %v6570_v7, %s5802_s25  ;;  %v3026_v21 = vsel %vm87_vm1, %v6986_v43, %v6968_v36  ;;  %v4352_v7 = vld [vmem:[%s7534_s5] sm:$0xff]  ;;  %v7117_v15 = vpop.permute.xlu1 %3271  ;;  %v7131_v6 = vpop.permute.xlu0 %3267  ;;  %v3300_v36 = vsel %vm111_vm2, %v7061_v53, %v7043_v2 }
 0x4c3   :  { %v3305_v45 = vsel %vm111_vm2, %v7099_v10, %v7117_v15 }
 0x4c4   :  { %3065 = vmatpush1.bf16.msra.mxu1 %v3024_v20 }
 0x4c5   :  { %3066 = vmatprep.subr.bf16.mxu1 %v3027_v17 }
 0x4c6   :  { %4147 = vrot.lane.b32.xlu1 %v6647_v35, %s5802_s25  ;;  %4143 = vrot.lane.b32.xlu0 %v6568_v34, %s5802_s25  ;;  %v3029_v35 = vsel %vm87_vm1, %v6991_v56, %v7001_v44  ;;  %v3028_v34 = vsel %vm87_vm1, %v7008_v40, %v6991_v56  ;;  %v7134_v11 = vpop.permute.xlu1 %3275  ;;  %v7145_v50 = vpop.permute.xlu0 %3277  ;;  %v3302_v56 = vsel %vm111_vm2, %v7094_v62, %v7073_v18  ;;  %v5730_v62 = vld [vmem:[%s7533_s4 + $0x68] sm:$0xff]  }
 0x4c7   :  { %v3304_v40 = vsel %vm111_vm2, %v7131_v6, %v7099_v10  ;;  %v3307_v57 = vsel %vm111_vm2, %v7134_v11, %v7145_v50 }
 0x4c8   :  { %3067 = vmatpush1.bf16.msra.mxu1 %v3026_v21  ;;  %v5731_v21 = vld [vmem:[%s7533_s4 + $0x70] sm:$0xff]  }
 0x4c9   :  { %3068 = vmatprep.subr.bf16.mxu1 %v3029_v35 }
 0x4ca   :  { %4362 = vperm.xlu1 %5525, %v4352_v7   ;;  %4367 = vperm.xlu0 %5524, %v4353_v28   ;;  %v3274_v52 = vpop.permute.xlu1 %3273  ;;  %v3282_v0 = vpop.permute.xlu0 %3281  ;;  %v5732_v28 = vld [vmem:[%s7533_s4 + $0x78] sm:$0xff]  }
 0x4cb   :  { %v3306_v61 = vsel %vm111_vm2, %v3274_v52, %v7134_v11 }
 0x4cc   :  { %3069 = vmatpush1.bf16.msra.mxu1 %v3028_v34 }
 0x4cd   :  { %5124 = vmatprep.subr.bf16.mxu1 %v6851_v12 }
 0x4ce   :  { %4372 = vperm.xlu1 %5525, %v4354_v48   ;;  %4377 = vperm.xlu0 %5524, %v4355_v3   ;;  %v7161_v42 = vpop.permute.xlu1 %3283 }
 0x4cf   :  { %3087 = vmatmul.mubr.bf16.vlgmr.msra.gmra.mrb[32].mxu1 %v5725_v9 }
 0x4d0   :  { %5125 = vmatpush3.bf16.msra.mxu1 %v6851_v12  ;;  %3096 = vmatprep.mubr.bf16.mxu1 %v7548_v41  ;;  %v5726_v12 = vld [vmem:[%s7533_s4 + $0x48] sm:$0xff]  }
 0x4d1   :  { %5126 = vmatprep.subr.bf16.mxu1 %v6870_v1 }
 0x4d2   :  { %4382 = vperm.xlu1 %5525, %v4356_v33   ;;  %4387 = vperm.xlu0 %5524, %v4357_v63  }
 0x4d4   :  { %5127 = vmatpush3.bf16.msra.mxu1 %v6870_v1  ;;  %v3280_v1 = vpop.permute.xlu0 %3279 }
 0x4d5   :  { %5128 = vmatprep.subr.bf16.mxu1 %v6888_v49  ;;  %v3308_v2 = vsel %vm111_vm2, %v3280_v1, %v3282_v0 }
 0x4d6   :  { %4392 = vperm.xlu1 %5525, %v4358_v24   ;;  %4397 = vperm.xlu0 %5524, %v4359_v55  }
 0x4d7   :  { %3097 = vmatmul.mubr.bf16.gmra.mrb[36].mxu1 %v5726_v12 }
 0x4d8   :  { %5129 = vmatpush3.bf16.msra.mxu1 %v6888_v49  ;;  %3106 = vmatprep.mubr.bf16.mxu1 %v7548_v41  ;;  %v3288_v49 = vpop.permute.xlu1 %3287  ;;  %v7174_v25 = vpop.permute.xlu0 %3289 }
 0x4d9   :  { %5130 = vmatprep.subr.bf16.mxu1 %v6908_v13  ;;  %v3311_v22 = vsel %vm111_vm2, %v3288_v49, %v7174_v25 }
 0x4dc   :  { %5131 = vmatpush3.bf16.msra.mxu1 %v6908_v13  ;;  %v3286_v13 = vpop.permute.xlu1 %3285 }
 0x4dd   :  { %5132 = vmatprep.subr.bf16.mxu1 %v6927_v27  ;;  %v3310_v39 = vsel %vm111_vm2, %v3286_v13, %v3288_v49 }
 0x4df   :  { %3107 = vmatmul.mubr.bf16.gmra.mrb[40].mxu1 %v5727_v26 }
 0x4e0   :  { %5133 = vmatpush3.bf16.msra.mxu1 %v6927_v27  ;;  %3116 = vmatprep.mubr.bf16.mxu1 %v7548_v41  ;;  %v3294_v27 = vpop.permute.xlu0 %3293  ;;  %v7184_v32 = vpop.permute.xlu1 %3295 }
 0x4e1   :  { %5134 = vmatprep.subr.bf16.mxu1 %v6953_v59  ;;  %v3313_v8 = vsel %vm111_vm2, %v3294_v27, %v7184_v32 }
 0x4e4   :  { %5135 = vmatpush3.bf16.msra.mxu1 %v6953_v59  ;;  %v3298_v59 = vsel %vm111_vm2, %v7034_v51, %v7016_v19  ;;  %v3292_v16 = vpop.permute.xlu0 %3291  ;;  %v7195_v38 = vpop.permute.xlu1 %3535  ;;  %v3309_v51 = vsel %vm111_vm2, %v3282_v0, %v7161_v42 }
 0x4e5   :  { %5136 = vmatprep.subr.bf16.mxu1 %v6978_v46  ;;  %v3312_v58 = vsel %vm111_vm2, %v3292_v16, %v3294_v27 }
 0x4e7   :  { %3117 = vmatmul.mubr.bf16.gmra.mrb[44].mxu1 %v5728_v14 }
 0x4e8   :  { %5137 = vmatpush3.bf16.msra.mxu1 %v6978_v46  ;;  %5140 = vmatprep.mubr.bf16.mxu1 %v5725_v9  ;;  %v3303_v46 = vsel %vm111_vm2, %v7073_v18, %v7082_v23  ;;  %v7200_v43 = vpop.permute.xlu0 %3537 }
 0x4e9   :  { %5138 = vmatprep.subr.bf16.mxu1 %v7001_v44  ;;  %v3583_v48 = vsel %vm135_vm4, %v7195_v38, %v7200_v43 }
 0x4ec   :  { %5139 = vmatpush3.bf16.msra.mxu1 %v7001_v44  ;;  %v7209_v44 = vpop.permute.xlu1 %3533  ;;  %v7214_v19 = vpop.permute.xlu0 %3541 }
 0x4ed   :  { %3338 = vmatprep.subr.bf16.mxu1 %v3299_v60  ;;  %v3582_v3 = vsel %vm135_vm4, %v7209_v44, %v7195_v38 }
 0x4ef   :  { %5141 = vmatmul.mubr.bf16.vlgmr.msra.gmra.mrb[48].mxu1 %v5726_v12 }
 0x4f0   :  { %3339 = vmatpush1.bf16.msra.mxu1 %v3298_v59  ;;  %5144 = vmatprep.mubr.bf16.mxu1 %v5727_v26  ;;  %v7221_v4 = vpop.permute.xlu1 %3543  ;;  %v7225_v29 = vpop.permute.xlu0 %3539 }
 0x4f1   :  { %3340 = vmatprep.subr.bf16.mxu1 %v3301_v31  ;;  %v3585_v6 = vsel %vm135_vm4, %v7214_v19, %v7221_v4  ;;  %v3584_v33 = vsel %vm135_vm4, %v7225_v29, %v7214_v19 }
 0x4f4   :  { %3341 = vmatpush1.bf16.msra.mxu1 %v3300_v36  ;;  %v7230_v5 = vpop.permute.xlu1 %3547  ;;  %v7233_v53 = vpop.permute.xlu0 %3549  ;;  %v5733_v36 = vld [vmem:[%s7533_s4 + $0x80] sm:$0xff]  }
 0x4f5   :  { %3342 = vmatprep.subr.bf16.mxu1 %v3303_v46  ;;  %v3587_v63 = vsel %vm135_vm4, %v7230_v5, %v7233_v53 }
 0x4f7   :  { %5145 = vmatmul.mubr.bf16.gmra.mrb[52].mxu1 %v5728_v14 }
 0x4f8   :  { %3343 = vmatpush1.bf16.msra.mxu1 %v3302_v56  ;;  %3370 = vmatprep.mubr.bf16.mxu1 %v7548_v41  ;;  %v3546_v18 = vpop.permute.xlu1 %3545  ;;  %v3554_v30 = vpop.permute.xlu0 %3553 }
 0x4f9   :  { %3344 = vmatprep.subr.bf16.mxu1 %v3305_v45  ;;  %v3586_v24 = vsel %vm135_vm4, %v3546_v18, %v7230_v5  ;;  %v5734_v45 = vld [vmem:[%s7533_s4 + $0x88] sm:$0xff]  }
 0x4fc   :  { %3345 = vmatpush1.bf16.msra.mxu1 %v3304_v40  ;;  %v7244_v20 = vpop.permute.xlu1 %3555  ;;  %v3552_v17 = vpop.permute.xlu0 %3551  ;;  %v5735_v40 = vld [vmem:[%s7533_s4 + $0x90] sm:$0xff]  }
 0x4fd   :  { %3346 = vmatprep.subr.bf16.mxu1 %v3307_v57  ;;  %v3589_v12 = vsel %vm135_vm4, %v3554_v30, %v7244_v20  ;;  %v3588_v52 = vsel %vm135_vm4, %v3552_v17, %v3554_v30 }
 0x500   :  { %3347 = vmatpush1.bf16.msra.mxu1 %v3306_v61  ;;  %v3560_v10 = vpop.permute.xlu1 %3559 }
 0x501   :  { %3348 = vmatprep.subr.bf16.mxu1 %v3309_v51 }
 0x504   :  { %3349 = vmatpush1.bf16.msra.mxu1 %v3308_v2  ;;  %v3558_v7 = vpop.permute.xlu1 %3557 }
 0x505   :  { %3350 = vmatprep.subr.bf16.mxu1 %v3311_v22  ;;  %v3590_v1 = vsel %vm135_vm4, %v3558_v7, %v3560_v10 }
 0x508   :  { %3351 = vmatpush1.bf16.msra.mxu1 %v3310_v39 }
 0x509   :  { %3352 = vmatprep.subr.bf16.mxu1 %v3313_v8 }
 0x50c   :  { %3353 = vmatpush1.bf16.msra.mxu1 %v3312_v58 }
 0x50d   :  { %5148 = vmatprep.subr.bf16.mxu1 %v7022_v54 }
 0x50f   :  { %3371 = vmatmul.mubr.bf16.vlgmr.msra.gmra.mrb[32].mxu1 %v5729_v47 }
 0x510   :  { %5149 = vmatpush3.bf16.msra.mxu1 %v7022_v54  ;;  %3380 = vmatprep.mubr.bf16.mxu1 %v7548_v41  ;;  %v7255_v54 = vpop.permute.xlu0 %3561 }
 0x511   :  { %5150 = vmatprep.subr.bf16.mxu1 %v7055_v37 }
 0x514   :  { %5151 = vmatpush3.bf16.msra.mxu1 %v7055_v37  ;;  %v3566_v37 = vpop.permute.xlu0 %3565 }
 0x515   :  { %5152 = vmatprep.subr.bf16.mxu1 %v7082_v23 }
 0x517   :  { %3381 = vmatmul.mubr.bf16.gmra.mrb[36].mxu1 %v5730_v62 }
 0x518   :  { %5153 = vmatpush3.bf16.msra.mxu1 %v7082_v23  ;;  %3390 = vmatprep.mubr.bf16.mxu1 %v7548_v41  ;;  %v7265_v23 = vpop.permute.xlu1 %3567  ;;  %v3564_v35 = vpop.permute.xlu0 %3563 }
 0x519   :  { %5154 = vmatprep.subr.bf16.mxu1 %v7117_v15  ;;  %v3593_v49 = vsel %vm135_vm4, %v3566_v37, %v7265_v23 }
 0x51c   :  { %5155 = vmatpush3.bf16.msra.mxu1 %v7117_v15  ;;  %v3572_v15 = vpop.permute.xlu1 %3571  ;;  %v7274_v34 = vpop.permute.xlu0 %3573 }
 0x51d   :  { %5156 = vmatprep.subr.bf16.mxu1 %v7145_v50  ;;  %v3595_v27 = vsel %vm135_vm4, %v3572_v15, %v7274_v34 }
 0x51f   :  { %3391 = vmatmul.mubr.bf16.gmra.mrb[40].mxu1 %v5731_v21 }
 0x520   :  { %5157 = vmatpush3.bf16.msra.mxu1 %v7145_v50  ;;  %3400 = vmatprep.mubr.bf16.mxu1 %v7548_v41  ;;  %v3570_v9 = vpop.permute.xlu1 %3569  ;;  %v3578_v11 = vpop.permute.xlu0 %3577 }
 0x521   :  { %5158 = vmatprep.subr.bf16.mxu1 %v7161_v42  ;;  %v3594_v60 = vsel %vm135_vm4, %v3570_v9, %v3572_v15 }
 0x524   :  { %5159 = vmatpush3.bf16.msra.mxu1 %v7161_v42  ;;  %v7292_v50 = vpop.permute.xlu1 %3579  ;;  %v3576_v55 = vpop.permute.xlu0 %3575  ;;  %v3591_v42 = vsel %vm135_vm4, %v3560_v10, %v7255_v54 }
 0x525   :  { %5160 = vmatprep.subr.bf16.mxu1 %v7174_v25  ;;  %v3597_v59 = vsel %vm135_vm4, %v3578_v11, %v7292_v50  ;;  %v3596_v31 = vsel %vm135_vm4, %v3576_v55, %v3578_v11  ;;  %v5737_v11 = vld [vmem:[%s7533_s4 + $0xa0] sm:$0xff]  }
 0x527   :  { %3401 = vmatmul.mubr.bf16.gmra.mrb[44].mxu1 %v5732_v28 }
 0x528   :  { %5161 = vmatpush3.bf16.msra.mxu1 %v7174_v25  ;;  %5164 = vmatprep.mubr.bf16.mxu1 %v5729_v47  ;;  %v7300_v0 = vpop.permute.xlu1 %3819  ;;  %v7304_v26 = vpop.permute.xlu0 %3821  ;;  %v3592_v25 = vsel %vm135_vm4, %v3564_v35, %v3566_v37 }
 0x529   :  { %5162 = vmatprep.subr.bf16.mxu1 %v7184_v32  ;;  %v3867_v22 = vsel %vm159_vm3, %v7300_v0, %v7304_v26 }
 0x52c   :  { %5163 = vmatpush3.bf16.msra.mxu1 %v7184_v32  ;;  %v3818_v14 = vpop.permute.xlu1 %3817  ;;  %v3826_v13 = vpop.permute.xlu0 %3825 }
 0x52d   :  { %3622 = vmatprep.subr.bf16.mxu1 %v3583_v48  ;;  %v3866_v39 = vsel %vm159_vm3, %v3818_v14, %v7300_v0  ;;  %v5739_v0 = vld [vmem:[%s7533_s4 + $0xb0] sm:$0xff]  }
 0x52f   :  { %5165 = vmatmul.mubr.bf16.vlgmr.msra.gmra.mrb[48].mxu1 %v5730_v62 }
 0x530   :  { %3623 = vmatpush1.bf16.msra.mxu1 %v3582_v3  ;;  %5168 = vmatprep.mubr.bf16.mxu1 %v5731_v21  ;;  %v7313_v32 = vpop.permute.xlu1 %3827  ;;  %v3824_v16 = vpop.permute.xlu0 %3823 }
 0x531   :  { %3624 = vmatprep.subr.bf16.mxu1 %v3585_v6  ;;  %v3868_v58 = vsel %vm159_vm3, %v3824_v16, %v3826_v13 }
 0x534   :  { %3625 = vmatpush1.bf16.msra.mxu1 %v3584_v33  ;;  %v3832_v38 = vpop.permute.xlu1 %3831  ;;  %v7322_v46 = vpop.permute.xlu0 %3833 }
 0x535   :  { %3626 = vmatprep.subr.bf16.mxu1 %v3587_v63  ;;  %v3871_v47 = vsel %vm159_vm3, %v3832_v38, %v7322_v46 }
 0x537   :  { %5169 = vmatmul.mubr.bf16.gmra.mrb[52].mxu1 %v5732_v28 }
 0x538   :  { %3627 = vmatpush1.bf16.msra.mxu1 %v3586_v24  ;;  %3654 = vmatprep.mubr.bf16.mxu1 %v7548_v41  ;;  %v3830_v56 = vpop.permute.xlu1 %3829  ;;  %v3838_v44 = vpop.permute.xlu0 %3837  ;;  %v5738_v24 = vld [vmem:[%s7533_s4 + $0xa8] sm:$0xff]  }
 0x539   :  { %3628 = vmatprep.subr.bf16.mxu1 %v3589_v12  ;;  %v3870_v30 = vsel %vm159_vm3, %v3830_v56, %v3832_v38 }
 0x53c   :  { %3629 = vmatpush1.bf16.msra.mxu1 %v3588_v52  ;;  %v3836_v19 = vpop.permute.xlu0 %3835 }
 0x53d   :  { %3630 = vmatprep.subr.bf16.mxu1 %v3591_v42  ;;  %v3872_v10 = vsel %vm159_vm3, %v3836_v19, %v3838_v44 }
 0x540   :  { %3631 = vmatpush1.bf16.msra.mxu1 %v3590_v1  ;;  %v7345_v61 = vpop.permute.xlu0 %3845  ;;  %v5740_v1 = vld [vmem:[%s7533_s4 + $0xb8] sm:$0xff]  }
 0x541   :  { %3632 = vmatprep.subr.bf16.mxu1 %v3593_v49 }
 0x544   :  { %3633 = vmatpush1.bf16.msra.mxu1 %v3592_v25  ;;  %v3850_v29 = vpop.permute.xlu0 %3849 }
 0x545   :  { %3634 = vmatprep.subr.bf16.mxu1 %v3595_v27 }
 0x548   :  { %3635 = vmatpush1.bf16.msra.mxu1 %v3594_v60  ;;  %v3848_v5 = vpop.permute.xlu0 %3847 }
 0x549   :  { %3636 = vmatprep.subr.bf16.mxu1 %v3597_v59  ;;  %v3876_v28 = vsel %vm159_vm3, %v3848_v5, %v3850_v29 }
 0x54c   :  { %3637 = vmatpush1.bf16.msra.mxu1 %v3596_v31  ;;  %v7365_v18 = vpop.permute.xlu0 %3857 }
 0x54d   :  { %5172 = vmatprep.subr.bf16.mxu1 %v7200_v43 }
 0x54f   :  { %3655 = vmatmul.mubr.bf16.vlgmr.msra.gmra.mrb[32].mxu1 %v5733_v36 }
 0x550   :  { %5173 = vmatpush3.bf16.msra.mxu1 %v7200_v43  ;;  %3664 = vmatprep.mubr.bf16.mxu1 %v7548_v41  ;;  %v7334_v43 = vpop.permute.xlu1 %3839  ;;  %v3862_v17 = vpop.permute.xlu0 %3861 }
 0x551   :  { %5174 = vmatprep.subr.bf16.mxu1 %v7221_v4  ;;  %v3873_v62 = vsel %vm159_vm3, %v3838_v44, %v7334_v43 }
 0x554   :  { %5175 = vmatpush3.bf16.msra.mxu1 %v7221_v4  ;;  %v3844_v57 = vpop.permute.xlu1 %3843  ;;  %v5736_v4 = vld [vmem:[%s7533_s4 + $0x98] sm:$0xff]   ;;  %v3860_v37 = vpop.permute.xlu0 %3859 }
 0x555   :  { %5176 = vmatprep.subr.bf16.mxu1 %v7233_v53  ;;  %v3880_v6 = vsel %vm159_vm3, %v3860_v37, %v3862_v17 }
 0x557   :  { %3665 = vmatmul.mubr.bf16.gmra.mrb[36].mxu1 %v5734_v45 }
 0x558   :  { %5177 = vmatpush3.bf16.msra.mxu1 %v7233_v53  ;;  %3674 = vmatprep.mubr.bf16.mxu1 %v7548_v41  ;;  %v3842_v51 = vpop.permute.xlu1 %3841  ;;  %v3869_v53 = vsel %vm159_vm3, %v3826_v13, %v7313_v32 }
 0x559   :  { %5178 = vmatprep.subr.bf16.mxu1 %v7244_v20  ;;  %v3874_v7 = vsel %vm159_vm3, %v3842_v51, %v3844_v57 }
 0x55c   :  { %5179 = vmatpush3.bf16.msra.mxu1 %v7244_v20  ;;  %v7354_v2 = vpop.permute.xlu1 %3851 }
 0x55d   :  { %5180 = vmatprep.subr.bf16.mxu1 %v7255_v54 }
 0x55f   :  { %3675 = vmatmul.mubr.bf16.gmra.mrb[40].mxu1 %v5735_v40 }
 0x560   :  { %5181 = vmatpush3.bf16.msra.mxu1 %v7255_v54  ;;  %3684 = vmatprep.mubr.bf16.mxu1 %v7548_v41  ;;  %v3856_v8 = vpop.permute.xlu1 %3855  ;;  %v3875_v54 = vsel %vm159_vm3, %v3844_v57, %v7345_v61 }
 0x561   :  { %5182 = vmatprep.subr.bf16.mxu1 %v7265_v23  ;;  %v3879_v15 = vsel %vm159_vm3, %v3856_v8, %v7365_v18 }
 0x564   :  { %5183 = vmatpush3.bf16.msra.mxu1 %v7265_v23  ;;  %v3854_v20 = vpop.permute.xlu1 %3853  ;;  %v3877_v23 = vsel %vm159_vm3, %v3850_v29, %v7354_v2 }
 0x565   :  { %5184 = vmatprep.subr.bf16.mxu1 %v7274_v34  ;;  %v3878_v48 = vsel %vm159_vm3, %v3854_v20, %v3856_v8  ;;  %v5741_v8 = vld [vmem:[%s7533_s4 + $0xc0] sm:$0xff]  }
 0x567   :  { %3685 = vmatmul.mubr.bf16.gmra.mrb[44].mxu1 %v5736_v4 }
 0x568   :  { %5185 = vmatpush3.bf16.msra.mxu1 %v7274_v34  ;;  %5188 = vmatprep.mubr.bf16.mxu1 %v5733_v36  ;;  %v3864_v21 = vpop.permute.xlu1 %3863  ;;  %v7382_v34 = vpop.permute.xlu0 %4105 }
 0x569   :  { %5186 = vmatprep.subr.bf16.mxu1 %v7292_v50  ;;  %v3881_v3 = vsel %vm159_vm3, %v3862_v17, %v3864_v21 }
 0x56c   :  { %5187 = vmatpush3.bf16.msra.mxu1 %v7292_v50  ;;  %v4104_v35 = vpop.permute.xlu1 %4103  ;;  %v4110_v33 = vpop.permute.xlu0 %4109 }
 0x56d   :  { %3906 = vmatprep.subr.bf16.mxu1 %v3867_v22  ;;  %v4151_v13 = vsel %vm183_vm5, %v4104_v35, %v7382_v34 }
 0x56f   :  { %5189 = vmatmul.mubr.bf16.vlgmr.msra.gmra.mrb[48].mxu1 %v5734_v45 }
 0x570   :  { %3907 = vmatpush1.bf16.msra.mxu1 %v3866_v39  ;;  %5192 = vmatprep.mubr.bf16.mxu1 %v5735_v40  ;;  %v4102_v9 = vpop.permute.xlu1 %4101  ;;  %v4108_v50 = vpop.permute.xlu0 %4107 }
 0x571   :  { %3908 = vmatprep.subr.bf16.mxu1 %v3869_v53  ;;  %v4150_v60 = vsel %vm183_vm5, %v4102_v9, %v4104_v35  ;;  %v4152_v16 = vsel %vm183_vm5, %v4108_v50, %v4110_v33 }
 0x574   :  { %3909 = vmatpush1.bf16.msra.mxu1 %v3868_v58  ;;  %v7391_v63 = vpop.permute.xlu1 %4111  ;;  %v7401_v12 = vpop.permute.xlu0 %4117  ;;  %v5742_v58 = vld [vmem:[%s7533_s4 + $0xc8] sm:$0xff]  }
 0x575   :  { %3910 = vmatprep.subr.bf16.mxu1 %v3871_v47  ;;  %v4153_v59 = vsel %vm183_vm5, %v4110_v33, %v7391_v63  ;;  %v5744_v47 = vld [vmem:[%s7533_s4 + $0xd8] sm:$0xff]  }
 0x577   :  { %5193 = vmatmul.mubr.bf16.gmra.mrb[52].mxu1 %v5736_v4 }
 0x578   :  { %3911 = vmatpush1.bf16.msra.mxu1 %v3870_v30  ;;  %3938 = vmatprep.mubr.bf16.mxu1 %v7548_v41  ;;  %v4116_v55 = vpop.permute.xlu1 %4115  ;;  %v4122_v42 = vpop.permute.xlu0 %4121 }
 0x579   :  { %3912 = vmatprep.subr.bf16.mxu1 %v3873_v62  ;;  %v4155_v36 = vsel %vm183_vm5, %v4116_v55, %v7401_v12 }
 0x57c   :  { %3913 = vmatpush1.bf16.msra.mxu1 %v3872_v10  ;;  %v4114_v52 = vpop.permute.xlu1 %4113  ;;  %v4120_v49 = vpop.permute.xlu0 %4119 }
 0x57d   :  { %3914 = vmatprep.subr.bf16.mxu1 %v3875_v54  ;;  %v4156_v44 = vsel %vm183_vm5, %v4120_v49, %v4122_v42 }
 0x580   :  { %3915 = vmatpush1.bf16.msra.mxu1 %v3874_v7  ;;  %v7422_v25 = vpop.permute.xlu0 %4129 }
 0x581   :  { %3916 = vmatprep.subr.bf16.mxu1 %v3877_v23 }
 0x584   :  { %3917 = vmatpush1.bf16.msra.mxu1 %v3876_v28 }
 0x585   :  { %3918 = vmatprep.subr.bf16.mxu1 %v3879_v15 }
 0x588   :  { %3919 = vmatpush1.bf16.msra.mxu1 %v3878_v48 }
 0x589   :  { %3920 = vmatprep.subr.bf16.mxu1 %v3881_v3 }
 0x58c   :  { %3921 = vmatpush1.bf16.msra.mxu1 %v3880_v6 }
 0x58d   :  { %5196 = vmatprep.subr.bf16.mxu1 %v7304_v26 }
 0x58f   :  { %3939 = vmatmul.mubr.bf16.vlgmr.msra.gmra.mrb[32].mxu1 %v5737_v11 }
 0x590   :  { %5197 = vmatpush3.bf16.msra.mxu1 %v7304_v26  ;;  %3948 = vmatprep.mubr.bf16.mxu1 %v7548_v41  ;;  %v7413_v26 = vpop.permute.xlu1 %4123 }
 0x591   :  { %5198 = vmatprep.subr.bf16.mxu1 %v7313_v32  ;;  %v4157_v56 = vsel %vm183_vm5, %v4122_v42, %v7413_v26 }
 0x594   :  { %5199 = vmatpush3.bf16.msra.mxu1 %v7313_v32  ;;  %v4128_v14 = vpop.permute.xlu1 %4127  ;;  %v4134_v32 = vpop.permute.xlu0 %4133 }
 0x595   :  { %5200 = vmatprep.subr.bf16.mxu1 %v7322_v46  ;;  %v4159_v40 = vsel %vm183_vm5, %v4128_v14, %v7422_v25 }
 0x597   :  { %3949 = vmatmul.mubr.bf16.gmra.mrb[36].mxu1 %v5738_v24 }
 0x598   :  { %5201 = vmatpush3.bf16.msra.mxu1 %v7322_v46  ;;  %3958 = vmatprep.mubr.bf16.mxu1 %v7548_v41  ;;  %v4126_v27 = vpop.permute.xlu1 %4125  ;;  %v4132_v38 = vpop.permute.xlu0 %4131  ;;  %v4154_v46 = vsel %vm183_vm5, %v4114_v52, %v4116_v55 }
 0x599   :  { %5202 = vmatprep.subr.bf16.mxu1 %v7334_v43  ;;  %v4158_v19 = vsel %vm183_vm5, %v4126_v27, %v4128_v14  ;;  %v4160_v51 = vsel %vm183_vm5, %v4132_v38, %v4134_v32 }
 0x59c   :  { %5203 = vmatpush3.bf16.msra.mxu1 %v7334_v43  ;;  %v4136_v31 = vpop.permute.xlu1 %4135  ;;  %v4142_v43 = vpop.permute.xlu0 %4141 }
 0x59d   :  { %5204 = vmatprep.subr.bf16.mxu1 %v7345_v61 }
 0x59f   :  { %3959 = vmatmul.mubr.bf16.gmra.mrb[40].mxu1 %v5739_v0 }
 0x5a0   :  { %5205 = vmatpush3.bf16.msra.mxu1 %v7345_v61  ;;  %3968 = vmatprep.mubr.bf16.mxu1 %v7548_v41  ;;  %v4140_v45 = vpop.permute.xlu1 %4139  ;;  %v4161_v61 = vsel %vm183_vm5, %v4134_v32, %v4136_v31  ;;  %v4146_v4 = vpop.permute.xlu0 %4145 }
 0x5a1   :  { %5206 = vmatprep.subr.bf16.mxu1 %v7354_v2  ;;  %v4163_v29 = vsel %vm183_vm5, %v4140_v45, %v4142_v43 }
 0x5a4   :  { %5207 = vmatpush3.bf16.msra.mxu1 %v7354_v2  ;;  %v4138_v57 = vpop.permute.xlu1 %4137  ;;  %v4144_v5 = vpop.permute.xlu0 %4143 }
 0x5a5   :  { %5208 = vmatprep.subr.bf16.mxu1 %v7365_v18  ;;  %v4162_v22 = vsel %vm183_vm5, %v4138_v57, %v4140_v45  ;;  %v4164_v53 = vsel %vm183_vm5, %v4144_v5, %v4146_v4 }
 0x5a7   :  { %3969 = vmatmul.mubr.bf16.gmra.mrb[44].mxu1 %v5740_v1 }
 0x5a8   :  { %5209 = vmatpush3.bf16.msra.mxu1 %v7365_v18  ;;  %5212 = vmatprep.mubr.bf16.mxu1 %v5737_v11  ;;  %v4148_v2 = vpop.permute.xlu1 %4147  ;;  %v5743_v18 = vld [vmem:[%s7533_s4 + $0xd0] sm:$0xff]   ;;  %v7474_v17 = vpop.permute.xlu0 %4367  ;;  %s5804_s4 = smov [#allocation5]  }
 0x5a9   :  { %5210 = vmatprep.subr.bf16.mxu1 %v3864_v21  ;;  %v4165_v39 = vsel %vm183_vm5, %v4146_v4, %v4148_v2  ;;  %s4576_s19 = sshll.u32 %s5804_s4, 4  ;;  %s4577_s19 = int_to_ptr.vmem [resolvable:$true] %s4576_s19 }
 0x5aa   :  { %s5767_s22 = scalar_lea.vmem %s4577_s19, 1536  ;;  %p5772_p9 = scmp.lt.s32.totalorder %s4577_s19, %s4577_s19 }
 0x5ab   :  { %p5768_p8 = scmp.ne.s32.totalorder %s4577_s19, %s5767_s22  ;;  %p5773_p10 = scmp.lt.s32.totalorder %s5767_s22, %s5767_s22 }
 0x5ac   :  { %5211 = vmatpush3.bf16.msra.mxu1 %v3864_v21  ;;  %v7471_v30 = vpop.permute.xlu1 %4362 }
 0x5ad   :  { %4190 = vmatprep.subr.bf16.mxu1 %v4151_v13  ;;  %p5774_p11 = por %p5773_p10, %p5772_p9 }
 0x5af   :  { %5213 = vmatmul.mubr.bf16.vlgmr.msra.gmra.mrb[48].mxu1 %v5738_v24  ;;  %p5775_p12 = pnand %p5774_p11, %p5768_p8 }
 0x5b0   :  { %4191 = vmatpush1.bf16.msra.mxu1 %v4150_v60  ;;  %5216 = vmatprep.mubr.bf16.mxu1 %v5739_v0  ;;  %v4373_v3 = vpop.permute.xlu1 %4372 }
 0x5b1   :  { %4192 = vmatprep.subr.bf16.mxu1 %v4153_v59 }
 0x5b4   :  { %4193 = vmatpush1.bf16.msra.mxu1 %v4152_v16 }
 0x5b5   :  { %4194 = vmatprep.subr.bf16.mxu1 %v4155_v36 }
 0x5b7   :  { %5217 = vmatmul.mubr.bf16.gmra.mrb[52].mxu1 %v5740_v1 }
 0x5b8   :  { %4195 = vmatpush1.bf16.msra.mxu1 %v4154_v46  ;;  %4222 = vmatprep.mubr.bf16.mxu1 %v7548_v41 }
 0x5b9   :  { %4196 = vmatprep.subr.bf16.mxu1 %v4157_v56 }
 0x5bc   :  { %4197 = vmatpush1.bf16.msra.mxu1 %v4156_v44 }
 0x5bd   :  { %4198 = vmatprep.subr.bf16.mxu1 %v4159_v40 }
 0x5c0   :  { %4199 = vmatpush1.bf16.msra.mxu1 %v4158_v19 }
 0x5c1   :  { %4200 = vmatprep.subr.bf16.mxu1 %v4161_v61 }
 0x5c4   :  { %4201 = vmatpush1.bf16.msra.mxu1 %v4160_v51 }
 0x5c5   :  { %4202 = vmatprep.subr.bf16.mxu1 %v4163_v29 }
 0x5c8   :  { %4203 = vmatpush1.bf16.msra.mxu1 %v4162_v22 }
 0x5c9   :  { %4204 = vmatprep.subr.bf16.mxu1 %v4165_v39 }
 0x5cc   :  { %4205 = vmatpush1.bf16.msra.mxu1 %v4164_v53 }
 0x5cd   :  { %5220 = vmatprep.subr.bf16.mxu1 %v7382_v34 }
 0x5cf   :  { %4223 = vmatmul.mubr.bf16.vlgmr.msra.gmra.mrb[32].mxu1 %v5741_v8 }
 0x5d0   :  { %5221 = vmatpush3.bf16.msra.mxu1 %v7382_v34  ;;  %4232 = vmatprep.mubr.bf16.mxu1 %v7548_v41 }
 0x5d1   :  { %5222 = vmatprep.subr.bf16.mxu1 %v7391_v63 }
 0x5d4   :  { %5223 = vmatpush3.bf16.msra.mxu1 %v7391_v63  ;;  %v4378_v63 = vpop.permute.xlu0 %4377 }
 0x5d5   :  { %5224 = vmatprep.subr.bf16.mxu1 %v7401_v12 }
 0x5d7   :  { %4233 = vmatmul.mubr.bf16.gmra.mrb[36].mxu1 %v5742_v58 }
 0x5d8   :  { %5225 = vmatpush3.bf16.msra.mxu1 %v7401_v12  ;;  %4242 = vmatprep.mubr.bf16.mxu1 %v7548_v41  ;;  %v7490_v59 = vpop.permute.xlu0 %4387 }
 0x5d9   :  { %5226 = vmatprep.subr.bf16.mxu1 %v7413_v26 }
 0x5dc   :  { %5227 = vmatpush3.bf16.msra.mxu1 %v7413_v26 }
 0x5dd   :  { %5228 = vmatprep.subr.bf16.mxu1 %v7422_v25 }
 0x5df   :  { %4243 = vmatmul.mubr.bf16.gmra.mrb[40].mxu1 %v5743_v18 }
 0x5e0   :  { %5229 = vmatpush3.bf16.msra.mxu1 %v7422_v25  ;;  %4252 = vmatprep.mubr.bf16.mxu1 %v7548_v41  ;;  %v7485_v25 = vpop.permute.xlu1 %4382 }
 0x5e1   :  { %5230 = vmatprep.subr.bf16.mxu1 %v4136_v31 }
 0x5e4   :  { %5231 = vmatpush3.bf16.msra.mxu1 %v4136_v31  ;;  %v4393_v57 = vpop.permute.xlu1 %4392 }
 0x5e5   :  { %5232 = vmatprep.subr.bf16.mxu1 %v4142_v43 }
 0x5e7   :  { %4253 = vmatmul.mubr.bf16.gmra.mrb[44].mxu1 %v5744_v47 }
 0x5e8   :  { %5233 = vmatpush3.bf16.msra.mxu1 %v4142_v43  ;;  %5236 = vmatprep.mubr.bf16.mxu1 %v5741_v8 }
 0x5e9   :  { %5234 = vmatprep.subr.bf16.mxu1 %v4148_v2 }
 0x5ec   :  { %5235 = vmatpush3.bf16.msra.mxu1 %v4148_v2  ;;  %v4398_v2 = vpop.permute.xlu0 %4397 }
 0x5ef   :  { %5237 = vmatmul.mubr.bf16.vlgmr.msra.gmra.mrb[48].mxu1 %v5742_v58 }
 0x5f0   :  { %5240 = vmatprep.mubr.bf16.mxu1 %v5743_v18 }
 0x5f7   :  { %5241 = vmatmul.mubr.bf16.gmra.mrb[52].mxu1 %v5744_v47 }
 0x6a2   :  { %v4224_v20 = vpop.f32.mrb[32].mxu1 }
 0x6a3   :  { %v4400_v41 = vadd.f32 %v7471_v30, %v4224_v20  ;;  %v4226_v62 = vpop.f32.mrb[33].mxu1 }
 0x6a4   :  { %v4401_v10 = vadd.f32 %v7471_v30, %v4226_v62  ;;  %v4228_v54 = vpop.f32.mrb[34].mxu1 }
 0x6a5   :  { %v4424_v21 = vmax.f32 %v4400_v41, 0.0  ;;  %v4403_v7 = vadd.f32 %v7474_v17, %v4228_v54  ;;  %v4230_v37 = vpop.f32.mrb[35].mxu1 }
 0x6a6   :  { %v4425_v23 = vmax.f32 %v4401_v10, 0.0  ;;  %v4404_v28 = vadd.f32 %v7474_v17, %v4230_v37 }
 0x6a7   :  { %v4427_v35 = vmax.f32 %v4403_v7, 0.0 }
 0x6a8   :  { %v4860_v15 = vpack.c.bf16 %v4425_v23, %v4424_v21  ;;  %v4428_v34 = vmax.f32 %v4404_v28, 0.0 }
 0x6a9   :  { %v7479_v48 = vpack.c.bf16 %v4427_v35, %v4424_v21 }
 0x6aa   :  { %4558 = vst [vmem:[#allocation5] sm:$0xff] %v4860_v15  ;;  %v7481_v9 = vpack.c.bf16 %v4428_v34, %v4425_v23  ;;  %v4234_v6 = vpop.f32.mrb[36].mxu1 }
 0x6ab   :  { %v4406_v11 = vadd.f32 %v4373_v3, %v4234_v6  ;;  %v4236_v33 = vpop.f32.mrb[37].mxu1 }
 0x6ac   :  { %v4407_v50 = vadd.f32 %v4373_v3, %v4236_v33  ;;  %v4238_v24 = vpop.f32.mrb[38].mxu1 }
 0x6ad   :  { %v4430_v55 = vmax.f32 %v4406_v11, 0.0  ;;  %v4409_v12 = vadd.f32 %v4378_v63, %v4238_v24  ;;  %v4240_v52 = vpop.f32.mrb[39].mxu1  ;;  %v4463_v24 = vrot.slane %v7479_v48, 4  ;;  %v4464_v48 = vrot.slane %v7481_v9, 4 }
 0x6ae   :  { %v4431_v0 = vmax.f32 %v4407_v50, 0.0  ;;  %v4410_v42 = vadd.f32 %v4378_v63, %v4240_v52 }
 0x6af   :  { %v4433_v26 = vmax.f32 %v4409_v12, 0.0 }
 0x6b0   :  { %v4861_v1 = vpack.c.bf16 %v4431_v0, %v4430_v55  ;;  %v4434_v49 = vmax.f32 %v4410_v42, 0.0 }
 0x6b1   :  { %v7483_v14 = vpack.c.bf16 %v4433_v26, %v4430_v55 }
 0x6b2   :  { %4561 = vst [vmem:[#allocation5 + $0x18] sm:$0xff] %v4861_v1  ;;  %v7487_v13 = vpack.c.bf16 %v4434_v49, %v4431_v0  ;;  %v4244_v27 = vpop.f32.mrb[40].mxu1 }
 0x6b3   :  { %v4412_v60 = vadd.f32 %v7485_v25, %v4244_v27  ;;  %v4246_v32 = vpop.f32.mrb[41].mxu1  ;;  %v4469_v55 = vrot.slane %v7483_v14, 4 }
 0x6b4   :  { %v4413_v16 = vadd.f32 %v7485_v25, %v4246_v32  ;;  %v4248_v31 = vpop.f32.mrb[42].mxu1  ;;  %v4470_v52 = vrot.slane %v7487_v13, 4 }
 0x6b5   :  { %v4436_v36 = vmax.f32 %v4412_v60, 0.0  ;;  %v4415_v38 = vadd.f32 %v7490_v59, %v4248_v31  ;;  %v4250_v46 = vpop.f32.mrb[43].mxu1 }
 0x6b6   :  { %v4437_v56 = vmax.f32 %v4413_v16, 0.0  ;;  %v4416_v45 = vadd.f32 %v7490_v59, %v4250_v46 }
 0x6b7   :  { %v4439_v44 = vmax.f32 %v4415_v38, 0.0 }
 0x6b8   :  { %v4862_v43 = vpack.c.bf16 %v4437_v56, %v4436_v36  ;;  %v4440_v40 = vmax.f32 %v4416_v45, 0.0 }
 0x6b9   :  { %v7495_v19 = vpack.c.bf16 %v4439_v44, %v4436_v36 }
 0x6ba   :  { %4564 = vst [vmem:[#allocation5 + $0x30] sm:$0xff] %v4862_v43  ;;  %v7497_v61 = vpack.c.bf16 %v4440_v40, %v4437_v56  ;;  %v4254_v4 = vpop.f32.mrb[44].mxu1 }
 0x6bb   :  { %v4418_v51 = vadd.f32 %v4393_v57, %v4254_v4  ;;  %v4256_v29 = vpop.f32.mrb[45].mxu1  ;;  %v4475_v40 = vrot.slane %v7495_v19, 4 }
 0x6bc   :  { %v4419_v22 = vadd.f32 %v4393_v57, %v4256_v29  ;;  %v4258_v5 = vpop.f32.mrb[46].mxu1 }
 0x6bd   :  { %v4442_v39 = vmax.f32 %v4418_v51, 0.0  ;;  %v4421_v53 = vadd.f32 %v4398_v2, %v4258_v5  ;;  %v4260_v8 = vpop.f32.mrb[47].mxu1 }
 0x6be   :  { %v4443_v58 = vmax.f32 %v4419_v22, 0.0  ;;  %v4422_v18 = vadd.f32 %v4398_v2, %v4260_v8  ;;  %v4476_v22 = vrot.slane %v7497_v61, 4 }
 0x6bf   :  { %v4445_v47 = vmax.f32 %v4421_v53, 0.0 }
 0x6c0   :  { %v4863_v20 = vpack.c.bf16 %v4443_v58, %v4442_v39  ;;  %v4446_v41 = vmax.f32 %v4422_v18, 0.0 }
 0x6c1   :  { %v4457_v62 = vpack.c.bf16 %v4445_v47, %v4442_v39 }
 0x6c2   :  { %4567 = vst [vmem:[#allocation5 + $0x48] sm:$0xff] %v4863_v20  ;;  %v4458_v10 = vpack.c.bf16 %v4446_v41, %v4443_v58  ;;  %v5238_v54 = vpop.f32.mrb[48].mxu1 }
 0x6c3   :  { %v4408_v21 = vadd.f32 %v5238_v54, %v4373_v3  ;;  %v4297_v7 = vpop.f32.mrb[49].mxu1  ;;  %v4481_v44 = vrot.slane %v4457_v62, 4 }
 0x6c4   :  { %v4402_v37 = vadd.f32 %v7471_v30, %v4297_v7  ;;  %v5239_v23 = vpop.f32.mrb[50].mxu1  ;;  %v4482_v51 = vrot.slane %v4458_v10, 4 }
 0x6c5   :  { %v4411_v28 = vadd.f32 %v5239_v23, %v4378_v63  ;;  %v4300_v35 = vpop.f32.mrb[51].mxu1  ;;  %v4432_v34 = vmax.f32 %v4408_v21, 0.0 }
 0x6c6   :  { %v4405_v15 = vadd.f32 %v7474_v17, %v4300_v35  ;;  %v4426_v11 = vmax.f32 %v4402_v37, 0.0 }
 0x6c7   :  { %v4435_v6 = vmax.f32 %v4411_v28, 0.0 }
 0x6c8   :  { %v4429_v33 = vmax.f32 %v4405_v15, 0.0 }
 0x6c9   :  { %v4453_v50 = vpack.c.bf16 %v4435_v6, %v4432_v34 }
 0x6ca   :  { %v4450_v12 = vpack.c.bf16 %v4429_v33, %v4426_v11  ;;  %v5242_v3 = vpop.f32.mrb[52].mxu1 }
 0x6cb   :  { %v4471_v30 = vrot.slane %v4453_v50, 4  ;;  %v4491_v63 = vsel %vm4484_vm9, %v4453_v50, 0  ;;  %v4420_v0 = vadd.f32 %v5242_v3, %v4393_v57  ;;  %v4313_v42 = vpop.f32.mrb[53].mxu1 }
 0x6cc   :  { %v4852_v17 = vcombine.low %v4491_v63, %v4469_v55  ;;  %v4465_v26 = vrot.slane %v4450_v12, 4  ;;  %v4487_v1 = vsel %vm4484_vm9, %v4450_v12, 0  ;;  %v4414_v49 = vadd.f32 %v7485_v25, %v4313_v42  ;;  %v5243_v27 = vpop.f32.mrb[54].mxu1 }
 0x6cd   :  { %v4493_v14 = vsel %vm4484_vm9, %v4471_v30, 0  ;;  %v4849_v60 = vcombine.low %v4487_v1, %v4463_v24  ;;  %v4423_v32 = vadd.f32 %v5243_v27, %v4398_v2  ;;  %v4316_v16 = vpop.f32.mrb[55].mxu1  ;;  %v4444_v46 = vmax.f32 %v4420_v0, 0.0 }
 0x6ce   :  { %v4853_v13 = vcombine.low %v4470_v52, %v4493_v14  ;;  %4562 = vst [vmem:[#allocation5 + $0x20] sm:$0xff] %v4852_v17  ;;  %v4489_v31 = vsel %vm4484_vm9, %v4465_v26, 0  ;;  %v4417_v36 = vadd.f32 %v7490_v59, %v4316_v16  ;;  %v4438_v25 = vmax.f32 %v4414_v49, 0.0 }
 0x6cf   :  { %v4850_v38 = vcombine.low %v4464_v48, %v4489_v31  ;;  %4559 = vst [vmem:[#allocation5 + $0x8] sm:$0xff] %v4849_v60  ;;  %v4447_v56 = vmax.f32 %v4423_v32, 0.0 }
 0x6d0   :  { %4563 = vst [vmem:[#allocation5 + $0x28] sm:$0xff] %v4853_v13  ;;  %v4441_v45 = vmax.f32 %v4417_v36, 0.0 }
 0x6d1   :  { %4560 = vst [vmem:[#allocation5 + $0x10] sm:$0xff] %v4850_v38  ;;  %v4459_v9 = vpack.c.bf16 %v4447_v56, %v4444_v46 }
 0x6d2   :  { %v4456_v43 = vpack.c.bf16 %v4441_v45, %v4438_v25 }
 0x6d3   :  { %v4483_v57 = vrot.slane %v4459_v9, 4  ;;  %v4499_v4 = vsel %vm4484_vm9, %v4459_v9, 0 }
 0x6d4   :  { %v4858_v29 = vcombine.low %v4499_v4, %v4481_v44  ;;  %v4477_v2 = vrot.slane %v4456_v43, 4  ;;  %v4495_v59 = vsel %vm4484_vm9, %v4456_v43, 0 }
 0x6d5   :  { %v4501_v5 = vsel %vm4484_vm9, %v4483_v57, 0  ;;  %v4855_v39 = vcombine.low %v4495_v59, %v4475_v40 }
 0x6d6   :  { %v4859_v53 = vcombine.low %v4482_v51, %v4501_v5  ;;  %4568 = vst [vmem:[#allocation5 + $0x50] sm:$0xff] %v4858_v29  ;;  %v4497_v8 = vsel %vm4484_vm9, %v4477_v2, 0 }
 0x6d7   :  { %v4856_v19 = vcombine.low %v4476_v22, %v4497_v8  ;;  %4565 = vst [vmem:[#allocation5 + $0x38] sm:$0xff] %v4855_v39 }
 0x6d8   :  { %4569 = vst [vmem:[#allocation5 + $0x58] sm:$0xff] %v4859_v53 }
 0x6d9   :  { %4566 = vst [vmem:[#allocation5 + $0x40] sm:$0xff] %v4856_v19 }
 0x6da   :  { %5778 = shalt.err (!%p5775_p12)
}
 0x6db   :  { %s5779_s26 = scalar_lea.hbm %s7535_s6, 1536 }
 0x6dc   :  { %p5780_p13 = scmp.ne.s32.totalorder %s7535_s6, %s5779_s26  ;;  %p5783_p0 = scmp.lt.u32.totalorder %s5779_s26, %s7535_s6 }
 0x6de   :  { %p5785_p1 = pnand %p5783_p0, %p5780_p13 }
 0x6e0   :  { %5788 = shalt.err (!%p5785_p1)
}
 0x6e1   :  { %4579 = dma.vmem_to_hbm [thread:$0]  %s4577_s19, 1536, %s7535_s6, [#allocation4]  }
 0x6e2   :  { %5791 = dma.done.wait [#allocation4], 1536  }
 0x6e3   :  { %5792 = vsyncadd [#allocation4], 4294965760 }
 0x6e4   :  { %4583 = vsyncpa [#allocation3], 1 }
 0x6e5   :  { %4584 = vsyncpa [#allocation4], 1 }

</bundles_post_ra>
